<compile_context>
chip_gen: v5e
topology: v5e:2x2
jax: 0.10.0
libtpu: 0.0.40
codegen_flags: <defaults>
</compile_context>

<pallas_src>
import jax
import jax.numpy as jnp
from jax import lax
from jax.experimental import pallas as pl
from jax.experimental.pallas import tpu as pltpu

EPS = 1e-5
LANE = 128


def _rup(n, m):
    return (n + m - 1) // m * m


# ----------------------------- Pallas kernels ------------------------------ #

def _make_conv_kernel(taps, Ho, Wo, with_pre):
    """Conv = sum of shifted-window matmuls, plus per-channel (sum, sum_sq).

    refs:
      planes_ref : (P, PH, PW, Ci)  bf16  all planes of one image (VMEM tile)
      w_ref      : (T, Ci, Co)      bf16  one (Ci, Co) matrix per conv tap
      [sc_ref, sh_ref : (1, Ci) f32]      optional BN+ReLU applied to every
                                          input window (used for conv2)
      z_ref      : (M, Co)                conv output rows, M = Ho*Wo
      st_ref     : (2, Co)          f32   [sum(z); sum(z*z)] for this image
      acc_ref    : (M, Co)          f32   VMEM scratch accumulator
    """
    M = Ho * Wo

    def body(planes_ref, w_ref, z_ref, st_ref, acc_ref, pre):
        acc_ref[...] = jnp.zeros_like(acc_ref)
        for (p, di, dj, t) in taps:              # static Python unroll (<= 9)
            win = planes_ref[p, di:di + Ho, dj:dj + Wo, :]    # (Ho, Wo, Ci)
            if pre is not None:
                win = pre(win)
            lhs = win.astype(jnp.bfloat16).reshape(M, win.shape[-1])
            acc_ref[...] += jnp.dot(lhs, w_ref[t],
                                    preferred_element_type=jnp.float32)
        acc = acc_ref[...]
        z_ref[...] = acc.astype(z_ref.dtype)
        # one pass over acc: per-channel sum and sum-of-squares (f32)
        st_ref[...] = jnp.concatenate(
            [jnp.sum(acc, axis=0, keepdims=True),
             jnp.sum(acc * acc, axis=0, keepdims=True)], axis=0)

    if with_pre:
        def kernel(planes_ref, w_ref, sc_ref, sh_ref, z_ref, st_ref, acc_ref):
            sc = sc_ref[...].reshape(1, 1, -1)
            sh = sh_ref[...].reshape(1, 1, -1)
            pre = lambda v: jnp.maximum(v.astype(jnp.float32) * sc + sh, 0.0)
            body(planes_ref, w_ref, z_ref, st_ref, acc_ref, pre)
    else:
        def kernel(planes_ref, w_ref, z_ref, st_ref, acc_ref):
            body(planes_ref, w_ref, z_ref, st_ref, acc_ref, None)
    return kernel


def _conv_stats(planes, w_taps, taps, Ho, Wo, out_dtype, bn_pre=None):
    """planes: (N, P, PH, PW, Ci) bf16, w_taps: (T, Ci, Co) bf16.
    Returns z: (N, Ho*Wo, Co) out_dtype and per-image stats: (N, 2, Co) f32."""
    N, P, PH, PW, Ci = planes.shape
    planes = planes.reshape(N * P, PH, PW, Ci)
    T, _, Co = w_taps.shape
    M = Ho * Wo

    kernel = _make_conv_kernel(taps, Ho, Wo, with_pre=bn_pre is not None)

    in_specs = [pl.BlockSpec((P, PH, PW, Ci), lambda n: (n, 0, 0, 0)),
                pl.BlockSpec((T, Ci, Co), lambda n: (0, 0, 0))]
    args = [planes, w_taps]
    if bn_pre is not None:
        sc, sh = bn_pre
        in_specs += [pl.BlockSpec((1, Ci), lambda n: (0, 0)),
                     pl.BlockSpec((1, Ci), lambda n: (0, 0))]
        args += [sc, sh]

    out_bytes = jnp.dtype(out_dtype).itemsize
    cost = pl.CostEstimate(
        flops=2 * N * M * Ci * Co * len(taps),
        transcendentals=0,
        bytes_accessed=(N * P * PH * PW * Ci * 2 + T * Ci * Co * 2
                        + N * M * Co * out_bytes + N * 2 * Co * 4))

    return pl.pallas_call(
        kernel,
        out_shape=(jax.ShapeDtypeStruct((N, M, Co), out_dtype),
                   jax.ShapeDtypeStruct((N, 2, Co), jnp.float32)),
        grid=(N,),
        in_specs=in_specs,
        out_specs=(pl.BlockSpec((None, M, Co), lambda n: (n, 0, 0)),
                   pl.BlockSpec((None, 2, Co), lambda n: (n, 0, 0))),
        scratch_shapes=[pltpu.VMEM((M, Co), jnp.float32)],
        compiler_params=pltpu.CompilerParams(dimension_semantics=("parallel",)),
        cost_estimate=cost,
    )(*args)


def _bn_add_relu(z2, sc2, sh2, res, res_scale=None, res_shift=None):
    """out = relu(z2*sc2 + sh2 + residual); residual = res*res_scale+res_shift
    (downsample branch) or res itself (identity branch)."""
    N, M, Co = z2.shape
    assert res.shape == (N, M, Co)

    def vec_spec():
        return pl.BlockSpec((None, M, Co), lambda n: (n, 0, 0))

    def ch_spec():
        return pl.BlockSpec((1, Co), lambda n: (0, 0))

    if res_scale is None:
        def kernel(z_ref, a_ref, b_ref, r_ref, o_ref):
            y = z_ref[...] * a_ref[...] + b_ref[...]
            o_ref[...] = jnp.maximum(y + r_ref[...], 0.0)
        args = (z2, sc2, sh2, res)
        in_specs = [vec_spec(), ch_spec(), ch_spec(), vec_spec()]
    else:
        def kernel(z_ref, a_ref, b_ref, r_ref, ra_ref, rb_ref, o_ref):
            y = z_ref[...] * a_ref[...] + b_ref[...]
            yr = r_ref[...] * ra_ref[...] + rb_ref[...]
            o_ref[...] = jnp.maximum(y + yr, 0.0)
        args = (z2, sc2, sh2, res, res_scale, res_shift)
        in_specs = [vec_spec(), ch_spec(), ch_spec(), vec_spec(),
                    ch_spec(), ch_spec()]

    cost = pl.CostEstimate(flops=6 * N * M * Co, transcendentals=0,
                           bytes_accessed=3 * N * M * Co * 4)
    return pl.pallas_call(
        kernel,
        out_shape=jax.ShapeDtypeStruct((N, M, Co), jnp.float32),
        grid=(N,),
        in_specs=in_specs,
        out_specs=pl.BlockSpec((None, M, Co), lambda n: (n, 0, 0)),
        compiler_params=pltpu.CompilerParams(dimension_semantics=("parallel",)),
        cost_estimate=cost,
    )(*args)


# ------------------------------ JAX glue ----------------------------------- #

def _wtaps(w_oihw, ci_p, co_p):
    """PyTorch (Cout, Cin, KH, KW) -> (KH*KW, ci_p, co_p) bf16 tap matrices."""
    co, ci, kh, kw = w_oihw.shape
    w = jnp.transpose(w_oihw, (2, 3, 1, 0)).reshape(kh * kw, ci, co)
    w = jnp.pad(w, ((0, 0), (0, ci_p - ci), (0, co_p - co)))
    return w.astype(jnp.bfloat16)


def _planes_3x3(x, stride):
    """x: (N, H, W, Cp) f32, channel-padded.  Zero-pad spatially (pad=1) and
    decompose so every 3x3/stride tap is a contiguous (Ho, Wo) window of one
    plane.  Returns planes (N, P, PH, PW, Cp) bf16, taps, Ho, Wo."""
    N, H, W, C = x.shape
    xp = jnp.pad(x, ((0, 0), (1, 1), (1, 1), (0, 0)))
    Ho = (H - 1) // stride + 1
    Wo = (W - 1) // stride + 1
    if stride == 1:
        planes = xp[:, None]                                   # (N,1,H+2,W+2,C)
        taps = [(0, i, j, 3 * i + j) for i in range(3) for j in range(3)]
    elif stride == 2:
        if H % 2 or W % 2:
            raise NotImplementedError("stride-2 path assumes even H and W")
        phases = [xp[:, p::2, q::2, :] for p in range(2) for q in range(2)]
        planes = jnp.stack(phases, axis=1)                     # (N,4,Ho+1,Wo+1,C)
        taps = [((i % 2) * 2 + (j % 2), i // 2, j // 2, 3 * i + j)
                for i in range(3) for j in range(3)]
    else:
        raise NotImplementedError("only stride 1 or 2")  # TODO(synk): general stride
    return planes.astype(jnp.bfloat16), taps, Ho, Wo


def _finalize_bn(stats, count, gamma, beta, cp):
    """Per-image (sum, sum_sq) -> BN(training) scale/shift of shape (1, cp).
    f32 throughout; biased variance, clamped against E[x^2]-m^2 cancellation.
    Padded channels get gamma=0 -> scale=shift=0 -> exact zeros downstream."""
    s = jnp.sum(stats, axis=0)                                 # (2, cp)
    mean = s[0] / count
    var = jnp.maximum(s[1] / count - mean * mean, 0.0)
    g = jnp.zeros((cp,), jnp.float32).at[:gamma.size].set(gamma.reshape(-1))
    b = jnp.zeros((cp,), jnp.float32).at[:beta.size].set(beta.reshape(-1))
    scale = g * lax.rsqrt(var + EPS)
    shift = b - mean * scale
    return scale.reshape(1, cp), shift.reshape(1, cp)


def resblock_forward(x_nchw, params, stride):
    x = jnp.transpose(x_nchw, (0, 2, 3, 1)).astype(jnp.float32)   # NCHW -> NHWC
    N, H, W, Cin = x.shape
    Cout = params["w1"].shape[0]
    ci_p, co_p = _rup(Cin, LANE), _rup(Cout, LANE)
    xc = jnp.pad(x, ((0, 0), (0, 0), (0, 0), (0, ci_p - Cin)))    # lane-pad C

    # pass 1: conv1 (3x3, stride, pad 1) + batch stats
    planes1, taps1, Ho, Wo = _planes_3x3(xc, stride)
    z1, st1 = _conv_stats(planes1, _wtaps(params["w1"], ci_p, co_p), taps1,
                          Ho, Wo, out_dtype=jnp.bfloat16)
    sc1, sh1 = _finalize_bn(st1, N * Ho * Wo, params["g1"], params["b1"], co_p)

    # pass 2: conv2 (3x3, s=1, pad 1) over y1 = relu(bn1(z1)), with BN1+ReLU
    # applied to each input window inside the kernel (no y1 HBM round trip).
    # Spatial pad value v satisfies relu(v*sc1 + sh1) == 0 for every channel,
    # so the border behaves exactly like y1's zero padding.
    ratio = -sh1 / jnp.maximum(sc1, 1e-20)
    m = jnp.min(ratio)
    padv = (m - 1.0 - 0.01 * jnp.abs(m)).astype(z1.dtype)
    z1_sp = jnp.pad(z1.reshape(N, Ho, Wo, co_p),
                    ((0, 0), (1, 1), (1, 1), (0, 0)), constant_values=padv)
    taps2 = [(0, i, j, 3 * i + j) for i in range(3) for j in range(3)]
    z2, st2 = _conv_stats(z1_sp[:, None], _wtaps(params["w2"], co_p, co_p),
                          taps2, Ho, Wo, out_dtype=jnp.float32,
                          bn_pre=(sc1, sh1))
    sc2, sh2 = _finalize_bn(st2, N * Ho * Wo, params["g2"], params["b2"], co_p)

    # shortcut + pass 3: out = relu(bn2(z2) + residual)
    if "wd" in params:            # downsample: 1x1 conv (stride, pad 0) + BN
        xs = xc[:, ::stride, ::stride, :]                      # (N, Ho, Wo, ci_p)
        zd, std_ = _conv_stats(xs.astype(jnp.bfloat16)[:, None],
                               _wtaps(params["wd"], ci_p, co_p),
                               [(0, 0, 0, 0)], Ho, Wo, out_dtype=jnp.float32)
        scd, shd = _finalize_bn(std_, N * Ho * Wo,
                                params["gd"], params["bd"], co_p)
        out = _bn_add_relu(z2, sc2, sh2, zd, scd, shd)
    else:                         # identity shortcut (Cin == Cout, stride 1)
        out = _bn_add_relu(z2, sc2, sh2, xc.reshape(N, H * W, ci_p))

    out = out.reshape(N, Ho, Wo, co_p)[..., :Cout]
    return jnp.transpose(out, (0, 3, 1, 2))                    # NHWC -> NCHW


def init_params(key, in_ch, out_ch, stride):
    k1, k2, k3 = jax.random.split(key, 3)
    params = {
        "w1": 0.1 * jax.random.normal(k1, (out_ch, in_ch, 3, 3), jnp.float32),
        "g1": jnp.ones((1, out_ch), jnp.float32),
        "b1": jnp.zeros((1, out_ch), jnp.float32),
        "w2": 0.1 * jax.random.normal(k2, (out_ch, out_ch, 3, 3), jnp.float32),
        "g2": jnp.ones((1, out_ch), jnp.float32),
        "b2": jnp.zeros((1, out_ch), jnp.float32),
    }
    if in_ch != out_ch or stride != 1:
        params["wd"] = 0.1 * jax.random.normal(k3, (out_ch, in_ch, 1, 1), jnp.float32)
        params["gd"] = jnp.ones((1, out_ch), jnp.float32)
        params["bd"] = jnp.zeros((1, out_ch), jnp.float32)
    return params


# ------------------------- pure-JAX reference ------------------------------ #

def _conv_ref(x_nhwc, w_oihw, stride, pad):
    w_hwio = jnp.transpose(w_oihw, (2, 3, 1, 0))
    return lax.conv_general_dilated(
        x_nhwc, w_hwio, (stride, stride), ((pad, pad), (pad, pad)),
        dimension_numbers=("NHWC", "HWIO", "NHWC"))


def _bn_ref(z):
    m = jnp.mean(z, axis=(0, 1, 2), keepdims=True)
    v = jnp.mean((z - m) ** 2, axis=(0, 1, 2), keepdims=True)
    return (z - m) * lax.rsqrt(v + EPS)


def resblock_ref(x_nchw, params, stride):
    x = jnp.transpose(x_nchw, (0, 2, 3, 1)).astype(jnp.float32)
    y1 = jnp.maximum(_bn_ref(_conv_ref(x, params["w1"], stride, 1)), 0.0)
    y2 = _bn_ref(_conv_ref(y1, params["w2"], 1, 1))
    res = _bn_ref(_conv_ref(x, params["wd"], stride, 0)) if "wd" in params else x
    out = jnp.maximum(res + y2, 0.0)
    return jnp.transpose(out, (0, 3, 1, 2))


# --------------------------------- main ------------------------------------ #

if __name__ == "__main__":
    key = jax.random.PRNGKey(0)
    kx, kp1, kp2 = jax.random.split(key, 3)
    fwd = jax.jit(resblock_forward, static_argnums=2)

    # Case 1: in_ch=4 -> out_ch=8, stride=2 (exercises downsample branch)
    x = jax.random.normal(kx, (2, 4, 16, 16), jnp.float32)
    params = init_params(kp1, 4, 8, 2)
    out = jax.block_until_ready(fwd(x, params, 2))
    ref = resblock_ref(x, params, 2)
    assert out.shape == (2, 8, 8, 8), out.shape
    assert jnp.allclose(out, ref, atol=5e-2, rtol=5e-2), \
        float(jnp.max(jnp.abs(out - ref)))   # tolerance covers bf16 operands

    # Case 2: in_ch=out_ch=8, stride=1 (identity shortcut branch)
    x2 = jax.random.normal(kx, (2, 8, 16, 16), jnp.float32)
    params2 = init_params(kp2, 8, 8, 1)
    out2 = jax.block_until_ready(fwd(x2, params2, 1))
    ref2 = resblock_ref(x2, params2, 1)
    assert out2.shape == (2, 8, 16, 16), out2.shape
    assert jnp.allclose(out2, ref2, atol=5e-2, rtol=5e-2), \
        float(jnp.max(jnp.abs(out2 - ref2)))

    print("KERNEL_OK")
</pallas_src>

<mosaic_0001>
module attributes {stable_mosaic.version = 11 : i64} {
  func.func @kernel(%arg0: i32, %arg1: memref<4x9x9x128xbf16, #tpu.memory_space<vmem>>, %arg2: memref<9x128x128xbf16, #tpu.memory_space<vmem>>, %arg3: memref<1x64x128xbf16, #tpu.memory_space<vmem>>, %arg4: memref<1x2x128xf32, #tpu.memory_space<vmem>>, %arg5: memref<64x128xf32, #tpu.memory_space<vmem>>) attributes {dimension_semantics = [#tpu.dimension_semantics<parallel>], iteration_bounds = array<i64: 2>, scalar_prefetch = 0 : i64, scratch_operands = 1 : i64, tpu.core_type = #tpu.core_type<tc>, window_params = [{transform_indices = @transform_0, window_bounds = array<i64: 4, 9, 9, 128>}, {pipeline_mode = #tpu.pipeline_mode<synchronous>, transform_indices = @transform_1, window_bounds = array<i64: 9, 128, 128>}, {transform_indices = @transform_2, window_bounds = array<i64: 1, 64, 128>}, {transform_indices = @transform_3, window_bounds = array<i64: 1, 2, 128>}]} {
    %cst = arith.constant 0.000000e+00 : f32
    %0 = vector.broadcast %cst : f32 to vector<64x128xf32>
    %c0 = arith.constant 0 : index
    %c0_0 = arith.constant 0 : index
    %1 = vector.load %arg5[%c0, %c0_0] : memref<64x128xf32, #tpu.memory_space<vmem>>, vector<64x128xf32>
    tpu.vector_store %arg5[%c0, %c0_0], %0 {strides = array<i32>} : memref<64x128xf32, #tpu.memory_space<vmem>>, vector<64x128xf32>,
    %c0_1 = arith.constant 0 : index
    %c0_2 = arith.constant 0 : index
    %c0_3 = arith.constant 0 : index
    %c0_4 = arith.constant 0 : index
    %2 = vector.load %arg1[%c0_1, %c0_2, %c0_3, %c0_4] : memref<4x9x9x128xbf16, #tpu.memory_space<vmem>>, vector<1x8x8x128xbf16>
    %3 = vector.shape_cast %2 : vector<1x8x8x128xbf16> to vector<8x8x128xbf16>
    %4 = vector.shape_cast %3 : vector<8x8x128xbf16> to vector<64x128xbf16>
    %c0_5 = arith.constant 0 : index
    %c0_6 = arith.constant 0 : index
    %5 = vector.load %arg5[%c0_5, %c0_6] : memref<64x128xf32, #tpu.memory_space<vmem>>, vector<64x128xf32>
    %c0_7 = arith.constant 0 : index
    %c0_8 = arith.constant 0 : index
    %c0_9 = arith.constant 0 : index
    %6 = vector.load %arg2[%c0_7, %c0_8, %c0_9] : memref<9x128x128xbf16, #tpu.memory_space<vmem>>, vector<1x128x128xbf16>
    %7 = vector.shape_cast %6 : vector<1x128x128xbf16> to vector<128x128xbf16>
    %cst_10 = arith.constant dense<0.000000e+00> : vector<64x128xf32>
    %8 = tpu.matmul %4, %7, %cst_10 {dimension_numbers = #tpu.dot_dimension_numbers<[1], [0], [0], [1], [0, 0, 1, 1], [], []>} : vector<64x128xbf16>, vector<128x128xbf16>, vector<64x128xf32> -> vector<64x128xf32>
    %9 = arith.addf %5, %8 : vector<64x128xf32>
    %c0_11 = arith.constant 0 : index
    %c0_12 = arith.constant 0 : index
    %10 = vector.load %arg5[%c0_11, %c0_12] : memref<64x128xf32, #tpu.memory_space<vmem>>, vector<64x128xf32>
    tpu.vector_store %arg5[%c0_11, %c0_12], %9 {strides = array<i32>} : memref<64x128xf32, #tpu.memory_space<vmem>>, vector<64x128xf32>,
    %c1 = arith.constant 1 : index
    %c0_13 = arith.constant 0 : index
    %c0_14 = arith.constant 0 : index
    %c0_15 = arith.constant 0 : index
    %11 = vector.load %arg1[%c1, %c0_13, %c0_14, %c0_15] : memref<4x9x9x128xbf16, #tpu.memory_space<vmem>>, vector<1x8x8x128xbf16>
    %12 = vector.shape_cast %11 : vector<1x8x8x128xbf16> to vector<8x8x128xbf16>
    %13 = vector.shape_cast %12 : vector<8x8x128xbf16> to vector<64x128xbf16>
    %c0_16 = arith.constant 0 : index
    %c0_17 = arith.constant 0 : index
    %14 = vector.load %arg5[%c0_16, %c0_17] : memref<64x128xf32, #tpu.memory_space<vmem>>, vector<64x128xf32>
    %c1_18 = arith.constant 1 : index
    %c0_19 = arith.constant 0 : index
    %c0_20 = arith.constant 0 : index
    %15 = vector.load %arg2[%c1_18, %c0_19, %c0_20] : memref<9x128x128xbf16, #tpu.memory_space<vmem>>, vector<1x128x128xbf16>
    %16 = vector.shape_cast %15 : vector<1x128x128xbf16> to vector<128x128xbf16>
    %cst_21 = arith.constant dense<0.000000e+00> : vector<64x128xf32>
    %17 = tpu.matmul %13, %16, %cst_21 {dimension_numbers = #tpu.dot_dimension_numbers<[1], [0], [0], [1], [0, 0, 1, 1], [], []>} : vector<64x128xbf16>, vector<128x128xbf16>, vector<64x128xf32> -> vector<64x128xf32>
    %18 = arith.addf %14, %17 : vector<64x128xf32>
    %c0_22 = arith.constant 0 : index
    %c0_23 = arith.constant 0 : index
    %19 = vector.load %arg5[%c0_22, %c0_23] : memref<64x128xf32, #tpu.memory_space<vmem>>, vector<64x128xf32>
    tpu.vector_store %arg5[%c0_22, %c0_23], %18 {strides = array<i32>} : memref<64x128xf32, #tpu.memory_space<vmem>>, vector<64x128xf32>,
    %c0_24 = arith.constant 0 : index
    %c0_25 = arith.constant 0 : index
    %c1_26 = arith.constant 1 : index
    %c0_27 = arith.constant 0 : index
    %20 = vector.load %arg1[%c0_24, %c0_25, %c1_26, %c0_27] : memref<4x9x9x128xbf16, #tpu.memory_space<vmem>>, vector<1x8x8x128xbf16>
    %21 = vector.shape_cast %20 : vector<1x8x8x128xbf16> to vector<8x8x128xbf16>
    %22 = vector.shape_cast %21 : vector<8x8x128xbf16> to vector<64x128xbf16>
    %c0_28 = arith.constant 0 : index
    %c0_29 = arith.constant 0 : index
    %23 = vector.load %arg5[%c0_28, %c0_29] : memref<64x128xf32, #tpu.memory_space<vmem>>, vector<64x128xf32>
    %c2 = arith.constant 2 : index
    %c0_30 = arith.constant 0 : index
    %c0_31 = arith.constant 0 : index
    %24 = vector.load %arg2[%c2, %c0_30, %c0_31] : memref<9x128x128xbf16, #tpu.memory_space<vmem>>, vector<1x128x128xbf16>
    %25 = vector.shape_cast %24 : vector<1x128x128xbf16> to vector<128x128xbf16>
    %cst_32 = arith.constant dense<0.000000e+00> : vector<64x128xf32>
    %26 = tpu.matmul %22, %25, %cst_32 {dimension_numbers = #tpu.dot_dimension_numbers<[1], [0], [0], [1], [0, 0, 1, 1], [], []>} : vector<64x128xbf16>, vector<128x128xbf16>, vector<64x128xf32> -> vector<64x128xf32>
    %27 = arith.addf %23, %26 : vector<64x128xf32>
    %c0_33 = arith.constant 0 : index
    %c0_34 = arith.constant 0 : index
    %28 = vector.load %arg5[%c0_33, %c0_34] : memref<64x128xf32, #tpu.memory_space<vmem>>, vector<64x128xf32>
    tpu.vector_store %arg5[%c0_33, %c0_34], %27 {strides = array<i32>} : memref<64x128xf32, #tpu.memory_space<vmem>>, vector<64x128xf32>,
    %c2_35 = arith.constant 2 : index
    %c0_36 = arith.constant 0 : index
    %c0_37 = arith.constant 0 : index
    %c0_38 = arith.constant 0 : index
    %29 = vector.load %arg1[%c2_35, %c0_36, %c0_37, %c0_38] : memref<4x9x9x128xbf16, #tpu.memory_space<vmem>>, vector<1x8x8x128xbf16>
    %30 = vector.shape_cast %29 : vector<1x8x8x128xbf16> to vector<8x8x128xbf16>
    %31 = vector.shape_cast %30 : vector<8x8x128xbf16> to vector<64x128xbf16>
    %c0_39 = arith.constant 0 : index
    %c0_40 = arith.constant 0 : index
    %32 = vector.load %arg5[%c0_39, %c0_40] : memref<64x128xf32, #tpu.memory_space<vmem>>, vector<64x128xf32>
    %c3 = arith.constant 3 : index
    %c0_41 = arith.constant 0 : index
    %c0_42 = arith.constant 0 : index
    %33 = vector.load %arg2[%c3, %c0_41, %c0_42] : memref<9x128x128xbf16, #tpu.memory_space<vmem>>, vector<1x128x128xbf16>
    %34 = vector.shape_cast %33 : vector<1x128x128xbf16> to vector<128x128xbf16>
    %cst_43 = arith.constant dense<0.000000e+00> : vector<64x128xf32>
    %35 = tpu.matmul %31, %34, %cst_43 {dimension_numbers = #tpu.dot_dimension_numbers<[1], [0], [0], [1], [0, 0, 1, 1], [], []>} : vector<64x128xbf16>, vector<128x128xbf16>, vector<64x128xf32> -> vector<64x128xf32>
    %36 = arith.addf %32, %35 : vector<64x128xf32>
    %c0_44 = arith.constant 0 : index
    %c0_45 = arith.constant 0 : index
    %37 = vector.load %arg5[%c0_44, %c0_45] : memref<64x128xf32, #tpu.memory_space<vmem>>, vector<64x128xf32>
    tpu.vector_store %arg5[%c0_44, %c0_45], %36 {strides = array<i32>} : memref<64x128xf32, #tpu.memory_space<vmem>>, vector<64x128xf32>,
    %c3_46 = arith.constant 3 : index
    %c0_47 = arith.constant 0 : index
    %c0_48 = arith.constant 0 : index
    %c0_49 = arith.constant 0 : index
    %38 = vector.load %arg1[%c3_46, %c0_47, %c0_48, %c0_49] : memref<4x9x9x128xbf16, #tpu.memory_space<vmem>>, vector<1x8x8x128xbf16>
    %39 = vector.shape_cast %38 : vector<1x8x8x128xbf16> to vector<8x8x128xbf16>
    %40 = vector.shape_cast %39 : vector<8x8x128xbf16> to vector<64x128xbf16>
    %c0_50 = arith.constant 0 : index
    %c0_51 = arith.constant 0 : index
    %41 = vector.load %arg5[%c0_50, %c0_51] : memref<64x128xf32, #tpu.memory_space<vmem>>, vector<64x128xf32>
    %c4 = arith.constant 4 : index
    %c0_52 = arith.constant 0 : index
    %c0_53 = arith.constant 0 : index
    %42 = vector.load %arg2[%c4, %c0_52, %c0_53] : memref<9x128x128xbf16, #tpu.memory_space<vmem>>, vector<1x128x128xbf16>
    %43 = vector.shape_cast %42 : vector<1x128x128xbf16> to vector<128x128xbf16>
    %cst_54 = arith.constant dense<0.000000e+00> : vector<64x128xf32>
    %44 = tpu.matmul %40, %43, %cst_54 {dimension_numbers = #tpu.dot_dimension_numbers<[1], [0], [0], [1], [0, 0, 1, 1], [], []>} : vector<64x128xbf16>, vector<128x128xbf16>, vector<64x128xf32> -> vector<64x128xf32>
    %45 = arith.addf %41, %44 : vector<64x128xf32>
    %c0_55 = arith.constant 0 : index
    %c0_56 = arith.constant 0 : index
    %46 = vector.load %arg5[%c0_55, %c0_56] : memref<64x128xf32, #tpu.memory_space<vmem>>, vector<64x128xf32>
    tpu.vector_store %arg5[%c0_55, %c0_56], %45 {strides = array<i32>} : memref<64x128xf32, #tpu.memory_space<vmem>>, vector<64x128xf32>,
    %c2_57 = arith.constant 2 : index
    %c0_58 = arith.constant 0 : index
    %c1_59 = arith.constant 1 : index
    %c0_60 = arith.constant 0 : index
    %47 = vector.load %arg1[%c2_57, %c0_58, %c1_59, %c0_60] : memref<4x9x9x128xbf16, #tpu.memory_space<vmem>>, vector<1x8x8x128xbf16>
    %48 = vector.shape_cast %47 : vector<1x8x8x128xbf16> to vector<8x8x128xbf16>
    %49 = vector.shape_cast %48 : vector<8x8x128xbf16> to vector<64x128xbf16>
    %c0_61 = arith.constant 0 : index
    %c0_62 = arith.constant 0 : index
    %50 = vector.load %arg5[%c0_61, %c0_62] : memref<64x128xf32, #tpu.memory_space<vmem>>, vector<64x128xf32>
    %c5 = arith.constant 5 : index
    %c0_63 = arith.constant 0 : index
    %c0_64 = arith.constant 0 : index
    %51 = vector.load %arg2[%c5, %c0_63, %c0_64] : memref<9x128x128xbf16, #tpu.memory_space<vmem>>, vector<1x128x128xbf16>
    %52 = vector.shape_cast %51 : vector<1x128x128xbf16> to vector<128x128xbf16>
    %cst_65 = arith.constant dense<0.000000e+00> : vector<64x128xf32>
    %53 = tpu.matmul %49, %52, %cst_65 {dimension_numbers = #tpu.dot_dimension_numbers<[1], [0], [0], [1], [0, 0, 1, 1], [], []>} : vector<64x128xbf16>, vector<128x128xbf16>, vector<64x128xf32> -> vector<64x128xf32>
    %54 = arith.addf %50, %53 : vector<64x128xf32>
    %c0_66 = arith.constant 0 : index
    %c0_67 = arith.constant 0 : index
    %55 = vector.load %arg5[%c0_66, %c0_67] : memref<64x128xf32, #tpu.memory_space<vmem>>, vector<64x128xf32>
    tpu.vector_store %arg5[%c0_66, %c0_67], %54 {strides = array<i32>} : memref<64x128xf32, #tpu.memory_space<vmem>>, vector<64x128xf32>,
    %c0_68 = arith.constant 0 : index
    %c1_69 = arith.constant 1 : index
    %c0_70 = arith.constant 0 : index
    %c0_71 = arith.constant 0 : index
    %56 = vector.load %arg1[%c0_68, %c1_69, %c0_70, %c0_71] : memref<4x9x9x128xbf16, #tpu.memory_space<vmem>>, vector<1x8x8x128xbf16>
    %57 = vector.shape_cast %56 : vector<1x8x8x128xbf16> to vector<8x8x128xbf16>
    %58 = vector.shape_cast %57 : vector<8x8x128xbf16> to vector<64x128xbf16>
    %c0_72 = arith.constant 0 : index
    %c0_73 = arith.constant 0 : index
    %59 = vector.load %arg5[%c0_72, %c0_73] : memref<64x128xf32, #tpu.memory_space<vmem>>, vector<64x128xf32>
    %c6 = arith.constant 6 : index
    %c0_74 = arith.constant 0 : index
    %c0_75 = arith.constant 0 : index
    %60 = vector.load %arg2[%c6, %c0_74, %c0_75] : memref<9x128x128xbf16, #tpu.memory_space<vmem>>, vector<1x128x128xbf16>
    %61 = vector.shape_cast %60 : vector<1x128x128xbf16> to vector<128x128xbf16>
    %cst_76 = arith.constant dense<0.000000e+00> : vector<64x128xf32>
    %62 = tpu.matmul %58, %61, %cst_76 {dimension_numbers = #tpu.dot_dimension_numbers<[1], [0], [0], [1], [0, 0, 1, 1], [], []>} : vector<64x128xbf16>, vector<128x128xbf16>, vector<64x128xf32> -> vector<64x128xf32>
    %63 = arith.addf %59, %62 : vector<64x128xf32>
    %c0_77 = arith.constant 0 : index
    %c0_78 = arith.constant 0 : index
    %64 = vector.load %arg5[%c0_77, %c0_78] : memref<64x128xf32, #tpu.memory_space<vmem>>, vector<64x128xf32>
    tpu.vector_store %arg5[%c0_77, %c0_78], %63 {strides = array<i32>} : memref<64x128xf32, #tpu.memory_space<vmem>>, vector<64x128xf32>,
    %c1_79 = arith.constant 1 : index
    %c1_80 = arith.constant 1 : index
    %c0_81 = arith.constant 0 : index
    %c0_82 = arith.constant 0 : index
    %65 = vector.load %arg1[%c1_79, %c1_80, %c0_81, %c0_82] : memref<4x9x9x128xbf16, #tpu.memory_space<vmem>>, vector<1x8x8x128xbf16>
    %66 = vector.shape_cast %65 : vector<1x8x8x128xbf16> to vector<8x8x128xbf16>
    %67 = vector.shape_cast %66 : vector<8x8x128xbf16> to vector<64x128xbf16>
    %c0_83 = arith.constant 0 : index
    %c0_84 = arith.constant 0 : index
    %68 = vector.load %arg5[%c0_83, %c0_84] : memref<64x128xf32, #tpu.memory_space<vmem>>, vector<64x128xf32>
    %c7 = arith.constant 7 : index
    %c0_85 = arith.constant 0 : index
    %c0_86 = arith.constant 0 : index
    %69 = vector.load %arg2[%c7, %c0_85, %c0_86] : memref<9x128x128xbf16, #tpu.memory_space<vmem>>, vector<1x128x128xbf16>
    %70 = vector.shape_cast %69 : vector<1x128x128xbf16> to vector<128x128xbf16>
    %cst_87 = arith.constant dense<0.000000e+00> : vector<64x128xf32>
    %71 = tpu.matmul %67, %70, %cst_87 {dimension_numbers = #tpu.dot_dimension_numbers<[1], [0], [0], [1], [0, 0, 1, 1], [], []>} : vector<64x128xbf16>, vector<128x128xbf16>, vector<64x128xf32> -> vector<64x128xf32>
    %72 = arith.addf %68, %71 : vector<64x128xf32>
    %c0_88 = arith.constant 0 : index
    %c0_89 = arith.constant 0 : index
    %73 = vector.load %arg5[%c0_88, %c0_89] : memref<64x128xf32, #tpu.memory_space<vmem>>, vector<64x128xf32>
    tpu.vector_store %arg5[%c0_88, %c0_89], %72 {strides = array<i32>} : memref<64x128xf32, #tpu.memory_space<vmem>>, vector<64x128xf32>,
    %c0_90 = arith.constant 0 : index
    %c1_91 = arith.constant 1 : index
    %c1_92 = arith.constant 1 : index
    %c0_93 = arith.constant 0 : index
    %74 = vector.load %arg1[%c0_90, %c1_91, %c1_92, %c0_93] : memref<4x9x9x128xbf16, #tpu.memory_space<vmem>>, vector<1x8x8x128xbf16>
    %75 = vector.shape_cast %74 : vector<1x8x8x128xbf16> to vector<8x8x128xbf16>
    %76 = vector.shape_cast %75 : vector<8x8x128xbf16> to vector<64x128xbf16>
    %c0_94 = arith.constant 0 : index
    %c0_95 = arith.constant 0 : index
    %77 = vector.load %arg5[%c0_94, %c0_95] : memref<64x128xf32, #tpu.memory_space<vmem>>, vector<64x128xf32>
    %c8 = arith.constant 8 : index
    %c0_96 = arith.constant 0 : index
    %c0_97 = arith.constant 0 : index
    %78 = vector.load %arg2[%c8, %c0_96, %c0_97] : memref<9x128x128xbf16, #tpu.memory_space<vmem>>, vector<1x128x128xbf16>
    %79 = vector.shape_cast %78 : vector<1x128x128xbf16> to vector<128x128xbf16>
    %cst_98 = arith.constant dense<0.000000e+00> : vector<64x128xf32>
    %80 = tpu.matmul %76, %79, %cst_98 {dimension_numbers = #tpu.dot_dimension_numbers<[1], [0], [0], [1], [0, 0, 1, 1], [], []>} : vector<64x128xbf16>, vector<128x128xbf16>, vector<64x128xf32> -> vector<64x128xf32>
    %81 = arith.addf %77, %80 : vector<64x128xf32>
    %c0_99 = arith.constant 0 : index
    %c0_100 = arith.constant 0 : index
    %82 = vector.load %arg5[%c0_99, %c0_100] : memref<64x128xf32, #tpu.memory_space<vmem>>, vector<64x128xf32>
    tpu.vector_store %arg5[%c0_99, %c0_100], %81 {strides = array<i32>} : memref<64x128xf32, #tpu.memory_space<vmem>>, vector<64x128xf32>,
    %c0_101 = arith.constant 0 : index
    %c0_102 = arith.constant 0 : index
    %83 = vector.load %arg5[%c0_101, %c0_102] : memref<64x128xf32, #tpu.memory_space<vmem>>, vector<64x128xf32>
    %84 = arith.truncf %83 : vector<64x128xf32> to vector<64x128xbf16>
    %c0_103 = arith.constant 0 : index
    %c0_104 = arith.constant 0 : index
    %c0_105 = arith.constant 0 : index
    %85 = vector.load %arg3[%c0_103, %c0_104, %c0_105] : memref<1x64x128xbf16, #tpu.memory_space<vmem>>, vector<1x64x128xbf16>
    %86 = vector.shape_cast %85 : vector<1x64x128xbf16> to vector<64x128xbf16>
    %87 = vector.shape_cast %84 : vector<64x128xbf16> to vector<1x64x128xbf16>
    tpu.vector_store %arg3[%c0_103, %c0_104, %c0_105], %87 {strides = array<i32>} : memref<1x64x128xbf16, #tpu.memory_space<vmem>>, vector<1x64x128xbf16>,
    %cst_106 = arith.constant dense<0.000000e+00> : vector<128xf32>
    %88 = vector.multi_reduction <add>, %83, %cst_106 [0] : vector<64x128xf32> to vector<128xf32>
    %89 = vector.shape_cast %88 : vector<128xf32> to vector<1x128xf32>
    %90 = arith.mulf %83, %83 : vector<64x128xf32>
    %cst_107 = arith.constant dense<0.000000e+00> : vector<128xf32>
    %91 = vector.multi_reduction <add>, %90, %cst_107 [0] : vector<64x128xf32> to vector<128xf32>
    %92 = vector.shape_cast %91 : vector<128xf32> to vector<1x128xf32>
    %93 = tpu.concatenate %89, %92 in 0 : vector<1x128xf32>, vector<1x128xf32> -> vector<2x128xf32>
    %c0_108 = arith.constant 0 : index
    %c0_109 = arith.constant 0 : index
    %c0_110 = arith.constant 0 : index
    %94 = vector.load %arg4[%c0_108, %c0_109, %c0_110] : memref<1x2x128xf32, #tpu.memory_space<vmem>>, vector<1x2x128xf32>
    %95 = vector.shape_cast %94 : vector<1x2x128xf32> to vector<2x128xf32>
    %96 = vector.shape_cast %93 : vector<2x128xf32> to vector<1x2x128xf32>
    tpu.vector_store %arg4[%c0_108, %c0_109, %c0_110], %96 {strides = array<i32>} : memref<1x2x128xf32, #tpu.memory_space<vmem>>, vector<1x2x128xf32>,
    return
  }
  func.func @transform_0(%arg0: i32) -> (i32, i32, i32, i32) {
    %c0_i32 = arith.constant 0 : i32
    %c0_i32_0 = arith.constant 0 : i32
    %c0_i32_1 = arith.constant 0 : i32
    %c0_i32_2 = arith.constant 0 : i32
    return %arg0, %c0_i32, %c0_i32_0, %c0_i32_1 : i32, i32, i32, i32
  }
  func.func @transform_1(%arg0: i32) -> (i32, i32, i32) {
    %c0_i32 = arith.constant 0 : i32
    %c0_i32_0 = arith.constant 0 : i32
    %c0_i32_1 = arith.constant 0 : i32
    %c0_i32_2 = arith.constant 0 : i32
    return %c0_i32, %c0_i32_0, %c0_i32_1 : i32, i32, i32
  }
  func.func @transform_2(%arg0: i32) -> (i32, i32, i32) {
    %c0_i32 = arith.constant 0 : i32
    %c0_i32_0 = arith.constant 0 : i32
    %c0_i32_1 = arith.constant 0 : i32
    return %arg0, %c0_i32, %c0_i32_0 : i32, i32, i32
  }
  func.func @transform_3(%arg0: i32) -> (i32, i32, i32) {
    %c0_i32 = arith.constant 0 : i32
    %c0_i32_0 = arith.constant 0 : i32
    %c0_i32_1 = arith.constant 0 : i32
    return %arg0, %c0_i32, %c0_i32_0 : i32, i32, i32
  }
}

module attributes {stable_mosaic.version = 11 : i64} {
  func.func @kernel(%arg0: i32, %arg1: memref<1x10x10x128xbf16, #tpu.memory_space<vmem>>, %arg2: memref<9x128x128xbf16, #tpu.memory_space<vmem>>, %arg3: memref<1x128xf32, #tpu.memory_space<vmem>>, %arg4: memref<1x128xf32, #tpu.memory_space<vmem>>, %arg5: memref<1x64x128xf32, #tpu.memory_space<vmem>>, %arg6: memref<1x2x128xf32, #tpu.memory_space<vmem>>, %arg7: memref<64x128xf32, #tpu.memory_space<vmem>>) attributes {dimension_semantics = [#tpu.dimension_semantics<parallel>], iteration_bounds = array<i64: 2>, scalar_prefetch = 0 : i64, scratch_operands = 1 : i64, tpu.core_type = #tpu.core_type<tc>, window_params = [{transform_indices = @transform_0, window_bounds = array<i64: 1, 10, 10, 128>}, {pipeline_mode = #tpu.pipeline_mode<synchronous>, transform_indices = @transform_1, window_bounds = array<i64: 9, 128, 128>}, {pipeline_mode = #tpu.pipeline_mode<synchronous>, transform_indices = @transform_2, window_bounds = array<i64: 1, 128>}, {pipeline_mode = #tpu.pipeline_mode<synchronous>, transform_indices = @transform_3, window_bounds = array<i64: 1, 128>}, {transform_indices = @transform_4, window_bounds = array<i64: 1, 64, 128>}, {transform_indices = @transform_5, window_bounds = array<i64: 1, 2, 128>}]} {
    %c0 = arith.constant 0 : index
    %c0_0 = arith.constant 0 : index
    %0 = vector.load %arg3[%c0, %c0_0] : memref<1x128xf32, #tpu.memory_space<vmem>>, vector<1x128xf32>
    %1 = vector.shape_cast %0 : vector<1x128xf32> to vector<1x1x128xf32>
    %c0_1 = arith.constant 0 : index
    %c0_2 = arith.constant 0 : index
    %2 = vector.load %arg4[%c0_1, %c0_2] : memref<1x128xf32, #tpu.memory_space<vmem>>, vector<1x128xf32>
    %3 = vector.shape_cast %2 : vector<1x128xf32> to vector<1x1x128xf32>
    %cst = arith.constant 0.000000e+00 : f32
    %4 = vector.broadcast %cst : f32 to vector<64x128xf32>
    %c0_3 = arith.constant 0 : index
    %c0_4 = arith.constant 0 : index
    %5 = vector.load %arg7[%c0_3, %c0_4] : memref<64x128xf32, #tpu.memory_space<vmem>>, vector<64x128xf32>
    tpu.vector_store %arg7[%c0_3, %c0_4], %4 {strides = array<i32>} : memref<64x128xf32, #tpu.memory_space<vmem>>, vector<64x128xf32>,
    %c0_5 = arith.constant 0 : index
    %c0_6 = arith.constant 0 : index
    %c0_7 = arith.constant 0 : index
    %c0_8 = arith.constant 0 : index
    %6 = vector.load %arg1[%c0_5, %c0_6, %c0_7, %c0_8] : memref<1x10x10x128xbf16, #tpu.memory_space<vmem>>, vector<1x8x8x128xbf16>
    %7 = vector.shape_cast %6 : vector<1x8x8x128xbf16> to vector<8x8x128xbf16>
    %8 = arith.extf %7 : vector<8x8x128xbf16> to vector<8x8x128xf32>
    %9 = vector.broadcast %1 : vector<1x1x128xf32> to vector<8x8x128xf32>
    %10 = arith.mulf %8, %9 : vector<8x8x128xf32>
    %11 = vector.broadcast %3 : vector<1x1x128xf32> to vector<8x8x128xf32>
    %12 = arith.addf %10, %11 : vector<8x8x128xf32>
    %cst_9 = arith.constant 0.000000e+00 : f32
    %13 = vector.broadcast %cst_9 : f32 to vector<8x8x128xf32>
    %14 = arith.maximumf %12, %13 : vector<8x8x128xf32>
    %15 = arith.truncf %14 : vector<8x8x128xf32> to vector<8x8x128xbf16>
    %16 = vector.shape_cast %15 : vector<8x8x128xbf16> to vector<64x128xbf16>
    %c0_10 = arith.constant 0 : index
    %c0_11 = arith.constant 0 : index
    %17 = vector.load %arg7[%c0_10, %c0_11] : memref<64x128xf32, #tpu.memory_space<vmem>>, vector<64x128xf32>
    %c0_12 = arith.constant 0 : index
    %c0_13 = arith.constant 0 : index
    %c0_14 = arith.constant 0 : index
    %18 = vector.load %arg2[%c0_12, %c0_13, %c0_14] : memref<9x128x128xbf16, #tpu.memory_space<vmem>>, vector<1x128x128xbf16>
    %19 = vector.shape_cast %18 : vector<1x128x128xbf16> to vector<128x128xbf16>
    %cst_15 = arith.constant dense<0.000000e+00> : vector<64x128xf32>
    %20 = tpu.matmul %16, %19, %cst_15 {dimension_numbers = #tpu.dot_dimension_numbers<[1], [0], [0], [1], [0, 0, 1, 1], [], []>} : vector<64x128xbf16>, vector<128x128xbf16>, vector<64x128xf32> -> vector<64x128xf32>
    %21 = arith.addf %17, %20 : vector<64x128xf32>
    %c0_16 = arith.constant 0 : index
    %c0_17 = arith.constant 0 : index
    %22 = vector.load %arg7[%c0_16, %c0_17] : memref<64x128xf32, #tpu.memory_space<vmem>>, vector<64x128xf32>
    tpu.vector_store %arg7[%c0_16, %c0_17], %21 {strides = array<i32>} : memref<64x128xf32, #tpu.memory_space<vmem>>, vector<64x128xf32>,
    %c0_18 = arith.constant 0 : index
    %c0_19 = arith.constant 0 : index
    %c1 = arith.constant 1 : index
    %c0_20 = arith.constant 0 : index
    %23 = vector.load %arg1[%c0_18, %c0_19, %c1, %c0_20] : memref<1x10x10x128xbf16, #tpu.memory_space<vmem>>, vector<1x8x8x128xbf16>
    %24 = vector.shape_cast %23 : vector<1x8x8x128xbf16> to vector<8x8x128xbf16>
    %25 = arith.extf %24 : vector<8x8x128xbf16> to vector<8x8x128xf32>
    %26 = vector.broadcast %1 : vector<1x1x128xf32> to vector<8x8x128xf32>
    %27 = arith.mulf %25, %26 : vector<8x8x128xf32>
    %28 = vector.broadcast %3 : vector<1x1x128xf32> to vector<8x8x128xf32>
    %29 = arith.addf %27, %28 : vector<8x8x128xf32>
    %cst_21 = arith.constant 0.000000e+00 : f32
    %30 = vector.broadcast %cst_21 : f32 to vector<8x8x128xf32>
    %31 = arith.maximumf %29, %30 : vector<8x8x128xf32>
    %32 = arith.truncf %31 : vector<8x8x128xf32> to vector<8x8x128xbf16>
    %33 = vector.shape_cast %32 : vector<8x8x128xbf16> to vector<64x128xbf16>
    %c0_22 = arith.constant 0 : index
    %c0_23 = arith.constant 0 : index
    %34 = vector.load %arg7[%c0_22, %c0_23] : memref<64x128xf32, #tpu.memory_space<vmem>>, vector<64x128xf32>
    %c1_24 = arith.constant 1 : index
    %c0_25 = arith.constant 0 : index
    %c0_26 = arith.constant 0 : index
    %35 = vector.load %arg2[%c1_24, %c0_25, %c0_26] : memref<9x128x128xbf16, #tpu.memory_space<vmem>>, vector<1x128x128xbf16>
    %36 = vector.shape_cast %35 : vector<1x128x128xbf16> to vector<128x128xbf16>
    %cst_27 = arith.constant dense<0.000000e+00> : vector<64x128xf32>
    %37 = tpu.matmul %33, %36, %cst_27 {dimension_numbers = #tpu.dot_dimension_numbers<[1], [0], [0], [1], [0, 0, 1, 1], [], []>} : vector<64x128xbf16>, vector<128x128xbf16>, vector<64x128xf32> -> vector<64x128xf32>
    %38 = arith.addf %34, %37 : vector<64x128xf32>
    %c0_28 = arith.constant 0 : index
    %c0_29 = arith.constant 0 : index
    %39 = vector.load %arg7[%c0_28, %c0_29] : memref<64x128xf32, #tpu.memory_space<vmem>>, vector<64x128xf32>
    tpu.vector_store %arg7[%c0_28, %c0_29], %38 {strides = array<i32>} : memref<64x128xf32, #tpu.memory_space<vmem>>, vector<64x128xf32>,
    %c0_30 = arith.constant 0 : index
    %c0_31 = arith.constant 0 : index
    %c2 = arith.constant 2 : index
    %c0_32 = arith.constant 0 : index
    %40 = vector.load %arg1[%c0_30, %c0_31, %c2, %c0_32] : memref<1x10x10x128xbf16, #tpu.memory_space<vmem>>, vector<1x8x8x128xbf16>
    %41 = vector.shape_cast %40 : vector<1x8x8x128xbf16> to vector<8x8x128xbf16>
    %42 = arith.extf %41 : vector<8x8x128xbf16> to vector<8x8x128xf32>
    %43 = vector.broadcast %1 : vector<1x1x128xf32> to vector<8x8x128xf32>
    %44 = arith.mulf %42, %43 : vector<8x8x128xf32>
    %45 = vector.broadcast %3 : vector<1x1x128xf32> to vector<8x8x128xf32>
    %46 = arith.addf %44, %45 : vector<8x8x128xf32>
    %cst_33 = arith.constant 0.000000e+00 : f32
    %47 = vector.broadcast %cst_33 : f32 to vector<8x8x128xf32>
    %48 = arith.maximumf %46, %47 : vector<8x8x128xf32>
    %49 = arith.truncf %48 : vector<8x8x128xf32> to vector<8x8x128xbf16>
    %50 = vector.shape_cast %49 : vector<8x8x128xbf16> to vector<64x128xbf16>
    %c0_34 = arith.constant 0 : index
    %c0_35 = arith.constant 0 : index
    %51 = vector.load %arg7[%c0_34, %c0_35] : memref<64x128xf32, #tpu.memory_space<vmem>>, vector<64x128xf32>
    %c2_36 = arith.constant 2 : index
    %c0_37 = arith.constant 0 : index
    %c0_38 = arith.constant 0 : index
    %52 = vector.load %arg2[%c2_36, %c0_37, %c0_38] : memref<9x128x128xbf16, #tpu.memory_space<vmem>>, vector<1x128x128xbf16>
    %53 = vector.shape_cast %52 : vector<1x128x128xbf16> to vector<128x128xbf16>
    %cst_39 = arith.constant dense<0.000000e+00> : vector<64x128xf32>
    %54 = tpu.matmul %50, %53, %cst_39 {dimension_numbers = #tpu.dot_dimension_numbers<[1], [0], [0], [1], [0, 0, 1, 1], [], []>} : vector<64x128xbf16>, vector<128x128xbf16>, vector<64x128xf32> -> vector<64x128xf32>
    %55 = arith.addf %51, %54 : vector<64x128xf32>
    %c0_40 = arith.constant 0 : index
    %c0_41 = arith.constant 0 : index
    %56 = vector.load %arg7[%c0_40, %c0_41] : memref<64x128xf32, #tpu.memory_space<vmem>>, vector<64x128xf32>
    tpu.vector_store %arg7[%c0_40, %c0_41], %55 {strides = array<i32>} : memref<64x128xf32, #tpu.memory_space<vmem>>, vector<64x128xf32>,
    %c0_42 = arith.constant 0 : index
    %c1_43 = arith.constant 1 : index
    %c0_44 = arith.constant 0 : index
    %c0_45 = arith.constant 0 : index
    %57 = vector.load %arg1[%c0_42, %c1_43, %c0_44, %c0_45] : memref<1x10x10x128xbf16, #tpu.memory_space<vmem>>, vector<1x8x8x128xbf16>
    %58 = vector.shape_cast %57 : vector<1x8x8x128xbf16> to vector<8x8x128xbf16>
    %59 = arith.extf %58 : vector<8x8x128xbf16> to vector<8x8x128xf32>
    %60 = vector.broadcast %1 : vector<1x1x128xf32> to vector<8x8x128xf32>
    %61 = arith.mulf %59, %60 : vector<8x8x128xf32>
    %62 = vector.broadcast %3 : vector<1x1x128xf32> to vector<8x8x128xf32>
    %63 = arith.addf %61, %62 : vector<8x8x128xf32>
    %cst_46 = arith.constant 0.000000e+00 : f32
    %64 = vector.broadcast %cst_46 : f32 to vector<8x8x128xf32>
    %65 = arith.maximumf %63, %64 : vector<8x8x128xf32>
    %66 = arith.truncf %65 : vector<8x8x128xf32> to vector<8x8x128xbf16>
    %67 = vector.shape_cast %66 : vector<8x8x128xbf16> to vector<64x128xbf16>
    %c0_47 = arith.constant 0 : index
    %c0_48 = arith.constant 0 : index
    %68 = vector.load %arg7[%c0_47, %c0_48] : memref<64x128xf32, #tpu.memory_space<vmem>>, vector<64x128xf32>
    %c3 = arith.constant 3 : index
    %c0_49 = arith.constant 0 : index
    %c0_50 = arith.constant 0 : index
    %69 = vector.load %arg2[%c3, %c0_49, %c0_50] : memref<9x128x128xbf16, #tpu.memory_space<vmem>>, vector<1x128x128xbf16>
    %70 = vector.shape_cast %69 : vector<1x128x128xbf16> to vector<128x128xbf16>
    %cst_51 = arith.constant dense<0.000000e+00> : vector<64x128xf32>
    %71 = tpu.matmul %67, %70, %cst_51 {dimension_numbers = #tpu.dot_dimension_numbers<[1], [0], [0], [1], [0, 0, 1, 1], [], []>} : vector<64x128xbf16>, vector<128x128xbf16>, vector<64x128xf32> -> vector<64x128xf32>
    %72 = arith.addf %68, %71 : vector<64x128xf32>
    %c0_52 = arith.constant 0 : index
    %c0_53 = arith.constant 0 : index
    %73 = vector.load %arg7[%c0_52, %c0_53] : memref<64x128xf32, #tpu.memory_space<vmem>>, vector<64x128xf32>
    tpu.vector_store %arg7[%c0_52, %c0_53], %72 {strides = array<i32>} : memref<64x128xf32, #tpu.memory_space<vmem>>, vector<64x128xf32>,
    %c0_54 = arith.constant 0 : index
    %c1_55 = arith.constant 1 : index
    %c1_56 = arith.constant 1 : index
    %c0_57 = arith.constant 0 : index
    %74 = vector.load %arg1[%c0_54, %c1_55, %c1_56, %c0_57] : memref<1x10x10x128xbf16, #tpu.memory_space<vmem>>, vector<1x8x8x128xbf16>
    %75 = vector.shape_cast %74 : vector<1x8x8x128xbf16> to vector<8x8x128xbf16>
    %76 = arith.extf %75 : vector<8x8x128xbf16> to vector<8x8x128xf32>
    %77 = vector.broadcast %1 : vector<1x1x128xf32> to vector<8x8x128xf32>
    %78 = arith.mulf %76, %77 : vector<8x8x128xf32>
    %79 = vector.broadcast %3 : vector<1x1x128xf32> to vector<8x8x128xf32>
    %80 = arith.addf %78, %79 : vector<8x8x128xf32>
    %cst_58 = arith.constant 0.000000e+00 : f32
    %81 = vector.broadcast %cst_58 : f32 to vector<8x8x128xf32>
    %82 = arith.maximumf %80, %81 : vector<8x8x128xf32>
    %83 = arith.truncf %82 : vector<8x8x128xf32> to vector<8x8x128xbf16>
    %84 = vector.shape_cast %83 : vector<8x8x128xbf16> to vector<64x128xbf16>
    %c0_59 = arith.constant 0 : index
    %c0_60 = arith.constant 0 : index
    %85 = vector.load %arg7[%c0_59, %c0_60] : memref<64x128xf32, #tpu.memory_space<vmem>>, vector<64x128xf32>
    %c4 = arith.constant 4 : index
    %c0_61 = arith.constant 0 : index
    %c0_62 = arith.constant 0 : index
    %86 = vector.load %arg2[%c4, %c0_61, %c0_62] : memref<9x128x128xbf16, #tpu.memory_space<vmem>>, vector<1x128x128xbf16>
    %87 = vector.shape_cast %86 : vector<1x128x128xbf16> to vector<128x128xbf16>
    %cst_63 = arith.constant dense<0.000000e+00> : vector<64x128xf32>
    %88 = tpu.matmul %84, %87, %cst_63 {dimension_numbers = #tpu.dot_dimension_numbers<[1], [0], [0], [1], [0, 0, 1, 1], [], []>} : vector<64x128xbf16>, vector<128x128xbf16>, vector<64x128xf32> -> vector<64x128xf32>
    %89 = arith.addf %85, %88 : vector<64x128xf32>
    %c0_64 = arith.constant 0 : index
    %c0_65 = arith.constant 0 : index
    %90 = vector.load %arg7[%c0_64, %c0_65] : memref<64x128xf32, #tpu.memory_space<vmem>>, vector<64x128xf32>
    tpu.vector_store %arg7[%c0_64, %c0_65], %89 {strides = array<i32>} : memref<64x128xf32, #tpu.memory_space<vmem>>, vector<64x128xf32>,
    %c0_66 = arith.constant 0 : index
    %c1_67 = arith.constant 1 : index
    %c2_68 = arith.constant 2 : index
    %c0_69 = arith.constant 0 : index
    %91 = vector.load %arg1[%c0_66, %c1_67, %c2_68, %c0_69] : memref<1x10x10x128xbf16, #tpu.memory_space<vmem>>, vector<1x8x8x128xbf16>
    %92 = vector.shape_cast %91 : vector<1x8x8x128xbf16> to vector<8x8x128xbf16>
    %93 = arith.extf %92 : vector<8x8x128xbf16> to vector<8x8x128xf32>
    %94 = vector.broadcast %1 : vector<1x1x128xf32> to vector<8x8x128xf32>
    %95 = arith.mulf %93, %94 : vector<8x8x128xf32>
    %96 = vector.broadcast %3 : vector<1x1x128xf32> to vector<8x8x128xf32>
    %97 = arith.addf %95, %96 : vector<8x8x128xf32>
    %cst_70 = arith.constant 0.000000e+00 : f32
    %98 = vector.broadcast %cst_70 : f32 to vector<8x8x128xf32>
    %99 = arith.maximumf %97, %98 : vector<8x8x128xf32>
    %100 = arith.truncf %99 : vector<8x8x128xf32> to vector<8x8x128xbf16>
    %101 = vector.shape_cast %100 : vector<8x8x128xbf16> to vector<64x128xbf16>
    %c0_71 = arith.constant 0 : index
    %c0_72 = arith.constant 0 : index
    %102 = vector.load %arg7[%c0_71, %c0_72] : memref<64x128xf32, #tpu.memory_space<vmem>>, vector<64x128xf32>
    %c5 = arith.constant 5 : index
    %c0_73 = arith.constant 0 : index
    %c0_74 = arith.constant 0 : index
    %103 = vector.load %arg2[%c5, %c0_73, %c0_74] : memref<9x128x128xbf16, #tpu.memory_space<vmem>>, vector<1x128x128xbf16>
    %104 = vector.shape_cast %103 : vector<1x128x128xbf16> to vector<128x128xbf16>
    %cst_75 = arith.constant dense<0.000000e+00> : vector<64x128xf32>
    %105 = tpu.matmul %101, %104, %cst_75 {dimension_numbers = #tpu.dot_dimension_numbers<[1], [0], [0], [1], [0, 0, 1, 1], [], []>} : vector<64x128xbf16>, vector<128x128xbf16>, vector<64x128xf32> -> vector<64x128xf32>
    %106 = arith.addf %102, %105 : vector<64x128xf32>
    %c0_76 = arith.constant 0 : index
    %c0_77 = arith.constant 0 : index
    %107 = vector.load %arg7[%c0_76, %c0_77] : memref<64x128xf32, #tpu.memory_space<vmem>>, vector<64x128xf32>
    tpu.vector_store %arg7[%c0_76, %c0_77], %106 {strides = array<i32>} : memref<64x128xf32, #tpu.memory_space<vmem>>, vector<64x128xf32>,
    %c0_78 = arith.constant 0 : index
    %c2_79 = arith.constant 2 : index
    %c0_80 = arith.constant 0 : index
    %c0_81 = arith.constant 0 : index
    %108 = vector.load %arg1[%c0_78, %c2_79, %c0_80, %c0_81] : memref<1x10x10x128xbf16, #tpu.memory_space<vmem>>, vector<1x8x8x128xbf16>
    %109 = vector.shape_cast %108 : vector<1x8x8x128xbf16> to vector<8x8x128xbf16>
    %110 = arith.extf %109 : vector<8x8x128xbf16> to vector<8x8x128xf32>
    %111 = vector.broadcast %1 : vector<1x1x128xf32> to vector<8x8x128xf32>
    %112 = arith.mulf %110, %111 : vector<8x8x128xf32>
    %113 = vector.broadcast %3 : vector<1x1x128xf32> to vector<8x8x128xf32>
    %114 = arith.addf %112, %113 : vector<8x8x128xf32>
    %cst_82 = arith.constant 0.000000e+00 : f32
    %115 = vector.broadcast %cst_82 : f32 to vector<8x8x128xf32>
    %116 = arith.maximumf %114, %115 : vector<8x8x128xf32>
    %117 = arith.truncf %116 : vector<8x8x128xf32> to vector<8x8x128xbf16>
    %118 = vector.shape_cast %117 : vector<8x8x128xbf16> to vector<64x128xbf16>
    %c0_83 = arith.constant 0 : index
    %c0_84 = arith.constant 0 : index
    %119 = vector.load %arg7[%c0_83, %c0_84] : memref<64x128xf32, #tpu.memory_space<vmem>>, vector<64x128xf32>
    %c6 = arith.constant 6 : index
    %c0_85 = arith.constant 0 : index
    %c0_86 = arith.constant 0 : index
    %120 = vector.load %arg2[%c6, %c0_85, %c0_86] : memref<9x128x128xbf16, #tpu.memory_space<vmem>>, vector<1x128x128xbf16>
    %121 = vector.shape_cast %120 : vector<1x128x128xbf16> to vector<128x128xbf16>
    %cst_87 = arith.constant dense<0.000000e+00> : vector<64x128xf32>
    %122 = tpu.matmul %118, %121, %cst_87 {dimension_numbers = #tpu.dot_dimension_numbers<[1], [0], [0], [1], [0, 0, 1, 1], [], []>} : vector<64x128xbf16>, vector<128x128xbf16>, vector<64x128xf32> -> vector<64x128xf32>
    %123 = arith.addf %119, %122 : vector<64x128xf32>
    %c0_88 = arith.constant 0 : index
    %c0_89 = arith.constant 0 : index
    %124 = vector.load %arg7[%c0_88, %c0_89] : memref<64x128xf32, #tpu.memory_space<vmem>>, vector<64x128xf32>
    tpu.vector_store %arg7[%c0_88, %c0_89], %123 {strides = array<i32>} : memref<64x128xf32, #tpu.memory_space<vmem>>, vector<64x128xf32>,
    %c0_90 = arith.constant 0 : index
    %c2_91 = arith.constant 2 : index
    %c1_92 = arith.constant 1 : index
    %c0_93 = arith.constant 0 : index
    %125 = vector.load %arg1[%c0_90, %c2_91, %c1_92, %c0_93] : memref<1x10x10x128xbf16, #tpu.memory_space<vmem>>, vector<1x8x8x128xbf16>
    %126 = vector.shape_cast %125 : vector<1x8x8x128xbf16> to vector<8x8x128xbf16>
    %127 = arith.extf %126 : vector<8x8x128xbf16> to vector<8x8x128xf32>
    %128 = vector.broadcast %1 : vector<1x1x128xf32> to vector<8x8x128xf32>
    %129 = arith.mulf %127, %128 : vector<8x8x128xf32>
    %130 = vector.broadcast %3 : vector<1x1x128xf32> to vector<8x8x128xf32>
    %131 = arith.addf %129, %130 : vector<8x8x128xf32>
    %cst_94 = arith.constant 0.000000e+00 : f32
    %132 = vector.broadcast %cst_94 : f32 to vector<8x8x128xf32>
    %133 = arith.maximumf %131, %132 : vector<8x8x128xf32>
    %134 = arith.truncf %133 : vector<8x8x128xf32> to vector<8x8x128xbf16>
    %135 = vector.shape_cast %134 : vector<8x8x128xbf16> to vector<64x128xbf16>
    %c0_95 = arith.constant 0 : index
    %c0_96 = arith.constant 0 : index
    %136 = vector.load %arg7[%c0_95, %c0_96] : memref<64x128xf32, #tpu.memory_space<vmem>>, vector<64x128xf32>
    %c7 = arith.constant 7 : index
    %c0_97 = arith.constant 0 : index
    %c0_98 = arith.constant 0 : index
    %137 = vector.load %arg2[%c7, %c0_97, %c0_98] : memref<9x128x128xbf16, #tpu.memory_space<vmem>>, vector<1x128x128xbf16>
    %138 = vector.shape_cast %137 : vector<1x128x128xbf16> to vector<128x128xbf16>
    %cst_99 = arith.constant dense<0.000000e+00> : vector<64x128xf32>
    %139 = tpu.matmul %135, %138, %cst_99 {dimension_numbers = #tpu.dot_dimension_numbers<[1], [0], [0], [1], [0, 0, 1, 1], [], []>} : vector<64x128xbf16>, vector<128x128xbf16>, vector<64x128xf32> -> vector<64x128xf32>
    %140 = arith.addf %136, %139 : vector<64x128xf32>
    %c0_100 = arith.constant 0 : index
    %c0_101 = arith.constant 0 : index
    %141 = vector.load %arg7[%c0_100, %c0_101] : memref<64x128xf32, #tpu.memory_space<vmem>>, vector<64x128xf32>
    tpu.vector_store %arg7[%c0_100, %c0_101], %140 {strides = array<i32>} : memref<64x128xf32, #tpu.memory_space<vmem>>, vector<64x128xf32>,
    %c0_102 = arith.constant 0 : index
    %c2_103 = arith.constant 2 : index
    %c2_104 = arith.constant 2 : index
    %c0_105 = arith.constant 0 : index
    %142 = vector.load %arg1[%c0_102, %c2_103, %c2_104, %c0_105] : memref<1x10x10x128xbf16, #tpu.memory_space<vmem>>, vector<1x8x8x128xbf16>
    %143 = vector.shape_cast %142 : vector<1x8x8x128xbf16> to vector<8x8x128xbf16>
    %144 = arith.extf %143 : vector<8x8x128xbf16> to vector<8x8x128xf32>
    %145 = vector.broadcast %1 : vector<1x1x128xf32> to vector<8x8x128xf32>
    %146 = arith.mulf %144, %145 : vector<8x8x128xf32>
    %147 = vector.broadcast %3 : vector<1x1x128xf32> to vector<8x8x128xf32>
    %148 = arith.addf %146, %147 : vector<8x8x128xf32>
    %cst_106 = arith.constant 0.000000e+00 : f32
    %149 = vector.broadcast %cst_106 : f32 to vector<8x8x128xf32>
    %150 = arith.maximumf %148, %149 : vector<8x8x128xf32>
    %151 = arith.truncf %150 : vector<8x8x128xf32> to vector<8x8x128xbf16>
    %152 = vector.shape_cast %151 : vector<8x8x128xbf16> to vector<64x128xbf16>
    %c0_107 = arith.constant 0 : index
    %c0_108 = arith.constant 0 : index
    %153 = vector.load %arg7[%c0_107, %c0_108] : memref<64x128xf32, #tpu.memory_space<vmem>>, vector<64x128xf32>
    %c8 = arith.constant 8 : index
    %c0_109 = arith.constant 0 : index
    %c0_110 = arith.constant 0 : index
    %154 = vector.load %arg2[%c8, %c0_109, %c0_110] : memref<9x128x128xbf16, #tpu.memory_space<vmem>>, vector<1x128x128xbf16>
    %155 = vector.shape_cast %154 : vector<1x128x128xbf16> to vector<128x128xbf16>
    %cst_111 = arith.constant dense<0.000000e+00> : vector<64x128xf32>
    %156 = tpu.matmul %152, %155, %cst_111 {dimension_numbers = #tpu.dot_dimension_numbers<[1], [0], [0], [1], [0, 0, 1, 1], [], []>} : vector<64x128xbf16>, vector<128x128xbf16>, vector<64x128xf32> -> vector<64x128xf32>
    %157 = arith.addf %153, %156 : vector<64x128xf32>
    %c0_112 = arith.constant 0 : index
    %c0_113 = arith.constant 0 : index
    %158 = vector.load %arg7[%c0_112, %c0_113] : memref<64x128xf32, #tpu.memory_space<vmem>>, vector<64x128xf32>
    tpu.vector_store %arg7[%c0_112, %c0_113], %157 {strides = array<i32>} : memref<64x128xf32, #tpu.memory_space<vmem>>, vector<64x128xf32>,
    %c0_114 = arith.constant 0 : index
    %c0_115 = arith.constant 0 : index
    %159 = vector.load %arg7[%c0_114, %c0_115] : memref<64x128xf32, #tpu.memory_space<vmem>>, vector<64x128xf32>
    %c0_116 = arith.constant 0 : index
    %c0_117 = arith.constant 0 : index
    %c0_118 = arith.constant 0 : index
    %160 = vector.load %arg5[%c0_116, %c0_117, %c0_118] : memref<1x64x128xf32, #tpu.memory_space<vmem>>, vector<1x64x128xf32>
    %161 = vector.shape_cast %160 : vector<1x64x128xf32> to vector<64x128xf32>
    %162 = vector.shape_cast %159 : vector<64x128xf32> to vector<1x64x128xf32>
    tpu.vector_store %arg5[%c0_116, %c0_117, %c0_118], %162 {strides = array<i32>} : memref<1x64x128xf32, #tpu.memory_space<vmem>>, vector<1x64x128xf32>,
    %cst_119 = arith.constant dense<0.000000e+00> : vector<128xf32>
    %163 = vector.multi_reduction <add>, %159, %cst_119 [0] : vector<64x128xf32> to vector<128xf32>
    %164 = vector.shape_cast %163 : vector<128xf32> to vector<1x128xf32>
    %165 = arith.mulf %159, %159 : vector<64x128xf32>
    %cst_120 = arith.constant dense<0.000000e+00> : vector<128xf32>
    %166 = vector.multi_reduction <add>, %165, %cst_120 [0] : vector<64x128xf32> to vector<128xf32>
    %167 = vector.shape_cast %166 : vector<128xf32> to vector<1x128xf32>
    %168 = tpu.concatenate %164, %167 in 0 : vector<1x128xf32>, vector<1x128xf32> -> vector<2x128xf32>
    %c0_121 = arith.constant 0 : index
    %c0_122 = arith.constant 0 : index
    %c0_123 = arith.constant 0 : index
    %169 = vector.load %arg6[%c0_121, %c0_122, %c0_123] : memref<1x2x128xf32, #tpu.memory_space<vmem>>, vector<1x2x128xf32>
    %170 = vector.shape_cast %169 : vector<1x2x128xf32> to vector<2x128xf32>
    %171 = vector.shape_cast %168 : vector<2x128xf32> to vector<1x2x128xf32>
    tpu.vector_store %arg6[%c0_121, %c0_122, %c0_123], %171 {strides = array<i32>} : memref<1x2x128xf32, #tpu.memory_space<vmem>>, vector<1x2x128xf32>,
    return
  }
  func.func @transform_0(%arg0: i32) -> (i32, i32, i32, i32) {
    %c0_i32 = arith.constant 0 : i32
    %c0_i32_0 = arith.constant 0 : i32
    %c0_i32_1 = arith.constant 0 : i32
    %c0_i32_2 = arith.constant 0 : i32
    return %arg0, %c0_i32, %c0_i32_0, %c0_i32_1 : i32, i32, i32, i32
  }
  func.func @transform_1(%arg0: i32) -> (i32, i32, i32) {
    %c0_i32 = arith.constant 0 : i32
    %c0_i32_0 = arith.constant 0 : i32
    %c0_i32_1 = arith.constant 0 : i32
    %c0_i32_2 = arith.constant 0 : i32
    return %c0_i32, %c0_i32_0, %c0_i32_1 : i32, i32, i32
  }
  func.func @transform_2(%arg0: i32) -> (i32, i32) {
    %c0_i32 = arith.constant 0 : i32
    %c0_i32_0 = arith.constant 0 : i32
    %c0_i32_1 = arith.constant 0 : i32
    return %c0_i32, %c0_i32_0 : i32, i32
  }
  func.func @transform_3(%arg0: i32) -> (i32, i32) {
    %c0_i32 = arith.constant 0 : i32
    %c0_i32_0 = arith.constant 0 : i32
    %c0_i32_1 = arith.constant 0 : i32
    return %c0_i32, %c0_i32_0 : i32, i32
  }
  func.func @transform_4(%arg0: i32) -> (i32, i32, i32) {
    %c0_i32 = arith.constant 0 : i32
    %c0_i32_0 = arith.constant 0 : i32
    %c0_i32_1 = arith.constant 0 : i32
    return %arg0, %c0_i32, %c0_i32_0 : i32, i32, i32
  }
  func.func @transform_5(%arg0: i32) -> (i32, i32, i32) {
    %c0_i32 = arith.constant 0 : i32
    %c0_i32_0 = arith.constant 0 : i32
    %c0_i32_1 = arith.constant 0 : i32
    return %arg0, %c0_i32, %c0_i32_0 : i32, i32, i32
  }
}

module attributes {stable_mosaic.version = 11 : i64} {
  func.func @kernel(%arg0: i32, %arg1: memref<1x8x8x128xbf16, #tpu.memory_space<vmem>>, %arg2: memref<1x128x128xbf16, #tpu.memory_space<vmem>>, %arg3: memref<1x64x128xf32, #tpu.memory_space<vmem>>, %arg4: memref<1x2x128xf32, #tpu.memory_space<vmem>>, %arg5: memref<64x128xf32, #tpu.memory_space<vmem>>) attributes {dimension_semantics = [#tpu.dimension_semantics<parallel>], iteration_bounds = array<i64: 2>, scalar_prefetch = 0 : i64, scratch_operands = 1 : i64, tpu.core_type = #tpu.core_type<tc>, window_params = [{transform_indices = @transform_0, window_bounds = array<i64: 1, 8, 8, 128>}, {pipeline_mode = #tpu.pipeline_mode<synchronous>, transform_indices = @transform_1, window_bounds = array<i64: 1, 128, 128>}, {transform_indices = @transform_2, window_bounds = array<i64: 1, 64, 128>}, {transform_indices = @transform_3, window_bounds = array<i64: 1, 2, 128>}]} {
    %cst = arith.constant 0.000000e+00 : f32
    %0 = vector.broadcast %cst : f32 to vector<64x128xf32>
    %c0 = arith.constant 0 : index
    %c0_0 = arith.constant 0 : index
    %1 = vector.load %arg5[%c0, %c0_0] : memref<64x128xf32, #tpu.memory_space<vmem>>, vector<64x128xf32>
    tpu.vector_store %arg5[%c0, %c0_0], %0 {strides = array<i32>} : memref<64x128xf32, #tpu.memory_space<vmem>>, vector<64x128xf32>,
    %c0_1 = arith.constant 0 : index
    %c0_2 = arith.constant 0 : index
    %c0_3 = arith.constant 0 : index
    %c0_4 = arith.constant 0 : index
    %2 = vector.load %arg1[%c0_1, %c0_2, %c0_3, %c0_4] : memref<1x8x8x128xbf16, #tpu.memory_space<vmem>>, vector<1x8x8x128xbf16>
    %3 = vector.shape_cast %2 : vector<1x8x8x128xbf16> to vector<8x8x128xbf16>
    %4 = vector.shape_cast %3 : vector<8x8x128xbf16> to vector<64x128xbf16>
    %c0_5 = arith.constant 0 : index
    %c0_6 = arith.constant 0 : index
    %5 = vector.load %arg5[%c0_5, %c0_6] : memref<64x128xf32, #tpu.memory_space<vmem>>, vector<64x128xf32>
    %c0_7 = arith.constant 0 : index
    %c0_8 = arith.constant 0 : index
    %c0_9 = arith.constant 0 : index
    %6 = vector.load %arg2[%c0_7, %c0_8, %c0_9] : memref<1x128x128xbf16, #tpu.memory_space<vmem>>, vector<1x128x128xbf16>
    %7 = vector.shape_cast %6 : vector<1x128x128xbf16> to vector<128x128xbf16>
    %cst_10 = arith.constant dense<0.000000e+00> : vector<64x128xf32>
    %8 = tpu.matmul %4, %7, %cst_10 {dimension_numbers = #tpu.dot_dimension_numbers<[1], [0], [0], [1], [0, 0, 1, 1], [], []>} : vector<64x128xbf16>, vector<128x128xbf16>, vector<64x128xf32> -> vector<64x128xf32>
    %9 = arith.addf %5, %8 : vector<64x128xf32>
    %c0_11 = arith.constant 0 : index
    %c0_12 = arith.constant 0 : index
    %10 = vector.load %arg5[%c0_11, %c0_12] : memref<64x128xf32, #tpu.memory_space<vmem>>, vector<64x128xf32>
    tpu.vector_store %arg5[%c0_11, %c0_12], %9 {strides = array<i32>} : memref<64x128xf32, #tpu.memory_space<vmem>>, vector<64x128xf32>,
    %c0_13 = arith.constant 0 : index
    %c0_14 = arith.constant 0 : index
    %11 = vector.load %arg5[%c0_13, %c0_14] : memref<64x128xf32, #tpu.memory_space<vmem>>, vector<64x128xf32>
    %c0_15 = arith.constant 0 : index
    %c0_16 = arith.constant 0 : index
    %c0_17 = arith.constant 0 : index
    %12 = vector.load %arg3[%c0_15, %c0_16, %c0_17] : memref<1x64x128xf32, #tpu.memory_space<vmem>>, vector<1x64x128xf32>
    %13 = vector.shape_cast %12 : vector<1x64x128xf32> to vector<64x128xf32>
    %14 = vector.shape_cast %11 : vector<64x128xf32> to vector<1x64x128xf32>
    tpu.vector_store %arg3[%c0_15, %c0_16, %c0_17], %14 {strides = array<i32>} : memref<1x64x128xf32, #tpu.memory_space<vmem>>, vector<1x64x128xf32>,
    %cst_18 = arith.constant dense<0.000000e+00> : vector<128xf32>
    %15 = vector.multi_reduction <add>, %11, %cst_18 [0] : vector<64x128xf32> to vector<128xf32>
    %16 = vector.shape_cast %15 : vector<128xf32> to vector<1x128xf32>
    %17 = arith.mulf %11, %11 : vector<64x128xf32>
    %cst_19 = arith.constant dense<0.000000e+00> : vector<128xf32>
    %18 = vector.multi_reduction <add>, %17, %cst_19 [0] : vector<64x128xf32> to vector<128xf32>
    %19 = vector.shape_cast %18 : vector<128xf32> to vector<1x128xf32>
    %20 = tpu.concatenate %16, %19 in 0 : vector<1x128xf32>, vector<1x128xf32> -> vector<2x128xf32>
    %c0_20 = arith.constant 0 : index
    %c0_21 = arith.constant 0 : index
    %c0_22 = arith.constant 0 : index
    %21 = vector.load %arg4[%c0_20, %c0_21, %c0_22] : memref<1x2x128xf32, #tpu.memory_space<vmem>>, vector<1x2x128xf32>
    %22 = vector.shape_cast %21 : vector<1x2x128xf32> to vector<2x128xf32>
    %23 = vector.shape_cast %20 : vector<2x128xf32> to vector<1x2x128xf32>
    tpu.vector_store %arg4[%c0_20, %c0_21, %c0_22], %23 {strides = array<i32>} : memref<1x2x128xf32, #tpu.memory_space<vmem>>, vector<1x2x128xf32>,
    return
  }
  func.func @transform_0(%arg0: i32) -> (i32, i32, i32, i32) {
    %c0_i32 = arith.constant 0 : i32
    %c0_i32_0 = arith.constant 0 : i32
    %c0_i32_1 = arith.constant 0 : i32
    %c0_i32_2 = arith.constant 0 : i32
    return %arg0, %c0_i32, %c0_i32_0, %c0_i32_1 : i32, i32, i32, i32
  }
  func.func @transform_1(%arg0: i32) -> (i32, i32, i32) {
    %c0_i32 = arith.constant 0 : i32
    %c0_i32_0 = arith.constant 0 : i32
    %c0_i32_1 = arith.constant 0 : i32
    %c0_i32_2 = arith.constant 0 : i32
    return %c0_i32, %c0_i32_0, %c0_i32_1 : i32, i32, i32
  }
  func.func @transform_2(%arg0: i32) -> (i32, i32, i32) {
    %c0_i32 = arith.constant 0 : i32
    %c0_i32_0 = arith.constant 0 : i32
    %c0_i32_1 = arith.constant 0 : i32
    return %arg0, %c0_i32, %c0_i32_0 : i32, i32, i32
  }
  func.func @transform_3(%arg0: i32) -> (i32, i32, i32) {
    %c0_i32 = arith.constant 0 : i32
    %c0_i32_0 = arith.constant 0 : i32
    %c0_i32_1 = arith.constant 0 : i32
    return %arg0, %c0_i32, %c0_i32_0 : i32, i32, i32
  }
}

module attributes {stable_mosaic.version = 11 : i64} {
  func.func @kernel(%arg0: i32, %arg1: memref<1x64x128xf32, #tpu.memory_space<vmem>>, %arg2: memref<1x128xf32, #tpu.memory_space<vmem>>, %arg3: memref<1x128xf32, #tpu.memory_space<vmem>>, %arg4: memref<1x64x128xf32, #tpu.memory_space<vmem>>, %arg5: memref<1x128xf32, #tpu.memory_space<vmem>>, %arg6: memref<1x128xf32, #tpu.memory_space<vmem>>, %arg7: memref<1x64x128xf32, #tpu.memory_space<vmem>>) attributes {dimension_semantics = [#tpu.dimension_semantics<parallel>], iteration_bounds = array<i64: 2>, scalar_prefetch = 0 : i64, scratch_operands = 0 : i64, tpu.core_type = #tpu.core_type<tc>, window_params = [{transform_indices = @transform_0, window_bounds = array<i64: 1, 64, 128>}, {pipeline_mode = #tpu.pipeline_mode<synchronous>, transform_indices = @transform_1, window_bounds = array<i64: 1, 128>}, {pipeline_mode = #tpu.pipeline_mode<synchronous>, transform_indices = @transform_2, window_bounds = array<i64: 1, 128>}, {transform_indices = @transform_3, window_bounds = array<i64: 1, 64, 128>}, {pipeline_mode = #tpu.pipeline_mode<synchronous>, transform_indices = @transform_4, window_bounds = array<i64: 1, 128>}, {pipeline_mode = #tpu.pipeline_mode<synchronous>, transform_indices = @transform_5, window_bounds = array<i64: 1, 128>}, {transform_indices = @transform_6, window_bounds = array<i64: 1, 64, 128>}]} {
    %c0 = arith.constant 0 : index
    %c0_0 = arith.constant 0 : index
    %c0_1 = arith.constant 0 : index
    %0 = vector.load %arg1[%c0, %c0_0, %c0_1] : memref<1x64x128xf32, #tpu.memory_space<vmem>>, vector<1x64x128xf32>
    %1 = vector.shape_cast %0 : vector<1x64x128xf32> to vector<64x128xf32>
    %c0_2 = arith.constant 0 : index
    %c0_3 = arith.constant 0 : index
    %2 = vector.load %arg2[%c0_2, %c0_3] : memref<1x128xf32, #tpu.memory_space<vmem>>, vector<1x128xf32>
    %3 = vector.broadcast %2 : vector<1x128xf32> to vector<64x128xf32>
    %4 = arith.mulf %1, %3 : vector<64x128xf32>
    %c0_4 = arith.constant 0 : index
    %c0_5 = arith.constant 0 : index
    %5 = vector.load %arg3[%c0_4, %c0_5] : memref<1x128xf32, #tpu.memory_space<vmem>>, vector<1x128xf32>
    %6 = vector.broadcast %5 : vector<1x128xf32> to vector<64x128xf32>
    %7 = arith.addf %4, %6 : vector<64x128xf32>
    %c0_6 = arith.constant 0 : index
    %c0_7 = arith.constant 0 : index
    %c0_8 = arith.constant 0 : index
    %8 = vector.load %arg4[%c0_6, %c0_7, %c0_8] : memref<1x64x128xf32, #tpu.memory_space<vmem>>, vector<1x64x128xf32>
    %9 = vector.shape_cast %8 : vector<1x64x128xf32> to vector<64x128xf32>
    %c0_9 = arith.constant 0 : index
    %c0_10 = arith.constant 0 : index
    %10 = vector.load %arg5[%c0_9, %c0_10] : memref<1x128xf32, #tpu.memory_space<vmem>>, vector<1x128xf32>
    %11 = vector.broadcast %10 : vector<1x128xf32> to vector<64x128xf32>
    %12 = arith.mulf %9, %11 : vector<64x128xf32>
    %c0_11 = arith.constant 0 : index
    %c0_12 = arith.constant 0 : index
    %13 = vector.load %arg6[%c0_11, %c0_12] : memref<1x128xf32, #tpu.memory_space<vmem>>, vector<1x128xf32>
    %14 = vector.broadcast %13 : vector<1x128xf32> to vector<64x128xf32>
    %15 = arith.addf %12, %14 : vector<64x128xf32>
    %16 = arith.addf %7, %15 : vector<64x128xf32>
    %cst = arith.constant 0.000000e+00 : f32
    %17 = vector.broadcast %cst : f32 to vector<64x128xf32>
    %18 = arith.maximumf %16, %17 : vector<64x128xf32>
    %c0_13 = arith.constant 0 : index
    %c0_14 = arith.constant 0 : index
    %c0_15 = arith.constant 0 : index
    %19 = vector.load %arg7[%c0_13, %c0_14, %c0_15] : memref<1x64x128xf32, #tpu.memory_space<vmem>>, vector<1x64x128xf32>
    %20 = vector.shape_cast %19 : vector<1x64x128xf32> to vector<64x128xf32>
    %21 = vector.shape_cast %18 : vector<64x128xf32> to vector<1x64x128xf32>
    tpu.vector_store %arg7[%c0_13, %c0_14, %c0_15], %21 {strides = array<i32>} : memref<1x64x128xf32, #tpu.memory_space<vmem>>, vector<1x64x128xf32>,
    return
  }
  func.func @transform_0(%arg0: i32) -> (i32, i32, i32) {
    %c0_i32 = arith.constant 0 : i32
    %c0_i32_0 = arith.constant 0 : i32
    %c0_i32_1 = arith.constant 0 : i32
    return %arg0, %c0_i32, %c0_i32_0 : i32, i32, i32
  }
  func.func @transform_1(%arg0: i32) -> (i32, i32) {
    %c0_i32 = arith.constant 0 : i32
    %c0_i32_0 = arith.constant 0 : i32
    %c0_i32_1 = arith.constant 0 : i32
    return %c0_i32, %c0_i32_0 : i32, i32
  }
  func.func @transform_2(%arg0: i32) -> (i32, i32) {
    %c0_i32 = arith.constant 0 : i32
    %c0_i32_0 = arith.constant 0 : i32
    %c0_i32_1 = arith.constant 0 : i32
    return %c0_i32, %c0_i32_0 : i32, i32
  }
  func.func @transform_3(%arg0: i32) -> (i32, i32, i32) {
    %c0_i32 = arith.constant 0 : i32
    %c0_i32_0 = arith.constant 0 : i32
    %c0_i32_1 = arith.constant 0 : i32
    return %arg0, %c0_i32, %c0_i32_0 : i32, i32, i32
  }
  func.func @transform_4(%arg0: i32) -> (i32, i32) {
    %c0_i32 = arith.constant 0 : i32
    %c0_i32_0 = arith.constant 0 : i32
    %c0_i32_1 = arith.constant 0 : i32
    return %c0_i32, %c0_i32_0 : i32, i32
  }
  func.func @transform_5(%arg0: i32) -> (i32, i32) {
    %c0_i32 = arith.constant 0 : i32
    %c0_i32_0 = arith.constant 0 : i32
    %c0_i32_1 = arith.constant 0 : i32
    return %c0_i32, %c0_i32_0 : i32, i32
  }
  func.func @transform_6(%arg0: i32) -> (i32, i32, i32) {
    %c0_i32 = arith.constant 0 : i32
    %c0_i32_0 = arith.constant 0 : i32
    %c0_i32_1 = arith.constant 0 : i32
    return %arg0, %c0_i32, %c0_i32_0 : i32, i32, i32
  }
}

</mosaic_0001>

<bundles_post_ra>
// kernel: resblock_forward.7
= control target key start
LH: loop header
LB: loop body
LE: loop exit
PB: predicated region body
PF: predicated region fallthrough
CT: control target
= control target key end

     0   :  { %s498_s21 = smov 0   ;;  %s585_s0 = inlined_call_operand.vmem [shape: f32[2,64,128], index: 0, kind: input, shape index: {}]   ;;  %s586_s1 = inlined_call_operand.vmem [shape: f32[1,128], index: 1, kind: input, shape index: {}]   ;;  %s587_s2 = inlined_call_operand.vmem [shape: f32[1,128], index: 2, kind: input, shape index: {}]   ;;  %s588_s3 = inlined_call_operand.vmem [shape: f32[2,64,128], index: 3, kind: input, shape index: {}]   ;;  %s589_s4 = inlined_call_operand.vmem [shape: f32[1,128], index: 4, kind: input, shape index: {}]   ;;  %s590_s5 = inlined_call_operand.vmem [shape: f32[1,128], index: 5, kind: input, shape index: {}]   ;;  %s591_s6 = inlined_call_operand.vmem [shape: f32[2,64,128], index: 6, kind: output, shape index: {}]  }
   0x1 LB: > { %s427_s22 = sadd.s32 4294967295, %s461_s21   ;;  %p431_p0 = scmp.ge.s32.totalorder %s461_s21, 1  ;;  %s461_s21 = sphi %s498_s21, %s16_s21  }
   0x2   : > { %p222_p1 = scmp.lt.s32.totalorder %s461_s21, 3 }
   0x4   : > { %p223_p2 = pnand %p431_p0, %p222_p1 }
   0x5   : > { %p257_p3 = scmp.lt.s32.totalorder (!%p223_p2), %s427_s22, 1 }
   0x6   : > { %226 = sbr.rel (%p223_p2) target bundleno = 34 (0x22), region = 44 }
   0xb   : > { %s593_s22 = smov (!%p257_p3, %s427_s22), 1  ;;  %v451_v0 = vld [vmem:[%s586_s1] ss:$0 sm:$0xff] }
   0xc   : > { %v453_v1 = vld [vmem:[%s589_s4] ss:$0 sm:$0xff]  ;;  %s512_s27 = sshll.u32 %s593_s22, 6 }
   0xd   : > { %s518_s30 = scalar_lea.vmem %s585_s0, %s512_s27  ;;  %s524_s9 = scalar_lea.vmem %s588_s3, %s512_s27  ;;  %v529_v2 = vld [vmem:[%s587_s2] ss:$0 sm:$0xff] }
   0xe   : > { %v534_v3 = vld [vmem:[%s590_s5] ss:$0 sm:$0xff]  ;;  %v273_v6 = vld [vmem:[%s518_s30 + $0x8] sm:$0xff]  ;;  %v274_v11 = vld [vmem:[%s518_s30 + $0x10] sm:$0xff]  ;;  %s559_s16 = scalar_lea.vmem %s591_s6, %s512_s27 }
   0xf   : > { %v272_v4 = vld [vmem:[%s518_s30] sm:$0xff]  ;;  %v285_v9 = vmul.f32 %v451_v0, %v273_v6  ;;  %v305_v10 = vld [vmem:[%s524_s9 + $0x8] sm:$0xff]  ;;  %v306_v12 = vld [vmem:[%s524_s9 + $0x10] sm:$0xff]  ;;  %v286_v14 = vmul.f32 %v451_v0, %v274_v11 }
  0x10   : > { %v304_v5 = vld [vmem:[%s524_s9] sm:$0xff]  ;;  %v284_v7 = vmul.f32 %v451_v0, %v272_v4  ;;  %v317_v13 = vmul.f32 %v453_v1, %v305_v10  ;;  %v318_v15 = vmul.f32 %v453_v1, %v306_v12  ;;  %v275_v16 = vld [vmem:[%s518_s30 + $0x18] sm:$0xff]  ;;  %v277_v24 = vld [vmem:[%s518_s30 + $0x28] sm:$0xff] }
  0x11   : > { %v316_v8 = vmul.f32 %v453_v1, %v304_v5  ;;  %v307_v17 = vld [vmem:[%s524_s9 + $0x18] sm:$0xff]  ;;  %v276_v18 = vld [vmem:[%s518_s30 + $0x20] sm:$0xff]  ;;  %v297_v21 = vadd.f32 %v529_v2, %v285_v9  ;;  %v287_v22 = vmul.f32 %v451_v0, %v275_v16  ;;  %v298_v26 = vadd.f32 %v529_v2, %v286_v14  ;;  %v309_v29 = vld [vmem:[%s524_s9 + $0x28] sm:$0xff] }
  0x12   : > { %v296_v19 = vadd.f32 %v529_v2, %v284_v7  ;;  %v308_v23 = vld [vmem:[%s524_s9 + $0x20] sm:$0xff]  ;;  %v329_v25 = vadd.f32 %v534_v3, %v317_v13  ;;  %v330_v27 = vadd.f32 %v534_v3, %v318_v15  ;;  %v319_v28 = vmul.f32 %v453_v1, %v307_v17  ;;  %v278_v38 = vld [vmem:[%s518_s30 + $0x30] sm:$0xff]  ;;  %v279_v44 = vld [vmem:[%s518_s30 + $0x38] sm:$0xff] }
  0x13   : > { %v328_v20 = vadd.f32 %v534_v3, %v316_v8  ;;  %v299_v31 = vadd.f32 %v529_v2, %v287_v22  ;;  %v288_v32 = vmul.f32 %v451_v0, %v276_v18  ;;  %v320_v33 = vmul.f32 %v453_v1, %v308_v23  ;;  %v310_v39 = vld [vmem:[%s524_s9 + $0x30] sm:$0xff]  ;;  %v311_v45 = vld [vmem:[%s524_s9 + $0x38] sm:$0xff] }
  0x14   : > { %v337_v34 = vadd.f32 %v329_v25, %v297_v21  ;;  %v338_v35 = vadd.f32 %v330_v27, %v298_v26  ;;  %v331_v36 = vadd.f32 %v534_v3, %v319_v28  ;;  %v289_v37 = vmul.f32 %v451_v0, %v277_v24 }
  0x15   : > { %v336_v30 = vadd.f32 %v328_v20, %v296_v19  ;;  %v300_v41 = vadd.f32 %v529_v2, %v288_v32  ;;  %v332_v42 = vadd.f32 %v534_v3, %v320_v33  ;;  %v321_v43 = vmul.f32 %v453_v1, %v309_v29 }
  0x16   : > { %v345_v46 = vmax.f32 %v337_v34, 0.0  ;;  %v346_v47 = vmax.f32 %v338_v35, 0.0  ;;  %v339_v48 = vadd.f32 %v331_v36, %v299_v31  ;;  %v301_v49 = vadd.f32 %v529_v2, %v289_v37 }
  0x17   : > { %v344_v40 = vmax.f32 %v336_v30, 0.0  ;;  %v340_v50 = vadd.f32 %v332_v42, %v300_v41  ;;  %v333_v51 = vadd.f32 %v534_v3, %v321_v43  ;;  %v290_v52 = vmul.f32 %v451_v0, %v278_v38 }
  0x18   : > { %v322_v53 = vmul.f32 %v453_v1, %v310_v39  ;;  %353 = vst [vmem:[%s559_s16 + $0x8] sm:$0xff] %v345_v46  ;;  %v347_v54 = vmax.f32 %v339_v48, 0.0  ;;  %v291_v55 = vmul.f32 %v451_v0, %v279_v44  ;;  %v323_v56 = vmul.f32 %v453_v1, %v311_v45 }
  0x19   : > { %352 = vst [vmem:[%s559_s16] sm:$0xff] %v344_v40  ;;  %v348_v57 = vmax.f32 %v340_v50, 0.0  ;;  %v341_v58 = vadd.f32 %v333_v51, %v301_v49  ;;  %v302_v59 = vadd.f32 %v529_v2, %v290_v52 }
  0x1a   : > { %354 = vst [vmem:[%s559_s16 + $0x10] sm:$0xff] %v346_v47  ;;  %v334_v60 = vadd.f32 %v534_v3, %v322_v53  ;;  %v303_v61 = vadd.f32 %v529_v2, %v291_v55  ;;  %v335_v62 = vadd.f32 %v534_v3, %v323_v56 }
  0x1b   : > { %355 = vst [vmem:[%s559_s16 + $0x18] sm:$0xff] %v347_v54  ;;  %v349_v63 = vmax.f32 %v341_v58, 0.0 }
  0x1c   : > { %356 = vst [vmem:[%s559_s16 + $0x20] sm:$0xff] %v348_v57  ;;  %v342_v4 = vadd.f32 %v334_v60, %v302_v59  ;;  %v343_v5 = vadd.f32 %v335_v62, %v303_v61 }
  0x1d   : > { %357 = vst [vmem:[%s559_s16 + $0x28] sm:$0xff] %v349_v63 }
  0x1e   : > { %v350_v0 = vmax.f32 %v342_v4, 0.0  ;;  %v351_v1 = vmax.f32 %v343_v5, 0.0 }
  0x20   : > { %358 = vst [vmem:[%s559_s16 + $0x30] sm:$0xff] %v350_v0 }
  0x21   : > { %359 = vst [vmem:[%s559_s16 + $0x38] sm:$0xff] %v351_v1 }
  0x22 PF: > { %s16_s21 = sadd.s32 1, %s461_s21  }
  0x23   : > { %p13_p4 = scmp.ge.s32.totalorder %s16_s21, 4  }
  0x25   :  { %15 = sbr.rel (!%p13_p4) target bundleno = 1 (0x1), region = 77 }

// kernel: resblock_forward.6
= control target key start
LH: loop header
LB: loop body
LE: loop exit
PB: predicated region body
PF: predicated region fallthrough
CT: control target
= control target key end

     0   :  { %s612_s12 = smov 0   ;;  %s675_s0 = inlined_call_operand.vmem [shape: bf16[2,8,8,128], index: 0, kind: input, shape index: {}]   ;;  %s676_s1 = inlined_call_operand.vmem [shape: bf16[1,128,128], index: 1, kind: input, shape index: {}]   ;;  %s677_s2 = inlined_call_operand.vmem [shape: f32[2,64,128], index: 2, kind: output, shape index: {0}]   ;;  %s678_s3 = inlined_call_operand.vmem [shape: f32[2,2,128], index: 3, kind: output, shape index: {1}]  }
   0x1 LB: > { %s478_s13 = sadd.s32 4294967295, %s590_s12   ;;  %p482_p0 = scmp.ge.s32.totalorder %s590_s12, 1  ;;  %s590_s12 = sphi %s612_s12, %s14_s12  }
   0x2   : > { %p140_p1 = scmp.lt.s32.totalorder %s590_s12, 3 }
   0x4   : > { %p141_p2 = pnand %p482_p0, %p140_p1 }
   0x5   : > { %p168_p3 = scmp.lt.s32.totalorder (!%p141_p2), %s478_s13, 1 }
   0x6   : > { %144 = sbr.rel (%p141_p2) target bundleno = 207 (0xcf), region = 28 }
   0xb   : > { %v551_v0 = vld [vmem:[%s676_s1 + $0x38] sm:$0xff]  ;;  %v550_v1 = vld [vmem:[%s676_s1 + $0x30] sm:$0xff]  ;;  %v549_v2 = vld [vmem:[%s676_s1 + $0x28] sm:$0xff]  ;;  %s680_s13 = smov (!%p168_p3, %s478_s13), 1  ;;  %vm389_vm0 = vcmask 1040384  }
   0xc   : > { %294 = vmatpush.bf16.msra.mxu0 %v551_v0  ;;  %552 = vmatpush.bf16.msra.mxu1 %v551_v0  ;;  %v548_v3 = vld [vmem:[%s676_s1 + $0x20] sm:$0xff]  ;;  %v547_v4 = vld [vmem:[%s676_s1 + $0x18] sm:$0xff]  ;;  %v546_v5 = vld [vmem:[%s676_s1 + $0x10] sm:$0xff]  ;;  %s538_s28 = sshll.u32 %s680_s13, 5  ;;  %s539_s7 = sshll.u32 %s680_s13, 6 }
   0xd   : > { %553 = vmatpush.bf16.msra.mxu2 %v551_v0  ;;  %554 = vmatpush.bf16.msra.mxu3 %v551_v0  ;;  %v545_v6 = vld [vmem:[%s676_s1 + $0x8] sm:$0xff]  ;;  %v544_v7 = vld [vmem:[%s676_s1] sm:$0xff]  ;;  %s172_s6 = scalar_lea.vmem %s675_s0, %s538_s28  ;;  %s658_s10 = scalar_lea.vmem %s677_s2, %s539_s7 }
   0xe   : > { %v540_v8 = vld [vmem:[%s172_s6] sm:$0xff]  ;;  %v541_v9 = vld [vmem:[%s172_s6 + $0x8] sm:$0xff]  ;;  %v542_v10 = vld [vmem:[%s172_s6 + $0x10] sm:$0xff]  ;;  %s487_s11 = sshll.u32 %s680_s13, 1 }
   0xf   : > { %v543_v11 = vld [vmem:[%s172_s6 + $0x18] sm:$0xff]  ;;  %s181_s16 = scalar_lea.vmem %s678_s3, %s487_s11 }
  0x10   : > { %295 = vmatpush.bf16.msra.mxu0 %v550_v1  ;;  %555 = vmatpush.bf16.msra.mxu1 %v550_v1 }
  0x11   : > { %556 = vmatpush.bf16.msra.mxu2 %v550_v1  ;;  %557 = vmatpush.bf16.msra.mxu3 %v550_v1 }
  0x14   : > { %296 = vmatpush.bf16.msra.mxu0 %v549_v2  ;;  %558 = vmatpush.bf16.msra.mxu1 %v549_v2 }
  0x15   : > { %559 = vmatpush.bf16.msra.mxu2 %v549_v2  ;;  %560 = vmatpush.bf16.msra.mxu3 %v549_v2 }
  0x18   : > { %297 = vmatpush.bf16.msra.mxu0 %v548_v3  ;;  %561 = vmatpush.bf16.msra.mxu1 %v548_v3 }
  0x19   : > { %562 = vmatpush.bf16.msra.mxu2 %v548_v3  ;;  %563 = vmatpush.bf16.msra.mxu3 %v548_v3 }
  0x1c   : > { %298 = vmatpush.bf16.msra.mxu0 %v547_v4  ;;  %564 = vmatpush.bf16.msra.mxu1 %v547_v4 }
  0x1d   : > { %565 = vmatpush.bf16.msra.mxu2 %v547_v4  ;;  %566 = vmatpush.bf16.msra.mxu3 %v547_v4 }
  0x20   : > { %299 = vmatpush.bf16.msra.mxu0 %v546_v5  ;;  %567 = vmatpush.bf16.msra.mxu1 %v546_v5 }
  0x21   : > { %568 = vmatpush.bf16.msra.mxu2 %v546_v5  ;;  %569 = vmatpush.bf16.msra.mxu3 %v546_v5 }
  0x24   : > { %300 = vmatpush.bf16.msra.mxu0 %v545_v6  ;;  %570 = vmatpush.bf16.msra.mxu1 %v545_v6 }
  0x25   : > { %571 = vmatpush.bf16.msra.mxu2 %v545_v6  ;;  %572 = vmatpush.bf16.msra.mxu3 %v545_v6 }
  0x28   : > { %301 = vmatpush.bf16.msra.mxu0 %v544_v7  ;;  %573 = vmatpush.bf16.msra.mxu1 %v544_v7 }
  0x29   : > { %574 = vmatpush.bf16.msra.mxu2 %v544_v7  ;;  %575 = vmatpush.bf16.msra.mxu3 %v544_v7 }
  0x2b   : > { %302 = vmatmul.bf16.vlgmr.msra.gmra.mxu0 %v540_v8  ;;  %307 = vmatmul.bf16.vlgmr.msra.gmra.mxu1 %v541_v9 }
  0x2c   : > { %312 = vmatmul.bf16.vlgmr.msra.gmra.mxu2 %v542_v10  ;;  %317 = vmatmul.bf16.vlgmr.msra.gmra.mxu3 %v543_v11 }
  0xa8   : > { %v303_v12 = vpop.f32.mrf.mxu0  ;;  %v308_v13 = vpop.f32.mrf.mxu1 }
  0xa9   : > { %347 = vst [vmem:[%s658_s10] sm:$0xff] %v303_v12  ;;  %v368_v18 = vmul.f32 %v303_v12, %v303_v12  ;;  %v370_v21 = vmul.f32 %v308_v13, %v308_v13 }
  0xaa   : > { %349 = vst [vmem:[%s658_s10 + $0x10] sm:$0xff] %v308_v13 }
  0xaf   : > { %v313_v14 = vpop.f32.mrf.mxu2  ;;  %v318_v15 = vpop.f32.mrf.mxu3 }
  0xb0   : > { %351 = vst [vmem:[%s658_s10 + $0x20] sm:$0xff] %v313_v14  ;;  %v305_v16 = vpop.f32.mrf.mxu0  ;;  %v310_v17 = vpop.f32.mrf.mxu1  ;;  %v372_v27 = vmul.f32 %v313_v14, %v313_v14  ;;  %v374_v35 = vmul.f32 %v318_v15, %v318_v15 }
  0xb1   : > { %353 = vst [vmem:[%s658_s10 + $0x30] sm:$0xff] %v318_v15  ;;  %v355_v19 = vadd.f32 %v305_v16, %v303_v12  ;;  %v369_v20 = vmul.f32 %v305_v16, %v305_v16  ;;  %v371_v25 = vmul.f32 %v310_v17, %v310_v17 }
  0xb2   : > { %348 = vst [vmem:[%s658_s10 + $0x8] sm:$0xff] %v305_v16 }
  0xb3   : > { %v376_v22 = vadd.f32 %v369_v20, %v368_v18  ;;  %350 = vst [vmem:[%s658_s10 + $0x18] sm:$0xff] %v310_v17  ;;  %v356_v23 = vadd.f32 %v355_v19, %v308_v13 }
  0xb5   : > { %v357_v24 = vadd.f32 %v356_v23, %v310_v17  ;;  %v377_v26 = vadd.f32 %v376_v22, %v370_v21 }
  0xb7   : > { %v378_v28 = vadd.f32 %v377_v26, %v371_v25  ;;  %v315_v29 = vpop.f32.mrf.mxu2  ;;  %v358_v30 = vadd.f32 %v357_v24, %v313_v14  ;;  %v320_v31 = vpop.f32.mrf.mxu3 }
  0xb8   : > { %352 = vst [vmem:[%s658_s10 + $0x28] sm:$0xff] %v315_v29  ;;  %v373_v33 = vmul.f32 %v315_v29, %v315_v29  ;;  %v375_v39 = vmul.f32 %v320_v31, %v320_v31 }
  0xb9   : > { %v359_v32 = vadd.f32 %v358_v30, %v315_v29  ;;  %v379_v34 = vadd.f32 %v378_v28, %v372_v27  ;;  %354 = vst [vmem:[%s658_s10 + $0x38] sm:$0xff] %v320_v31 }
  0xbb   : > { %v380_v36 = vadd.f32 %v379_v34, %v373_v33  ;;  %v360_v37 = vadd.f32 %v359_v32, %v318_v15 }
  0xbd   : > { %v361_v38 = vadd.f32 %v360_v37, %v320_v31  ;;  %v381_v40 = vadd.f32 %v380_v36, %v374_v35 }
  0xbf   : > { %v362_v41 = vrot.slane %v361_v38, 4  ;;  %v382_v42 = vadd.f32 %v381_v40, %v375_v39 }
  0xc1   : > { %v363_v43 = vadd.f32 %v362_v41, %v361_v38  ;;  %v383_v44 = vrot.slane %v382_v42, 4 }
  0xc3   : > { %v364_v45 = vrot.slane %v363_v43, 2  ;;  %v384_v46 = vadd.f32 %v383_v44, %v382_v42 }
  0xc5   : > { %v365_v47 = vadd.f32 %v364_v45, %v363_v43  ;;  %v385_v48 = vrot.slane %v384_v46, 2 }
  0xc7   : > { %v366_v49 = vrot.slane %v365_v47, 1  ;;  %v386_v50 = vadd.f32 %v385_v48, %v384_v46 }
  0xc9   : > { %v387_v51 = vrot.slane %v386_v50, 1  ;;  %v367_v52 = vadd.f32 %v366_v49, %v365_v47 }
  0xcb   : > { %v388_v53 = vadd.f32 %v387_v51, %v386_v50 }
  0xcd   : > { %v390_v54 = vsel %vm389_vm0, %v367_v52, %v388_v53 }
  0xce   : > { %391 = vst [vmem:[%s181_s16] sm:$0x3] %v390_v54 }
  0xcf PF: > { %s14_s12 = sadd.s32 1, %s590_s12  }
  0xd0   : > { %p11_p4 = scmp.ge.s32.totalorder %s14_s12, 4  }
  0xd2   :  { %13 = sbr.rel (!%p11_p4) target bundleno = 1 (0x1), region = 70 }

// kernel: resblock_forward.4
= control target key start
LH: loop header
LB: loop body
LE: loop exit
PB: predicated region body
PF: predicated region fallthrough
CT: control target
= control target key end

     0   :  { %s2804_s12 = smov 0   ;;  %s3244_s0 = inlined_call_operand.vmem [shape: bf16[8,9,9,128], index: 0, kind: input, shape index: {}]   ;;  %s3245_s1 = inlined_call_operand.vmem [shape: bf16[9,128,128], index: 1, kind: input, shape index: {}]   ;;  %s3246_s2 = inlined_call_operand.vmem [shape: bf16[2,64,128], index: 2, kind: output, shape index: {0}]   ;;  %s3247_s3 = inlined_call_operand.vmem [shape: f32[2,2,128], index: 3, kind: output, shape index: {1}]  }
   0x1 LB: > { %s2810_s13 = sadd.s32 4294967295, %s2782_s12   ;;  %p2039_p0 = scmp.ge.s32.totalorder %s2782_s12, 1  ;;  %s2782_s12 = sphi %s2804_s12, %s14_s12  }
   0x2   : > { %p142_p1 = scmp.lt.s32.totalorder %s2782_s12, 3 }
   0x4   : > { %p143_p2 = pnand %p2039_p0, %p142_p1 }
   0x5   : > { %s2040_s16 = sshll.u32 (!%p143_p2), %s2810_s13, 2  ;;  %p178_p4 = scmp.lt.s32.totalorder (!%p143_p2), %s2810_s13, 1 }
   0x6   : > { %146 = sbr.rel (%p143_p2) target bundleno = 347 (0x15b), region = 28  ;;  %p172_p3 = scmp.lt.s32.totalorder (!%p143_p2), %s2040_s16, 7 }
   0xb   : > { %v2643_v0 = vld [vmem:[%s3245_s1 + $0x38] sm:$0xff]  ;;  %v2642_v2 = vld [vmem:[%s3245_s1 + $0x30] sm:$0xff]  ;;  %s3251_s16 = smov (!%p172_p3, %s2040_s16), 7  ;;  %v2641_v6 = vld [vmem:[%s3245_s1 + $0x28] sm:$0xff]  ;;  %vm511_vm0 = vsmask.f32 3328 }
   0xc   : > { %v2663_v1 = vld [vmem:[%s3245_s1 + $0xb8] sm:$0xff]  ;;  %2751 = vmatpush.bf16.msra.mxu1 %v2643_v0  ;;  %299 = vmatpush.bf16.msra.mxu0 %v2643_v0  ;;  %v2662_v3 = vld [vmem:[%s3245_s1 + $0xb0] sm:$0xff]  ;;  %s2767_s27 = smul.u32 72, %s3251_s16  ;;  %v2661_v7 = vld [vmem:[%s3245_s1 + $0xa8] sm:$0xff]  ;;  %vm512_vm1 = vsmask.f32 7440 }
   0xd   : > { %715 = vmatpush.bf16.msra.mxu2 %v2663_v1  ;;  %v2675_v4 = vld [vmem:[%s3245_s1 + $0xf8] sm:$0xff]  ;;  %v2674_v5 = vld [vmem:[%s3245_s1 + $0xf0] sm:$0xff]  ;;  %v2673_v8 = vld [vmem:[%s3245_s1 + $0xe8] sm:$0xff]  ;;  %s3253_s13 = smov (!%p178_p4, %s2810_s13), 1  ;;  %vm1946_vm3 = vcmask 1040384  }
   0xe   : > { %866 = vmatpush.bf16.msra.mxu3 %v2675_v4  ;;  %s2842_s7 = scalar_lea.vmem %s3244_s0, %s2767_s27  ;;  %v2640_v10 = vld [vmem:[%s3245_s1 + $0x20] sm:$0xff]  ;;  %v2639_v23 = vld [vmem:[%s3245_s1 + $0x18] sm:$0xff]  ;;  %v2638_v31 = vld [vmem:[%s3245_s1 + $0x10] sm:$0xff]  ;;  %s2044_s21 = sshll.u32 %s3253_s13, 1 }
   0xf   : > { %v495_v9 = vld [vmem:[%s2842_s7] sm:$0xf]  ;;  %v497_v11 = vld [vmem:[%s2842_s7 + $0x8] sm:$0xf]  ;;  %v496_v16 = vld [vmem:[%s2842_s7 + $0x4] sm:$0x1]  ;;  %s186_s24 = scalar_lea.vmem %s3247_s3, %s2044_s21 }
  0x10   : > { %2752 = vmatpush.bf16.msra.mxu1 %v2642_v2  ;;  %300 = vmatpush.bf16.msra.mxu0 %v2642_v2  ;;  %v2660_v12 = vld [vmem:[%s3245_s1 + $0xa0] sm:$0xff]  ;;  %v515_v13 = vshrl.u32 %v495_v9, 16  ;;  %v518_v14 = vshll.u32 %v495_v9, 16  ;;  %v529_v15 = vshrl.u32 %v497_v11, 16  ;;  %v498_v17 = vld [vmem:[%s2842_s7 + $0xc] sm:$0x1]  ;;  %vm2877_vm2 = vmor %vm511_vm0, %vm512_vm1 }
  0x11   : > { %716 = vmatpush.bf16.msra.mxu2 %v2662_v3  ;;  %v532_v18 = vshll.u32 %v497_v11, 16  ;;  %v2672_v19 = vld [vmem:[%s3245_s1 + $0xe0] sm:$0xff]  ;;  %v2659_v25 = vld [vmem:[%s3245_s1 + $0x98] sm:$0xff]  ;;  %v524_v27 = vshll.u32 %v496_v16, 16  ;;  %v538_v28 = vshll.u32 %v498_v17, 16  ;;  %v2658_v34 = vld [vmem:[%s3245_s1 + $0x90] sm:$0xff] }
  0x12   : > { %867 = vmatpush.bf16.msra.mxu3 %v2674_v5  ;;  %v517_v20 = vrot.slane %v515_v13, 4  ;;  %v520_v21 = vrot.slane %v518_v14, 5  ;;  %v531_v22 = vrot.slane %v529_v15, 4  ;;  %v2671_v30 = vld [vmem:[%s3245_s1 + $0xd8] sm:$0xff]  ;;  %v499_v32 = vld [vmem:[%s2842_s7 + $0x10] sm:$0xf] }
  0x13   : > { %v534_v24 = vrot.slane %v532_v18, 5  ;;  %v501_v33 = vld [vmem:[%s2842_s7 + $0x18] sm:$0xf]  ;;  %v526_v36 = vrot.slane %v524_v27, 5  ;;  %v540_v38 = vrot.slane %v538_v28, 5  ;;  %v2670_v40 = vld [vmem:[%s3245_s1 + $0xd0] sm:$0xff] }
  0x14   : > { %2753 = vmatpush.bf16.msra.mxu1 %v2641_v6  ;;  %301 = vmatpush.bf16.msra.mxu0 %v2641_v6  ;;  %v521_v26 = vor.u32 %v520_v21, %v517_v20  ;;  %v543_v41 = vshrl.u32 %v499_v32, 16  ;;  %v546_v42 = vshll.u32 %v499_v32, 16  ;;  %v557_v43 = vshrl.u32 %v501_v33, 16  ;;  %v2637_v45 = vld [vmem:[%s3245_s1 + $0x8] sm:$0xff]  ;;  %v2636_v49 = vld [vmem:[%s3245_s1] sm:$0xff]  ;;  %v2655_v63 = vld [vmem:[%s3245_s1 + $0x78] sm:$0xff] }
  0x15   : > { %717 = vmatpush.bf16.msra.mxu2 %v2661_v7  ;;  %v535_v29 = vor.u32 %v534_v24, %v531_v22  ;;  %v560_v44 = vshll.u32 %v501_v33, 16  ;;  %v2657_v46 = vld [vmem:[%s3245_s1 + $0x88] sm:$0xff]  ;;  %v2055_v50 = vld [vmem:[%s2842_s7 + $0x20] sm:$0xf]  ;;  %v500_v53 = vld [vmem:[%s2842_s7 + $0x14] sm:$0x1] }
  0x16   : > { %868 = vmatpush.bf16.msra.mxu3 %v2673_v8  ;;  %v522_v35 = vrot.slane %v521_v26, 4  ;;  %v2634_v51 = vld [vmem:[%s2842_s7 + $0x24] sm:$0xf0]  ;;  %v545_v54 = vrot.slane %v543_v41, 4  ;;  %v548_v55 = vrot.slane %v546_v42, 5  ;;  %v559_v56 = vrot.slane %v557_v43, 4 }
  0x17   : > { %v536_v37 = vrot.slane %v535_v29, 4  ;;  %v2669_v52 = vld [vmem:[%s3245_s1 + $0xc8] sm:$0xff]  ;;  %v562_v57 = vrot.slane %v560_v44, 5  ;;  %v2047_v58 = vld [vmem:[%s2842_s7] sm:$0xf]  ;;  %v2056_v1 = vor.u32 %v2634_v51, %v2055_v50  ;;  %v2687_v2 = vld [vmem:[%s3245_s1 + $0x138] sm:$0xff] }
  0x18   : > { %2754 = vmatpush.bf16.msra.mxu1 %v2640_v10  ;;  %302 = vmatpush.bf16.msra.mxu0 %v2640_v10  ;;  %v527_v47 = vsel %vm2877_vm2, %v522_v35, %v526_v36  ;;  %v2632_v59 = vld [vmem:[%s2842_s7 + $0x4] sm:$0xf0]  ;;  %v502_v62 = vld [vmem:[%s2842_s7 + $0x1c] sm:$0x1]  ;;  %v2656_v0 = vld [vmem:[%s3245_s1 + $0x80] sm:$0xff]  ;;  %v552_v4 = vshll.u32 %v500_v53, 16  ;;  %v549_v6 = vor.u32 %v548_v55, %v545_v54 }
  0x19   : > { %718 = vmatpush.bf16.msra.mxu2 %v2660_v12  ;;  %v541_v48 = vsel %vm2877_vm2, %v536_v37, %v540_v38  ;;  %v651_v60 = vunpack.c.l.b16 %v527_v47  ;;  %v2707_v3 = vld [vmem:[%s3245_s1 + $0x1b8] sm:$0xff]  ;;  %v2048_v5 = vor.u32 %v2632_v59, %v2047_v58  ;;  %v563_v7 = vor.u32 %v562_v57, %v559_v56  ;;  %v2668_v10 = vld [vmem:[%s3245_s1 + $0xc0] sm:$0xff]  ;;  %v2239_v11 = vld [vmem:[%s2842_s7 + $0x90] sm:$0xf] }
  0x1a   : > { %869 = vmatpush.bf16.msra.mxu3 %v2672_v19  ;;  %v652_v61 = vunpack.c.l.b16 %v541_v48  ;;  %v566_v8 = vshll.u32 %v502_v62, 16  ;;  %v2664_v12 = vld [vmem:[%s2842_s7 + $0x94] sm:$0xf0]  ;;  %v2654_v13 = vld [vmem:[%s3245_s1 + $0x70] sm:$0xff]  ;;  %v554_v16 = vrot.slane %v552_v4, 5  ;;  %v550_v19 = vrot.slane %v549_v6, 4 }
  0x1b   : > { %v2719_v14 = vld [vmem:[%s3245_s1 + $0x1f8] sm:$0xff]  ;;  %v2686_v15 = vld [vmem:[%s3245_s1 + $0x130] sm:$0xff]  ;;  %v2240_v18 = vor.u32 %v2664_v12, %v2239_v11  ;;  %v564_v20 = vrot.slane %v563_v7, 4  ;;  %v2653_v22 = vld [vmem:[%s3245_s1 + $0x68] sm:$0xff] }
  0x1c   : > { %2755 = vmatpush.bf16.msra.mxu1 %v2639_v23  ;;  %303 = vmatpush.bf16.msra.mxu0 %v2639_v23  ;;  %v659_v9 = vpack.c.b16 %v652_v61, %v651_v60  ;;  %v2706_v17 = vld [vmem:[%s3245_s1 + $0x1b0] sm:$0xff]  ;;  %v568_v21 = vrot.slane %v566_v8, 5  ;;  %v503_v24 = vld [vmem:[%s2842_s7 + $0x20] sm:$0xf]  ;;  %v2685_v26 = vld [vmem:[%s3245_s1 + $0x128] sm:$0xff]  ;;  %v555_v28 = vsel %vm2877_vm2, %v550_v19, %v554_v16 }
  0x1d   : > { %719 = vmatpush.bf16.msra.mxu2 %v2659_v25  ;;  %v2718_v23 = vld [vmem:[%s3245_s1 + $0x1f0] sm:$0xff]  ;;  %v505_v25 = vld [vmem:[%s2842_s7 + $0x28] sm:$0xf]  ;;  %v2684_v36 = vld [vmem:[%s3245_s1 + $0x120] sm:$0xff]  ;;  %v653_v42 = vunpack.c.l.b16 %v555_v28 }
  0x1e   : > { %870 = vmatpush.bf16.msra.mxu3 %v2671_v30  ;;  %v2705_v27 = vld [vmem:[%s3245_s1 + $0x1a8] sm:$0xff]  ;;  %v569_v29 = vsel %vm2877_vm2, %v564_v20, %v568_v21  ;;  %v571_v30 = vshrl.u32 %v503_v24, 16  ;;  %v585_v32 = vshrl.u32 %v505_v25, 16  ;;  %v588_v33 = vshll.u32 %v505_v25, 16  ;;  %v2704_v37 = vld [vmem:[%s3245_s1 + $0x1a0] sm:$0xff]  ;;  %v2650_v62 = vld [vmem:[%s3245_s1 + $0x50] sm:$0xff] }
  0x1f   : > { %v2717_v35 = vld [vmem:[%s3245_s1 + $0x1e8] sm:$0xff]  ;;  %v2059_v38 = vld [vmem:[%s2842_s7 + $0x30] sm:$0xf]  ;;  %v654_v43 = vunpack.c.l.b16 %v569_v29  ;;  %v2633_v44 = vld [vmem:[%s2842_s7 + $0x14] sm:$0xf0] }
  0x20   : > { %2756 = vmatpush.bf16.msra.mxu1 %v2638_v31  ;;  %304 = vmatpush.bf16.msra.mxu0 %v2638_v31  ;;  %v574_v31 = vshll.u32 %v503_v24, 16  ;;  %v2051_v41 = vld [vmem:[%s2842_s7 + $0x10] sm:$0xf]  ;;  %v587_v47 = vrot.slane %v585_v32, 4  ;;  %v590_v48 = vrot.slane %v588_v33, 5  ;;  %v2649_v6 = vld [vmem:[%s3245_s1 + $0x48] sm:$0xff] }
  0x21   : > { %720 = vmatpush.bf16.msra.mxu2 %v2658_v34  ;;  %v2652_v34 = vld [vmem:[%s3245_s1 + $0x60] sm:$0xff]  ;;  %v506_v51 = vld [vmem:[%s2842_s7 + $0x2c] sm:$0x1]  ;;  %v2052_v54 = vor.u32 %v2633_v44, %v2051_v41  ;;  %v660_v55 = vpack.c.b16 %v654_v43, %v653_v42  ;;  %v2665_v57 = vld [vmem:[%s2842_s7 + $0xa4] sm:$0xf0] }
  0x22   : > { %871 = vmatpush.bf16.msra.mxu3 %v2670_v40  ;;  %v2635_v40 = vld [vmem:[%s2842_s7 + $0x34] sm:$0xf0]  ;;  %v504_v50 = vld [vmem:[%s2842_s7 + $0x24] sm:$0x1]  ;;  %v2243_v56 = vld [vmem:[%s2842_s7 + $0xa0] sm:$0xf]  ;;  %v591_v60 = vor.u32 %v590_v48, %v587_v47 }
  0x23   : > { %v2060_v53 = vor.u32 %v2635_v40, %v2059_v38  ;;  %v580_v59 = vshll.u32 %v504_v50, 16  ;;  %v594_v61 = vshll.u32 %v506_v51, 16  ;;  %v2681_v7 = vld [vmem:[%s3245_s1 + $0x108] sm:$0xff]  ;;  %v2716_v8 = vld [vmem:[%s3245_s1 + $0x1e0] sm:$0xff]  ;;  %v2702_v11 = vld [vmem:[%s3245_s1 + $0x190] sm:$0xff] }
  0x24   : > { %2757 = vmatpush.bf16.msra.mxu1 %v2637_v45  ;;  %305 = vmatpush.bf16.msra.mxu0 %v2637_v45  ;;  %v573_v45 = vrot.slane %v571_v30, 4  ;;  %v592_v4 = vrot.slane %v591_v60, 4  ;;  %v2695_v20 = vld [vmem:[%s3245_s1 + $0x178] sm:$0xff]  ;;  %v2680_v21 = vld [vmem:[%s3245_s1 + $0x100] sm:$0xff]  ;;  %v2644_v24 = vld [vmem:[%s2842_s7 + $0x4c] sm:$0xf0] }
  0x25   : > { %721 = vmatpush.bf16.msra.mxu2 %v2657_v46  ;;  %v576_v46 = vrot.slane %v574_v31, 5  ;;  %v2311_v25 = vld [vmem:[%s2842_s7 + $0xd8] sm:$0xf]  ;;  %v2694_v33 = vld [vmem:[%s3245_s1 + $0x170] sm:$0xff]  ;;  %v2693_v47 = vld [vmem:[%s3245_s1 + $0x168] sm:$0xff] }
  0x26   : > { %872 = vmatpush.bf16.msra.mxu3 %v2669_v52  ;;  %v2683_v52 = vld [vmem:[%s3245_s1 + $0x118] sm:$0xff]  ;;  %v2247_v40 = vld [vmem:[%s2842_s7 + $0xb0] sm:$0xf]  ;;  %v2701_v48 = vld [vmem:[%s3245_s1 + $0x188] sm:$0xff] }
  0x27   : > { %v577_v58 = vor.u32 %v576_v46, %v573_v45  ;;  %v2666_v41 = vld [vmem:[%s2842_s7 + $0xb4] sm:$0xf0]  ;;  %v2726_v42 = vld [vmem:[%s3245_s1 + $0x230] sm:$0xff]  ;;  %v2725_v50 = vld [vmem:[%s3245_s1 + $0x228] sm:$0xff] }
  0x28   : > { %2758 = vmatpush.bf16.msra.mxu1 %v2636_v49  ;;  %306 = vmatpush.bf16.msra.mxu0 %v2636_v49  ;;  %v2651_v49 = vld [vmem:[%s3245_s1 + $0x58] sm:$0xff] }
  0x29   : > { %722 = vmatpush.bf16.msra.mxu2 %v2656_v0  ;;  %v2244_v0 = vor.u32 %v2665_v57, %v2243_v56  ;;  %v2714_v56 = vld [vmem:[%s3245_s1 + $0x1d0] sm:$0xff]  ;;  %v2692_v57 = vld [vmem:[%s3245_s1 + $0x160] sm:$0xff] }
  0x2a   : > { %873 = vmatpush.bf16.msra.mxu3 %v2668_v10  ;;  %v509_v10 = vld [vmem:[%s2842_s7 + $0x38] sm:$0xf] }
  0x2b   : > { %317 = vmatmul.bf16.vlgmr.msra.gmra.mxu1 %v2056_v1  ;;  %307 = vmatmul.bf16.vlgmr.msra.gmra.mxu0 %v2048_v5  ;;  %v2703_v1 = vld [vmem:[%s3245_s1 + $0x198] sm:$0xff]  ;;  %v596_v5 = vrot.slane %v594_v61, 5  ;;  %v616_v19 = vshll.u32 %v509_v10, 16 }
  0x2c   : > { %450 = vmatpush.bf16.msrb.mxu1 %v2655_v63  ;;  %1017 = vmatpush.bf16.msrb.mxu0 %v2687_v2  ;;  %v2682_v63 = vld [vmem:[%s3245_s1 + $0x110] sm:$0xff]  ;;  %v578_v2 = vrot.slane %v577_v58, 4  ;;  %v2724_v58 = vld [vmem:[%s3245_s1 + $0x220] sm:$0xff] }
  0x2d   : > { %1430 = vmatpush.bf16.msrb.mxu2 %v2707_v3  ;;  %874 = vmatmul.bf16.vlgmr.msra.gmra.mxu3 %v2240_v18  ;;  %v582_v3 = vrot.slane %v580_v59, 5  ;;  %v613_v18 = vshrl.u32 %v509_v10, 16  ;;  %v618_v32 = vrot.slane %v616_v19, 5  ;;  %v2713_v59 = vld [vmem:[%s3245_s1 + $0x1c8] sm:$0xff]  ;;  %v2646_v19 = vld [vmem:[%s2842_s7 + $0x6c] sm:$0xf0] }
  0x2e   : > { %723 = vmatmul.bf16.vlgmr.msra.gmra.mxu2 %v659_v9  ;;  %1581 = vmatpush.bf16.msrb.mxu3 %v2719_v14  ;;  %v507_v9 = vld [vmem:[%s2842_s7 + $0x30] sm:$0xf]  ;;  %v2715_v14 = vld [vmem:[%s3245_s1 + $0x1d8] sm:$0xff]  ;;  %v2667_v10 = vld [vmem:[%s2842_s7 + $0xc4] sm:$0xf0] }
  0x2f   : > { %v583_v12 = vsel %vm2877_vm2, %v578_v2, %v582_v3  ;;  %v599_v16 = vshrl.u32 %v507_v9, 16  ;;  %v615_v31 = vrot.slane %v613_v18, 4  ;;  %v2677_v2 = vld [vmem:[%s2842_s7 + $0xec] sm:$0xf0]  ;;  %v2127_v18 = vld [vmem:[%s2842_s7 + $0x68] sm:$0xf] }
  0x30   : > { %451 = vmatpush.bf16.msrb.mxu1 %v2654_v13  ;;  %1018 = vmatpush.bf16.msrb.mxu0 %v2686_v15  ;;  %v597_v13 = vsel %vm2877_vm2, %v592_v4, %v596_v5  ;;  %v2648_v15 = vld [vmem:[%s3245_s1 + $0x40] sm:$0xff]  ;;  %v2690_v5 = vld [vmem:[%s3245_s1 + $0x150] sm:$0xff] }
  0x31   : > { %1431 = vmatpush.bf16.msrb.mxu2 %v2706_v17  ;;  %v602_v17 = vshll.u32 %v507_v9, 16  ;;  %v656_v28 = vunpack.c.l.b16 %v597_v13  ;;  %v601_v29 = vrot.slane %v599_v16, 4  ;;  %v619_v45 = vor.u32 %v618_v32, %v615_v31  ;;  %v2251_v9 = vld [vmem:[%s2842_s7 + $0xc0] sm:$0xf]  ;;  %v2723_v13 = vld [vmem:[%s3245_s1 + $0x218] sm:$0xff]  ;;  %v2722_v16 = vld [vmem:[%s3245_s1 + $0x210] sm:$0xff] }
  0x32   : > { %1582 = vmatpush.bf16.msrb.mxu3 %v2718_v23  ;;  %v2727_v23 = vld [vmem:[%s3245_s1 + $0x238] sm:$0xff]  ;;  %v2357_v31 = vld [vmem:[%s2842_s7 + $0x90] sm:$0xf] }
  0x33   : > { %v604_v30 = vrot.slane %v602_v17, 5  ;;  %v2721_v17 = vld [vmem:[%s3245_s1 + $0x208] sm:$0xff]  ;;  %v2359_v32 = vld [vmem:[%s2842_s7 + $0x98] sm:$0xf] }
  0x34   : > { %452 = vmatpush.bf16.msrb.mxu1 %v2653_v22  ;;  %1019 = vmatpush.bf16.msrb.mxu0 %v2685_v26  ;;  %v2119_v22 = vld [vmem:[%s2842_s7 + $0x48] sm:$0xf]  ;;  %v2676_v26 = vld [vmem:[%s2842_s7 + $0xdc] sm:$0xf0] }
  0x35   : > { %1432 = vmatpush.bf16.msrb.mxu2 %v2705_v27  ;;  %v655_v27 = vunpack.c.l.b16 %v583_v12  ;;  %v605_v43 = vor.u32 %v604_v30, %v601_v29  ;;  %v2689_v12 = vld [vmem:[%s3245_s1 + $0x148] sm:$0xff]  ;;  %v2720_v30 = vld [vmem:[%s3245_s1 + $0x200] sm:$0xff] }
  0x36   : > { %1583 = vmatpush.bf16.msrb.mxu3 %v2717_v35  ;;  %v510_v35 = vld [vmem:[%s2842_s7 + $0x3c] sm:$0x1] }
  0x37   : > { %v661_v38 = vpack.c.b16 %v656_v28, %v655_v27  ;;  %v622_v46 = vshll.u32 %v510_v35, 16  ;;  %v606_v51 = vrot.slane %v605_v43, 4  ;;  %v2519_v27 = vld [vmem:[%s2842_s7 + $0x50] sm:$0xf]  ;;  %v2708_v28 = vld [vmem:[%s2842_s7 + $0x54] sm:$0xf0] }
  0x38   : > { %453 = vmatpush.bf16.msrb.mxu1 %v2652_v34  ;;  %1020 = vmatpush.bf16.msrb.mxu0 %v2684_v36  ;;  %v508_v34 = vld [vmem:[%s2842_s7 + $0x34] sm:$0x1]  ;;  %v2120_v36 = vor.u32 %v2644_v24, %v2119_v22  ;;  %v2447_v22 = vld [vmem:[%s2842_s7 + $0x8] sm:$0xf]  ;;  %v2128_v24 = vor.u32 %v2646_v19, %v2127_v18  ;;  %v2520_v29 = vor.u32 %v2708_v28, %v2519_v27  ;;  %v1079_v35 = vshrl.u32 %v2357_v31, 16 }
  0x39   : > { %1433 = vmatpush.bf16.msrb.mxu2 %v2704_v37  ;;  %v2312_v37 = vor.u32 %v2676_v26, %v2311_v25  ;;  %v608_v44 = vshll.u32 %v508_v34, 16  ;;  %v2567_v34 = vld [vmem:[%s2842_s7 + $0x10] sm:$0xf]  ;;  %v2569_v18 = vld [vmem:[%s2842_s7 + $0x18] sm:$0xf] }
  0x3a   : > { %1584 = vmatpush.bf16.msrb.mxu3 %v2716_v8  ;;  %v1660_v43 = vshll.u32 %v2567_v34, 16  ;;  %v2571_v19 = vld [vmem:[%s2842_s7 + $0x20] sm:$0xf]  ;;  %v1671_v28 = vshrl.u32 %v2569_v18, 16 }
  0x3b   : > { %322 = vmatmul.bf16.gmra.mxu1 %v2060_v53  ;;  %312 = vmatmul.bf16.gmra.mxu0 %v2052_v54  ;;  %v620_v53 = vrot.slane %v619_v45, 4  ;;  %v624_v54 = vrot.slane %v622_v46, 5  ;;  %v2647_v45 = vld [vmem:[%s2842_s7 + $0x7c] sm:$0xf0]  ;;  %v2323_v46 = vld [vmem:[%s2842_s7 + $0x108] sm:$0xf] }
  0x3c   : > { %454 = vmatpush.bf16.msrb.mxu1 %v2651_v49  ;;  %1021 = vmatpush.bf16.msrb.mxu0 %v2683_v52  ;;  %v2248_v49 = vor.u32 %v2666_v41, %v2247_v40  ;;  %v610_v52 = vrot.slane %v608_v44, 5  ;;  %v2131_v44 = vld [vmem:[%s2842_s7 + $0x78] sm:$0xf] }
  0x3d   : > { %1434 = vmatpush.bf16.msrb.mxu2 %v2703_v1  ;;  %879 = vmatmul.bf16.gmra.mxu3 %v2244_v0  ;;  %v625_v61 = vsel %vm2877_vm2, %v620_v53, %v624_v54  ;;  %v2645_v0 = vld [vmem:[%s2842_s7 + $0x5c] sm:$0xf0]  ;;  %v2315_v1 = vld [vmem:[%s2842_s7 + $0xe8] sm:$0xf] }
  0x3e   : > { %728 = vmatmul.bf16.gmra.mxu2 %v660_v55  ;;  %1585 = vmatpush.bf16.msrb.mxu3 %v2715_v14  ;;  %v2700_v55 = vld [vmem:[%s3245_s1 + $0x180] sm:$0xff]  ;;  %v611_v60 = vsel %vm2877_vm2, %v606_v51, %v610_v52  ;;  %v658_v4 = vunpack.c.l.b16 %v625_v61  ;;  %v1081_v51 = vrot.slane %v1079_v35, 4  ;;  %v2568_v61 = vld [vmem:[%s2842_s7 + $0x14] sm:$0x1] }
  0x3f   : > { %v657_v3 = vunpack.c.l.b16 %v611_v60  ;;  %v2712_v14 = vld [vmem:[%s3245_s1 + $0x1c0] sm:$0xff]  ;;  %v2566_v60 = vld [vmem:[%s2842_s7 + $0xc] sm:$0x1] }
  0x40   : > { %455 = vmatpush.bf16.msrb.mxu1 %v2650_v62  ;;  %1022 = vmatpush.bf16.msrb.mxu0 %v2682_v63  ;;  %v2691_v62 = vld [vmem:[%s3245_s1 + $0x158] sm:$0xff] }
  0x41   : > { %1435 = vmatpush.bf16.msrb.mxu2 %v2702_v11  ;;  %v2123_v63 = vld [vmem:[%s2842_s7 + $0x58] sm:$0xf]  ;;  %v662_v8 = vpack.c.b16 %v658_v4, %v657_v3  ;;  %v2252_v11 = vor.u32 %v2667_v10, %v2251_v9  ;;  %v1666_v10 = vshll.u32 %v2568_v61, 16 }
  0x42   : > { %1586 = vmatpush.bf16.msrb.mxu3 %v2714_v56 }
  0x44   : > { %456 = vmatpush.bf16.msrb.mxu1 %v2649_v6  ;;  %1023 = vmatpush.bf16.msrb.mxu0 %v2681_v7  ;;  %v2124_v6 = vor.u32 %v2645_v0, %v2123_v63  ;;  %v2316_v7 = vor.u32 %v2677_v2, %v2315_v1 }
  0x45   : > { %1436 = vmatpush.bf16.msrb.mxu2 %v2701_v48  ;;  %v2451_v48 = vld [vmem:[%s2842_s7 + $0x18] sm:$0xf] }
  0x46   : > { %1587 = vmatpush.bf16.msrb.mxu3 %v2713_v59  ;;  %v1662_v59 = vrot.slane %v1660_v43, 5  ;;  %v1673_v43 = vrot.slane %v1671_v28, 4 }
  0x48   : > { %457 = vmatpush.bf16.msrb.mxu1 %v2648_v15  ;;  %1024 = vmatpush.bf16.msrb.mxu0 %v2680_v21  ;;  %v2688_v15 = vld [vmem:[%s3245_s1 + $0x140] sm:$0xff] }
  0x49   : > { %1437 = vmatpush.bf16.msrb.mxu2 %v2700_v55  ;;  %v2678_v21 = vld [vmem:[%s2842_s7 + $0xfc] sm:$0xf0] }
  0x4a   : > { %1588 = vmatpush.bf16.msrb.mxu3 %v2712_v14  ;;  %v2697_v55 = vld [vmem:[%s2842_s7 + $0x1c] sm:$0xf0]  ;;  %v2363_v14 = vld [vmem:[%s2842_s7 + $0xa8] sm:$0xf] }
  0x4b   : > { %458 = vmatmul.bf16.vlgmr.msrb.gmra.mxu1 %v2120_v36  ;;  %1025 = vmatmul.bf16.vlgmr.msrb.gmra.mxu0 %v2312_v37  ;;  %v1082_v36 = vshll.u32 %v2357_v31, 16  ;;  %v1093_v37 = vshrl.u32 %v2359_v32, 16  ;;  %v2452_v2 = vor.u32 %v2697_v55, %v2451_v48  ;;  %v1124_v27 = vshll.u32 %v2363_v14, 16 }
  0x4c   : > { %1279 = vmatpush.bf16.msra.mxu1 %v2695_v20  ;;  %1843 = vmatpush.bf16.msra.mxu0 %v2727_v23  ;;  %v2319_v20 = vld [vmem:[%s2842_s7 + $0xf8] sm:$0xf]  ;;  %v1688_v31 = vshll.u32 %v2571_v19, 16 }
  0x4d   : > { %884 = vmatmul.bf16.gmra.mxu3 %v2248_v49  ;;  %2759 = vmatpush.bf16.msra.mxu2 %v2727_v23  ;;  %v2696_v23 = vld [vmem:[%s2842_s7 + $0xc] sm:$0xf0]  ;;  %v2320_v25 = vor.u32 %v2678_v21, %v2319_v20  ;;  %v2358_v49 = vld [vmem:[%s2842_s7 + $0x94] sm:$0x1]  ;;  %v1084_v52 = vrot.slane %v1082_v36, 5  ;;  %v1095_v53 = vrot.slane %v1093_v37, 4 }
  0x4e   : > { %733 = vmatmul.bf16.gmra.mxu2 %v661_v38  ;;  %v2448_v26 = vor.u32 %v2696_v23, %v2447_v22  ;;  %v1096_v38 = vshll.u32 %v2359_v32, 16  ;;  %v1088_v63 = vshll.u32 %v2358_v49, 16  ;;  %v1668_v23 = vrot.slane %v1666_v10, 5  ;;  %v2362_v36 = vld [vmem:[%s2842_s7 + $0xa4] sm:$0x1] }
  0x4f   : > { %v1085_v3 = vor.u32 %v1084_v52, %v1081_v51  ;;  %v2570_v51 = vld [vmem:[%s2842_s7 + $0x1c] sm:$0x1]  ;;  %v2572_v52 = vld [vmem:[%s2842_s7 + $0x24] sm:$0x1] }
  0x50   : > { %1280 = vmatpush.bf16.msra.mxu1 %v2694_v33  ;;  %1844 = vmatpush.bf16.msra.mxu0 %v2726_v42  ;;  %v2565_v33 = vld [vmem:[%s2842_s7 + $0x8] sm:$0xf]  ;;  %v1098_v54 = vrot.slane %v1096_v38, 5 }
  0x51   : > { %2760 = vmatpush.bf16.msra.mxu2 %v2726_v42  ;;  %v1643_v40 = vshrl.u32 %v2565_v33, 16  ;;  %v1646_v41 = vshll.u32 %v2565_v33, 16  ;;  %v1657_v42 = vshrl.u32 %v2567_v34, 16 }
  0x52   : > { %v1099_v4 = vor.u32 %v1098_v54, %v1095_v53  ;;  %v2455_v53 = vld [vmem:[%s2842_s7 + $0x28] sm:$0xf]  ;;  %v2698_v54 = vld [vmem:[%s2842_s7 + $0x2c] sm:$0xf0] }
  0x53   : > { %v1645_v56 = vrot.slane %v1643_v40, 4 }
  0x54   : > { %1281 = vmatpush.bf16.msra.mxu1 %v2693_v47  ;;  %1845 = vmatpush.bf16.msra.mxu0 %v2725_v50  ;;  %v2679_v47 = vld [vmem:[%s2842_s7 + $0x10c] sm:$0xf0] }
  0x55   : > { %2761 = vmatpush.bf16.msra.mxu2 %v2725_v50  ;;  %v2360_v50 = vld [vmem:[%s2842_s7 + $0x9c] sm:$0x1]  ;;  %v2324_v1 = vor.u32 %v2679_v47, %v2323_v46  ;;  %v1690_v46 = vrot.slane %v1688_v31, 5 }
  0x56   : > { %v1102_v0 = vshll.u32 %v2360_v50, 16 }
  0x58   : > { %1282 = vmatpush.bf16.msra.mxu1 %v2692_v57  ;;  %1846 = vmatpush.bf16.msra.mxu0 %v2724_v58  ;;  %v1648_v57 = vrot.slane %v1646_v41, 5  ;;  %v1126_v41 = vrot.slane %v1124_v27, 5 }
  0x59   : > { %2762 = vmatpush.bf16.msra.mxu2 %v2724_v58  ;;  %v1659_v58 = vrot.slane %v1657_v42, 4  ;;  %v2364_v42 = vld [vmem:[%s2842_s7 + $0xac] sm:$0x1] }
  0x5b   : > { %463 = vmatmul.bf16.gmra.mxu1 %v2124_v6  ;;  %1030 = vmatmul.bf16.gmra.mxu0 %v2316_v7  ;;  %v2709_v6 = vld [vmem:[%s2842_s7 + $0x64] sm:$0xf0]  ;;  %v1649_v7 = vor.u32 %v1648_v57, %v1645_v56  ;;  %v1663_v9 = vor.u32 %v1662_v59, %v1659_v58  ;;  %v1116_v56 = vshll.u32 %v2362_v36, 16  ;;  %v1130_v58 = vshll.u32 %v2364_v42, 16  ;;  %v2366_v42 = vld [vmem:[%s2842_s7 + $0xb4] sm:$0x1] }
  0x5c   : > { %1283 = vmatpush.bf16.msra.mxu1 %v2691_v62  ;;  %1847 = vmatpush.bf16.msra.mxu0 %v2723_v13  ;;  %v2132_v62 = vor.u32 %v2647_v45, %v2131_v44 }
  0x5d   : > { %889 = vmatmul.bf16.gmra.mxu3 %v2252_v11  ;;  %2763 = vmatpush.bf16.msra.mxu2 %v2723_v13  ;;  %v1090_v11 = vrot.slane %v1088_v63, 5  ;;  %v2361_v13 = vld [vmem:[%s2842_s7 + $0xa0] sm:$0xf]  ;;  %v1650_v20 = vrot.slane %v1649_v7, 4  ;;  %v1664_v22 = vrot.slane %v1663_v9, 4  ;;  %v1132_v7 = vrot.slane %v1130_v58, 5 }
  0x5e   : > { %738 = vmatmul.bf16.gmra.mxu2 %v662_v8  ;;  %v1652_v8 = vshll.u32 %v2566_v60, 16  ;;  %v1680_v60 = vshll.u32 %v2570_v51, 16  ;;  %v2459_v51 = vld [vmem:[%s2842_s7 + $0x38] sm:$0xf]  ;;  %v2578_v58 = vld [vmem:[%s2842_s7 + $0x3c] sm:$0x1] }
  0x5f   : > { %v1669_v35 = vsel %vm2877_vm2, %v1664_v22, %v1668_v23 }
  0x60   : > { %1284 = vmatpush.bf16.msra.mxu1 %v2690_v5  ;;  %1848 = vmatpush.bf16.msra.mxu0 %v2722_v16  ;;  %v2523_v5 = vld [vmem:[%s2842_s7 + $0x60] sm:$0xf]  ;;  %v1654_v21 = vrot.slane %v1652_v8, 5  ;;  %v1780_v50 = vunpack.c.l.b16 %v1669_v35  ;;  %v1682_v9 = vrot.slane %v1680_v60, 5 }
  0x61   : > { %2764 = vmatpush.bf16.msra.mxu2 %v2722_v16  ;;  %v1100_v16 = vrot.slane %v1099_v4, 4 }
  0x62   : > { %v1655_v34 = vsel %vm2877_vm2, %v1650_v20, %v1654_v21  ;;  %v2577_v21 = vld [vmem:[%s2842_s7 + $0x38] sm:$0xf] }
  0x63   : > { %v1779_v49 = vunpack.c.l.b16 %v1655_v34  ;;  %v1730_v34 = vshll.u32 %v2577_v21, 16 }
  0x64   : > { %1285 = vmatpush.bf16.msra.mxu1 %v2689_v12  ;;  %1849 = vmatpush.bf16.msra.mxu0 %v2721_v17  ;;  %v1104_v12 = vrot.slane %v1102_v0, 5 }
  0x65   : > { %2765 = vmatpush.bf16.msra.mxu2 %v2721_v17  ;;  %v2524_v17 = vor.u32 %v2709_v6, %v2523_v5  ;;  %v1787_v0 = vpack.c.b16 %v1780_v50, %v1779_v49  ;;  %v1118_v5 = vrot.slane %v1116_v56, 5  ;;  %v2699_v56 = vld [vmem:[%s2842_s7 + $0x3c] sm:$0xf0] }
  0x66   : > { %v1105_v33 = vsel %vm2877_vm2, %v1100_v16, %v1104_v12  ;;  %v2365_v12 = vld [vmem:[%s2842_s7 + $0xb0] sm:$0xf] }
  0x67   : > { %v1216_v48 = vunpack.c.l.b16 %v1105_v33  ;;  %v2575_v16 = vld [vmem:[%s2842_s7 + $0x30] sm:$0xf]  ;;  %v1138_v20 = vshll.u32 %v2365_v12, 16  ;;  %v1727_v33 = vshrl.u32 %v2577_v21, 16 }
  0x68   : > { %1286 = vmatpush.bf16.msra.mxu1 %v2688_v15  ;;  %1850 = vmatpush.bf16.msra.mxu0 %v2720_v30  ;;  %v1086_v15 = vrot.slane %v1085_v3, 4  ;;  %v2710_v3 = vld [vmem:[%s2842_s7 + $0x74] sm:$0xf0] }
  0x69   : > { %2766 = vmatpush.bf16.msra.mxu2 %v2720_v30  ;;  %v1685_v30 = vshrl.u32 %v2571_v19, 16  ;;  %v1135_v19 = vshrl.u32 %v2365_v12, 16  ;;  %v1140_v36 = vrot.slane %v1138_v20, 5 }
  0x6a   : > { %v1091_v32 = vsel %vm2877_vm2, %v1086_v15, %v1090_v11  ;;  %v2573_v15 = vld [vmem:[%s2842_s7 + $0x28] sm:$0xf] }
  0x6b   : > { %468 = vmatmul.bf16.gmra.mxu1 %v2128_v24  ;;  %1035 = vmatmul.bf16.gmra.mxu0 %v2320_v25  ;;  %v1107_v24 = vshrl.u32 %v2361_v13, 16  ;;  %v1110_v25 = vshll.u32 %v2361_v13, 16  ;;  %v1687_v45 = vrot.slane %v1685_v30, 4  ;;  %v1215_v47 = vunpack.c.l.b16 %v1091_v32 }
  0x6c   : > { %v1699_v27 = vshrl.u32 %v2573_v15, 16  ;;  %v1702_v28 = vshll.u32 %v2573_v15, 16  ;;  %v1716_v30 = vshll.u32 %v2575_v16, 16  ;;  %v1137_v35 = vrot.slane %v1135_v19, 4 }
  0x6d   : > { %1589 = vmatmul.bf16.vlgmr.msrb.gmra.mxu3 %v2520_v29  ;;  %v1674_v29 = vshll.u32 %v2569_v18, 16  ;;  %v1109_v37 = vrot.slane %v1107_v24, 4  ;;  %v1112_v38 = vrot.slane %v1110_v25, 5  ;;  %v1691_v61 = vor.u32 %v1690_v46, %v1687_v45  ;;  %v2574_v46 = vld [vmem:[%s2842_s7 + $0x2c] sm:$0x1] }
  0x6e   : > { %1438 = vmatmul.bf16.vlgmr.msrb.gmra.mxu2 %v2448_v26  ;;  %v1121_v26 = vshrl.u32 %v2363_v14, 16  ;;  %v1223_v63 = vpack.c.b16 %v1216_v48, %v1215_v47  ;;  %v2367_v14 = vld [vmem:[%s2842_s7 + $0xb8] sm:$0xf]  ;;  %v1701_v47 = vrot.slane %v1699_v27, 4  ;;  %v1704_v48 = vrot.slane %v1702_v28, 5 }
  0x6f   : > { %v1676_v44 = vrot.slane %v1674_v29, 5  ;;  %v1113_v55 = vor.u32 %v1112_v38, %v1109_v37  ;;  %v1692_v10 = vrot.slane %v1691_v61, 4  ;;  %v1149_v24 = vshrl.u32 %v2367_v14, 16  ;;  %v2371_v27 = vld [vmem:[%s2842_s7 + $0xc8] sm:$0xf] }
  0x70   : > { %v1123_v40 = vrot.slane %v1121_v26, 4  ;;  %v1152_v25 = vshll.u32 %v2367_v14, 16  ;;  %v2579_v26 = vld [vmem:[%s2842_s7 + $0x40] sm:$0xf]  ;;  %v1713_v29 = vshrl.u32 %v2575_v16, 16  ;;  %v1718_v50 = vrot.slane %v1716_v30, 5 }
  0x71   : > { %v1677_v59 = vor.u32 %v1676_v44, %v1673_v43  ;;  %v1114_v4 = vrot.slane %v1113_v55, 4  ;;  %v1741_v37 = vshrl.u32 %v2579_v26, 16  ;;  %v1744_v38 = vshll.u32 %v2579_v26, 16  ;;  %v2368_v43 = vld [vmem:[%s2842_s7 + $0xbc] sm:$0x1] }
  0x72   : > { %v1127_v57 = vor.u32 %v1126_v41, %v1123_v40  ;;  %v1151_v44 = vrot.slane %v1149_v24, 4  ;;  %v1154_v45 = vrot.slane %v1152_v25, 5  ;;  %v1715_v49 = vrot.slane %v1713_v29, 4  ;;  %v2369_v24 = vld [vmem:[%s2842_s7 + $0xc0] sm:$0xf] }
  0x73   : > { %v1678_v8 = vrot.slane %v1677_v59, 4  ;;  %v1743_v59 = vrot.slane %v1741_v37, 4  ;;  %v1746_v60 = vrot.slane %v1744_v38, 5  ;;  %v1144_v61 = vshll.u32 %v2366_v42, 16 }
  0x74   : > { %v1128_v6 = vrot.slane %v1127_v57, 4  ;;  %v1141_v57 = vor.u32 %v1140_v36, %v1137_v35  ;;  %v1177_v35 = vshrl.u32 %v2371_v27, 16  ;;  %v1180_v36 = vshll.u32 %v2371_v27, 16 }
  0x75   : > { %v1683_v22 = vsel %vm2877_vm2, %v1678_v8, %v1682_v9  ;;  %v2711_v8 = vld [vmem:[%s2842_s7 + $0x84] sm:$0xf0]  ;;  %v1747_v12 = vor.u32 %v1746_v60, %v1743_v59  ;;  %v1146_v14 = vrot.slane %v1144_v61, 5 }
  0x76   : > { %v1133_v18 = vsel %vm2877_vm2, %v1128_v6, %v1132_v7  ;;  %v1781_v40 = vunpack.c.l.b16 %v1683_v22  ;;  %v2460_v6 = vor.u32 %v2699_v56, %v2459_v51  ;;  %v2531_v7 = vld [vmem:[%s2842_s7 + $0x80] sm:$0xf] }
  0x77   : > { %v1218_v32 = vunpack.c.l.b16 %v1133_v18  ;;  %v2532_v18 = vor.u32 %v2711_v8, %v2531_v7  ;;  %v1748_v25 = vrot.slane %v1747_v12, 4 }
  0x7b   : > { %473 = vmatmul.bf16.gmra.mxu1 %v2132_v62  ;;  %1040 = vmatmul.bf16.gmra.mxu0 %v2324_v1  ;;  %v1694_v62 = vshll.u32 %v2572_v52, 16  ;;  %v2456_v1 = vor.u32 %v2698_v54, %v2455_v53  ;;  %v2576_v52 = vld [vmem:[%s2842_s7 + $0x34] sm:$0x1]  ;;  %v1729_v53 = vrot.slane %v1727_v33, 4  ;;  %v1732_v54 = vrot.slane %v1730_v34, 5 }
  0x7c   : > { %v1166_v34 = vshll.u32 %v2369_v24, 16 }
  0x7d   : > { %1594 = vmatmul.bf16.gmra.mxu3 %v2524_v17  ;;  %v1696_v11 = vrot.slane %v1694_v62, 5  ;;  %v1119_v17 = vsel %vm2877_vm2, %v1114_v4, %v1118_v5  ;;  %v1155_v62 = vor.u32 %v1154_v45, %v1151_v44  ;;  %v1719_v4 = vor.u32 %v1718_v50, %v1715_v49  ;;  %v2372_v50 = vld [vmem:[%s2842_s7 + $0xcc] sm:$0x1] }
  0x7e   : > { %1443 = vmatmul.bf16.gmra.mxu2 %v2452_v2  ;;  %v2527_v2 = vld [vmem:[%s2842_s7 + $0x70] sm:$0xf]  ;;  %v1217_v31 = vunpack.c.l.b16 %v1119_v17  ;;  %v1722_v5 = vshll.u32 %v2576_v52, 16  ;;  %v1733_v9 = vor.u32 %v1732_v54, %v1729_v53  ;;  %v1182_v49 = vrot.slane %v1180_v36, 5 }
  0x7f   : > { %v2528_v13 = vor.u32 %v2710_v3, %v2527_v2  ;;  %v1697_v23 = vsel %vm2877_vm2, %v1692_v10, %v1696_v11  ;;  %v1705_v3 = vor.u32 %v1704_v48, %v1701_v47  ;;  %v1736_v10 = vshll.u32 %v2578_v58, 16 }
  0x80   : > { %v1782_v41 = vunpack.c.l.b16 %v1697_v23  ;;  %v1224_v55 = vpack.c.b16 %v1218_v32, %v1217_v31  ;;  %v1142_v11 = vrot.slane %v1141_v57, 4  ;;  %v1156_v15 = vrot.slane %v1155_v62, 4 }
  0x81   : > { %v1706_v19 = vrot.slane %v1705_v3, 4  ;;  %v1720_v20 = vrot.slane %v1719_v4, 4  ;;  %v1724_v21 = vrot.slane %v1722_v5, 5  ;;  %v1734_v22 = vrot.slane %v1733_v9, 4 }
  0x82   : > { %v1788_v2 = vpack.c.b16 %v1782_v41, %v1781_v40  ;;  %v1738_v23 = vrot.slane %v1736_v10, 5  ;;  %v1147_v28 = vsel %vm2877_vm2, %v1142_v11, %v1146_v14  ;;  %v1163_v32 = vshrl.u32 %v2369_v24, 16 }
  0x83   : > { %v1725_v31 = vsel %vm2877_vm2, %v1720_v20, %v1724_v21  ;;  %v1219_v38 = vunpack.c.l.b16 %v1147_v28  ;;  %v1168_v47 = vrot.slane %v1166_v34, 5  ;;  %v1179_v48 = vrot.slane %v1177_v35, 4 }
  0x84   : > { %v1739_v33 = vsel %vm2877_vm2, %v1734_v22, %v1738_v23  ;;  %v1784_v42 = vunpack.c.l.b16 %v1725_v31  ;;  %v1165_v44 = vrot.slane %v1163_v32, 4  ;;  %v1186_v59 = vshll.u32 %v2372_v50, 16 }
  0x85   : > { %v1183_v58 = vor.u32 %v1182_v49, %v1179_v48 }
  0x86   : > { %v1169_v57 = vor.u32 %v1168_v47, %v1165_v44 }
  0x87   : > { %v1184_v62 = vrot.slane %v1183_v58, 4 }
  0x88   : > { %v1170_v60 = vrot.slane %v1169_v57, 4 }
  0x8b   : > { %1287 = vmatmul.bf16.vlgmr.msra.gmra.mxu1 %v1223_v63  ;;  %1851 = vmatmul.bf16.vlgmr.msra.gmra.mxu0 %v1787_v0  ;;  %v1158_v63 = vshll.u32 %v2368_v43, 16  ;;  %v1708_v0 = vshll.u32 %v2574_v46, 16  ;;  %v1785_v43 = vunpack.c.l.b16 %v1739_v33  ;;  %v2370_v46 = vld [vmem:[%s2842_s7 + $0xc4] sm:$0x1] }
  0x8c   : > { %v1172_v53 = vshll.u32 %v2370_v46, 16 }
  0x8d   : > { %1599 = vmatmul.bf16.gmra.mxu3 %v2528_v13  ;;  %v1160_v16 = vrot.slane %v1158_v63, 5  ;;  %v1710_v17 = vrot.slane %v1708_v0, 5  ;;  %v1188_v63 = vrot.slane %v1186_v59, 5 }
  0x8e   : > { %1448 = vmatmul.bf16.gmra.mxu2 %v2456_v1  ;;  %v2580_v1 = vld [vmem:[%s2842_s7 + $0x44] sm:$0x1]  ;;  %v1174_v61 = vrot.slane %v1172_v53, 5  ;;  %s2631_s7 = sshll.u32 %s3253_s13, 5 }
  0x8f   : > { %v1750_v13 = vshll.u32 %v2580_v1, 16  ;;  %v1161_v29 = vsel %vm2877_vm2, %v1156_v15, %v1160_v16  ;;  %v1711_v30 = vsel %vm2877_vm2, %v1706_v19, %v1710_v17  ;;  %v1189_v4 = vsel %vm2877_vm2, %v1184_v62, %v1188_v63  ;;  %s3219_s20 = scalar_lea.vmem %s3246_s2, %s2631_s7 }
  0x90   : > { %v1220_v40 = vunpack.c.l.b16 %v1161_v29  ;;  %v1783_v41 = vunpack.c.l.b16 %v1711_v30  ;;  %v1175_v3 = vsel %vm2877_vm2, %v1170_v60, %v1174_v61  ;;  %v1222_v7 = vunpack.c.l.b16 %v1189_v4 }
  0x91   : > { %v1752_v26 = vrot.slane %v1750_v13, 5 }
  0x92   : > { %v1225_v51 = vpack.c.b16 %v1220_v40, %v1219_v38  ;;  %v1789_v52 = vpack.c.b16 %v1784_v42, %v1783_v41 }
  0x93   : > { %v1753_v37 = vsel %vm2877_vm2, %v1748_v25, %v1752_v26 }
  0x94   : > { %v1786_v45 = vunpack.c.l.b16 %v1753_v37 }
  0x96   : > { %v1790_v56 = vpack.c.b16 %v1786_v45, %v1785_v43 }
  0x9b   : > { %1292 = vmatmul.bf16.gmra.mxu1 %v1224_v55  ;;  %1856 = vmatmul.bf16.gmra.mxu0 %v1788_v2 }
  0x9d   : > { %1604 = vmatmul.bf16.gmra.mxu3 %v2532_v18 }
  0x9e   : > { %1453 = vmatmul.bf16.gmra.mxu2 %v2460_v6  ;;  %v1221_v6 = vunpack.c.l.b16 %v1175_v3 }
  0xa0   : > { %v1226_v8 = vpack.c.b16 %v1222_v7, %v1221_v6 }
  0xa8   : > { %v318_v54 = vpop.f32.mrf.mxu1  ;;  %v308_v55 = vpop.f32.mrf.mxu0 }
  0xab   : > { %1297 = vmatmul.bf16.gmra.mxu1 %v1225_v51  ;;  %1861 = vmatmul.bf16.gmra.mxu0 %v1789_v52 }
  0xae   : > { %1866 = vmatmul.bf16.vlgmr.msra.gmra.mxu2 %v1790_v56 }
  0xb0   : > { %v320_v1 = vpop.f32.mrf.mxu1  ;;  %v310_v2 = vpop.f32.mrf.mxu0 }
  0xb1   : > { %v724_v0 = vpop.f32.mrf.mxu2  ;;  %v875_v5 = vpop.f32.mrf.mxu3 }
  0xb8   : > { %v323_v10 = vpop.f32.mrf.mxu1  ;;  %v313_v11 = vpop.f32.mrf.mxu0 }
  0xb9   : > { %v726_v9 = vpop.f32.mrf.mxu2  ;;  %v3184_v12 = vpop.f32.mrf.mxu3 }
  0xbb   : > { %1302 = vmatmul.bf16.gmra.mxu1 %v1226_v8 }
  0xc0   : > { %v325_v14 = vpop.f32.mrf.mxu1  ;;  %v315_v15 = vpop.f32.mrf.mxu0 }
  0xc1   : > { %v729_v13 = vpop.f32.mrf.mxu2  ;;  %v880_v16 = vpop.f32.mrf.mxu3 }
  0xc8   : > { %v459_v18 = vpop.f32.mrf.mxu1  ;;  %v1026_v19 = vpop.f32.mrf.mxu0 }
  0xc9   : > { %v731_v17 = vpop.f32.mrf.mxu2  ;;  %v479_v20 = vadd.f32 %v459_v18, %v308_v55  ;;  %v3186_v21 = vpop.f32.mrf.mxu3 }
  0xcb   : > { %v744_v39 = vadd.f32 %v724_v0, %v479_v20 }
  0xcd   : > { %v895_v22 = vadd.f32 %v875_v5, %v744_v39 }
  0xcf   : > { %v1046_v23 = vadd.f32 %v1026_v19, %v895_v22 }
  0xd0   : > { %v461_v25 = vpop.f32.mrf.mxu1  ;;  %v1028_v26 = vpop.f32.mrf.mxu0 }
  0xd1   : > { %v734_v24 = vpop.f32.mrf.mxu2  ;;  %v480_v27 = vadd.f32 %v461_v25, %v310_v2  ;;  %v885_v29 = vpop.f32.mrf.mxu3 }
  0xd3   : > { %v745_v28 = vadd.f32 %v726_v9, %v480_v27 }
  0xd8   : > { %v464_v31 = vpop.f32.mrf.mxu1  ;;  %v1031_v32 = vpop.f32.mrf.mxu0 }
  0xd9   : > { %v736_v30 = vpop.f32.mrf.mxu2  ;;  %v481_v33 = vadd.f32 %v464_v31, %v313_v11  ;;  %v3188_v38 = vpop.f32.mrf.mxu3  ;;  %v896_v11 = vadd.f32 %v3184_v12, %v745_v28 }
  0xdb   : > { %v746_v34 = vadd.f32 %v729_v13, %v481_v33 }
  0xdd   : > { %v897_v35 = vadd.f32 %v880_v16, %v746_v34 }
  0xdf   : > { %v1048_v36 = vadd.f32 %v1031_v32, %v897_v35 }
  0xe0   : > { %v466_v40 = vpop.f32.mrf.mxu1  ;;  %v3190_v41 = vpop.f32.mrf.mxu0 }
  0xe1   : > { %v739_v37 = vpop.f32.mrf.mxu2  ;;  %v482_v42 = vadd.f32 %v466_v40, %v315_v15  ;;  %v3192_v48 = vpop.f32.mrf.mxu3 }
  0xe3   : > { %v747_v43 = vadd.f32 %v731_v17, %v482_v42 }
  0xe8   : > { %v469_v45 = vpop.f32.mrf.mxu1  ;;  %v1036_v46 = vpop.f32.mrf.mxu0 }
  0xe9   : > { %v741_v44 = vpop.f32.mrf.mxu2  ;;  %v483_v47 = vadd.f32 %v469_v45, %v318_v54  ;;  %v3200_v58 = vpop.f32.mrf.mxu3 }
  0xeb   : > { %v748_v49 = vadd.f32 %v734_v24, %v483_v47 }
  0xed   : > { %v899_v50 = vadd.f32 %v885_v29, %v748_v49 }
  0xef   : > { %v3194_v51 = vadd.f32 %v1036_v46, %v899_v50 }
  0xf0   : > { %v471_v53 = vpop.f32.mrf.mxu1  ;;  %v3196_v55 = vpop.f32.mrf.mxu0 }
  0xf1   : > { %v1439_v52 = vpop.f32.mrf.mxu2  ;;  %v484_v56 = vadd.f32 %v471_v53, %v320_v1  ;;  %v1590_v63 = vpop.f32.mrf.mxu3 }
  0xf3   : > { %v3198_v57 = vadd.f32 %v736_v30, %v484_v56  ;;  %v898_v30 = vadd.f32 %v3186_v21, %v747_v43 }
  0xf8   : > { %v474_v60 = vpop.f32.mrf.mxu1  ;;  %v3202_v61 = vpop.f32.mrf.mxu0 }
  0xf9   : > { %v1441_v59 = vpop.f32.mrf.mxu2  ;;  %v485_v54 = vadd.f32 %v474_v60, %v323_v10  ;;  %v1592_v5 = vpop.f32.mrf.mxu3  ;;  %v1047_v10 = vadd.f32 %v1028_v26, %v896_v11 }
  0xfb   : > { %v3204_v62 = vadd.f32 %v739_v37, %v485_v54  ;;  %v1049_v37 = vadd.f32 %v3190_v41, %v898_v30 }
 0x100   : > { %v476_v2 = vpop.f32.mrf.mxu1  ;;  %v3206_v3 = vpop.f32.mrf.mxu0 }
 0x101   : > { %v1444_v0 = vpop.f32.mrf.mxu2  ;;  %v486_v4 = vadd.f32 %v476_v2, %v325_v14  ;;  %v1595_v14 = vpop.f32.mrf.mxu3 }
 0x103   : > { %v3208_v1 = vadd.f32 %v741_v44, %v486_v4 }
 0x108   : > { %v1288_v6 = vpop.f32.mrf.mxu1  ;;  %v1852_v7 = vpop.f32.mrf.mxu0 }
 0x109   : > { %v1308_v8 = vadd.f32 %v1288_v6, %v1046_v23  ;;  %v1446_v9 = vpop.f32.mrf.mxu2  ;;  %v1597_v33 = vpop.f32.mrf.mxu3 }
 0x10b   : > { %v1459_v13 = vadd.f32 %v1439_v52, %v1308_v8 }
 0x10d   : > { %v1610_v15 = vadd.f32 %v1590_v63, %v1459_v13  ;;  %v900_v63 = vadd.f32 %v3188_v38, %v3198_v57 }
 0x10f   : > { %v1872_v20 = vadd.f32 %v1852_v7, %v1610_v15 }
 0x110   : > { %v1290_v16 = vpop.f32.mrf.mxu1  ;;  %v1854_v17 = vpop.f32.mrf.mxu0 }
 0x111   : > { %v1309_v18 = vadd.f32 %v1290_v16, %v1047_v10  ;;  %v1449_v39 = vpop.f32.mrf.mxu2  ;;  %v1925_v24 = vmul.f32 %v1872_v20, %v1872_v20  ;;  %v1600_v52 = vpop.f32.mrf.mxu3 }
 0x113   : > { %v1460_v19 = vadd.f32 %v1441_v59, %v1309_v18 }
 0x115   : > { %v1611_v22 = vadd.f32 %v1592_v5, %v1460_v19  ;;  %v1051_v5 = vadd.f32 %v3196_v55, %v900_v63 }
 0x117   : > { %v1873_v23 = vadd.f32 %v1854_v17, %v1611_v22 }
 0x118   : > { %v1293_v12 = vpop.f32.mrf.mxu1  ;;  %v1857_v25 = vpop.f32.mrf.mxu0 }
 0x119   : > { %v2731_v26 = vpack.c.bf16 %v1873_v23, %v1872_v20  ;;  %v1912_v27 = vadd.f32 %v1873_v23, %v1872_v20  ;;  %v1926_v28 = vmul.f32 %v1873_v23, %v1873_v23  ;;  %v1310_v29 = vadd.f32 %v1293_v12, %v1048_v36  ;;  %v1451_v35 = vpop.f32.mrf.mxu2  ;;  %v1602_v7 = vpop.f32.mrf.mxu3 }
 0x11a   : > { %v902_v23 = vadd.f32 %v3200_v58, %v3208_v1 }
 0x11b   : > { %2732 = vst [vmem:[%s3219_s20] sm:$0xff] %v2731_v26   ;;  %v1933_v31 = vadd.f32 %v1926_v28, %v1925_v24  ;;  %v1461_v32 = vadd.f32 %v1444_v0, %v1310_v29 }
 0x11d   : > { %v1612_v34 = vadd.f32 %v1595_v14, %v1461_v32 }
 0x11f   : > { %v1874_v40 = vadd.f32 %v1857_v25, %v1612_v34  ;;  %v1053_v25 = vadd.f32 %v3206_v3, %v902_v23 }
 0x120   : > { %v1295_v42 = vpop.f32.mrf.mxu1  ;;  %v1859_v44 = vpop.f32.mrf.mxu0 }
 0x121   : > { %v1913_v45 = vadd.f32 %v1912_v27, %v1874_v40  ;;  %v1927_v46 = vmul.f32 %v1874_v40, %v1874_v40  ;;  %v1311_v47 = vadd.f32 %v1295_v42, %v1049_v37  ;;  %v1454_v43 = vpop.f32.mrf.mxu2  ;;  %v1605_v22 = vpop.f32.mrf.mxu3 }
 0x123   : > { %v1934_v49 = vadd.f32 %v1933_v31, %v1927_v46  ;;  %v1462_v50 = vadd.f32 %v1446_v9, %v1311_v47 }
 0x125   : > { %v1613_v36 = vadd.f32 %v1597_v33, %v1462_v50 }
 0x127   : > { %v1875_v21 = vadd.f32 %v1859_v44, %v1613_v36 }
 0x128   : > { %v1298_v53 = vpop.f32.mrf.mxu1  ;;  %v1862_v41 = vpop.f32.mrf.mxu0 }
 0x129   : > { %v2736_v56 = vpack.c.bf16 %v1875_v21, %v1874_v40  ;;  %v1914_v59 = vadd.f32 %v1913_v45, %v1875_v21  ;;  %v1928_v60 = vmul.f32 %v1875_v21, %v1875_v21  ;;  %v1312_v54 = vadd.f32 %v1298_v53, %v3194_v51  ;;  %v1456_v10 = vpop.f32.mrf.mxu2  ;;  %v1607_v32 = vpop.f32.mrf.mxu3 }
 0x12a   : > { %v901_v51 = vadd.f32 %v3192_v48, %v3204_v62 }
 0x12b   : > { %2748 = vst [vmem:[%s3219_s20 + $0x8] sm:$0xff] %v2736_v56   ;;  %v1935_v0 = vadd.f32 %v1934_v49, %v1928_v60  ;;  %v1463_v2 = vadd.f32 %v1449_v39, %v1312_v54 }
 0x12c   : > { %v1052_v17 = vadd.f32 %v3202_v61, %v901_v51 }
 0x12d   : > { %v1614_v4 = vadd.f32 %v1600_v52, %v1463_v2 }
 0x12f   : > { %v1876_v6 = vadd.f32 %v1862_v41, %v1614_v4 }
 0x130   : > { %v1300_v8 = vpop.f32.mrf.mxu1  ;;  %v1864_v38 = vpop.f32.mrf.mxu0 }
 0x131   : > { %v1915_v9 = vadd.f32 %v1914_v59, %v1876_v6  ;;  %v1929_v11 = vmul.f32 %v1876_v6, %v1876_v6  ;;  %v1313_v13 = vadd.f32 %v1300_v8, %v1051_v5  ;;  %v1867_v48 = vpop.f32.mrf.mxu2 }
 0x133   : > { %v1936_v15 = vadd.f32 %v1935_v0, %v1929_v11  ;;  %v1464_v16 = vadd.f32 %v1451_v35, %v1313_v13 }
 0x135   : > { %v1615_v57 = vadd.f32 %v1602_v7, %v1464_v16 }
 0x137   : > { %v1877_v18 = vadd.f32 %v1864_v38, %v1615_v57 }
 0x138   : > { %v1303_v14 = vpop.f32.mrf.mxu1 }
 0x139   : > { %v2741_v55 = vpack.c.bf16 %v1877_v18, %v1876_v6  ;;  %v1916_v19 = vadd.f32 %v1915_v9, %v1877_v18  ;;  %v1930_v20 = vmul.f32 %v1877_v18, %v1877_v18  ;;  %v1314_v39 = vadd.f32 %v1303_v14, %v1052_v17  ;;  %v1869_v34 = vpop.f32.mrf.mxu2 }
 0x13b   : > { %2749 = vst [vmem:[%s3219_s20 + $0x10] sm:$0xff] %v2741_v55   ;;  %v1937_v24 = vadd.f32 %v1936_v15, %v1930_v20  ;;  %v1465_v12 = vadd.f32 %v1454_v43, %v1314_v39 }
 0x13d   : > { %v1616_v62 = vadd.f32 %v1605_v22, %v1465_v12 }
 0x13f   : > { %v1878_v26 = vadd.f32 %v1867_v48, %v1616_v62 }
 0x140   : > { %v1305_v61 = vpop.f32.mrf.mxu1 }
 0x141   : > { %v1917_v27 = vadd.f32 %v1916_v19, %v1878_v26  ;;  %v1931_v28 = vmul.f32 %v1878_v26, %v1878_v26  ;;  %v1315_v29 = vadd.f32 %v1305_v61, %v1053_v25 }
 0x143   : > { %v1938_v30 = vadd.f32 %v1937_v24, %v1931_v28  ;;  %v1466_v31 = vadd.f32 %v1456_v10, %v1315_v29 }
 0x145   : > { %v1617_v33 = vadd.f32 %v1607_v32, %v1466_v31 }
 0x147   : > { %v1879_v58 = vadd.f32 %v1869_v34, %v1617_v33 }
 0x149   : > { %v2746_v1 = vpack.c.bf16 %v1879_v58, %v1878_v26  ;;  %v1918_v35 = vadd.f32 %v1917_v27, %v1879_v58  ;;  %v1932_v37 = vmul.f32 %v1879_v58, %v1879_v58 }
 0x14b   : > { %2750 = vst [vmem:[%s3219_s20 + $0x18] sm:$0xff] %v2746_v1   ;;  %v1919_v40 = vrot.slane %v1918_v35, 4  ;;  %v1939_v42 = vadd.f32 %v1938_v30, %v1932_v37 }
 0x14d   : > { %v1920_v44 = vadd.f32 %v1919_v40, %v1918_v35  ;;  %v1940_v3 = vrot.slane %v1939_v42, 4 }
 0x14f   : > { %v1921_v45 = vrot.slane %v1920_v44, 2  ;;  %v1941_v46 = vadd.f32 %v1940_v3, %v1939_v42 }
 0x151   : > { %v1922_v47 = vadd.f32 %v1921_v45, %v1920_v44  ;;  %v1942_v49 = vrot.slane %v1941_v46, 2 }
 0x153   : > { %v1923_v50 = vrot.slane %v1922_v47, 1  ;;  %v1943_v36 = vadd.f32 %v1942_v49, %v1941_v46 }
 0x155   : > { %v1944_v52 = vrot.slane %v1943_v36, 1  ;;  %v1924_v21 = vadd.f32 %v1923_v50, %v1922_v47 }
 0x157   : > { %v1945_v43 = vadd.f32 %v1944_v52, %v1943_v36 }
 0x159   : > { %v1947_v53 = vsel %vm1946_vm3, %v1924_v21, %v1945_v43 }
 0x15a   : > { %1948 = vst [vmem:[%s186_s24] sm:$0x3] %v1947_v53 }
 0x15b PF: > { %s14_s12 = sadd.s32 1, %s2782_s12  }
 0x15c   : > { %p11_p5 = scmp.ge.s32.totalorder %s14_s12, 4  }
 0x15e   :  { %13 = sbr.rel (!%p11_p5) target bundleno = 1 (0x1), region = 83 }

// kernel: resblock_forward.5
= control target key start
LH: loop header
LB: loop body
LE: loop exit
PB: predicated region body
PF: predicated region fallthrough
CT: control target
= control target key end

     0   :  { %s3501_s18 = smov 0   ;;  %s4342_s0 = inlined_call_operand.vmem [shape: bf16[2,10,10,128], index: 0, kind: input, shape index: {}]   ;;  %s4343_s1 = inlined_call_operand.vmem [shape: bf16[9,128,128], index: 1, kind: input, shape index: {}]   ;;  %s4344_s2 = inlined_call_operand.vmem [shape: f32[1,128], index: 2, kind: input, shape index: {}]   ;;  %s4345_s3 = inlined_call_operand.vmem [shape: f32[1,128], index: 3, kind: input, shape index: {}]   ;;  %s4346_s4 = inlined_call_operand.vmem [shape: f32[2,64,128], index: 4, kind: output, shape index: {0}]   ;;  %s4347_s5 = inlined_call_operand.vmem [shape: f32[2,2,128], index: 5, kind: output, shape index: {1}]  }
   0x1 LB: > { %s2828_s19 = sadd.s32 4294967295, %s3469_s18   ;;  %p2832_p0 = scmp.ge.s32.totalorder %s3469_s18, 1  ;;  %s3469_s18 = sphi %s3501_s18, %s16_s18  }
   0x2   : > { %p190_p1 = scmp.lt.s32.totalorder %s3469_s18, 3 }
   0x4   : > { %p191_p2 = pnand %p2832_p0, %p190_p1 }
   0x5   : > { %p222_p3 = scmp.lt.s32.totalorder (!%p191_p2), %s2828_s19, 1 }
   0x6   : > { %194 = sbr.rel (%p191_p2) target bundleno = 433 (0x1b1), region = 36 }
   0xb   : > { %v3367_v0 = vld [vmem:[%s4343_s1 + $0x38] sm:$0xff]  ;;  %v3366_v2 = vld [vmem:[%s4343_s1 + $0x30] sm:$0xff]  ;;  %s4353_s19 = smov (!%p222_p3, %s2828_s19), 1  ;;  %v3365_v6 = vld [vmem:[%s4343_s1 + $0x28] sm:$0xff]  ;;  %vm898_vm0 = vcmask 1042432   ;;  %vm899_vm1 = vcmask 1046532  }
   0xc   : > { %v3383_v1 = vld [vmem:[%s4343_s1 + $0xb8] sm:$0xff]  ;;  %3432 = vmatpush.bf16.msra.mxu1 %v3367_v0  ;;  %396 = vmatpush.bf16.msra.mxu0 %v3367_v0  ;;  %v3382_v3 = vld [vmem:[%s4343_s1 + $0xb0] sm:$0xff]  ;;  %s3448_s30 = smul.u32 80, %s4353_s19  ;;  %v3541_v7 = vld [vmem:[%s4344_s2] ss:$0 sm:$0xff]  ;;  %s2836_s28 = sshll.u32 %s4353_s19, 1 }
   0xd   : > { %1022 = vmatpush.bf16.msra.mxu2 %v3383_v1  ;;  %v3391_v4 = vld [vmem:[%s4343_s1 + $0xf8] sm:$0xff]  ;;  %v3390_v5 = vld [vmem:[%s4343_s1 + $0xf0] sm:$0xff]  ;;  %v3381_v8 = vld [vmem:[%s4343_s1 + $0xa8] sm:$0xff]  ;;  %vm537_vm3 = vsmask.f32 3328  ;;  %vm2739_vm6 = vcmask 1040384   ;;  %s235_s6 = scalar_lea.vmem %s4347_s5, %s2836_s28 }
   0xe   : > { %1213 = vmatpush.bf16.msra.mxu3 %v3391_v4  ;;  %s3536_s12 = scalar_lea.vmem %s4342_s0, %s3448_s30  ;;  %v3551_v13 = vld [vmem:[%s4345_s3] ss:$0 sm:$0xff]  ;;  %v3389_v14 = vld [vmem:[%s4343_s1 + $0xe8] sm:$0xff]  ;;  %v3363_v36 = vld [vmem:[%s4343_s1 + $0x18] sm:$0xff]  ;;  %vm538_vm4 = vsmask.f32 7440 }
   0xf   : > { %v250_v9 = vld [vmem:[%s3536_s12 + $0x20] sm:$0xf]  ;;  %v251_v10 = vld [vmem:[%s3536_s12 + $0x28] sm:$0xf]  ;;  %v787_v24 = vld [vmem:[%s3536_s12 + $0x4] sm:$0x1] }
  0x10   : > { %3433 = vmatpush.bf16.msra.mxu1 %v3366_v2  ;;  %397 = vmatpush.bf16.msra.mxu0 %v3366_v2  ;;  %v258_v11 = vunpack.c.l.bf16 %v250_v9  ;;  %v259_v12 = vunpack.c.l.bf16 %v251_v10  ;;  %v246_v15 = vld [vmem:[%s3536_s12] sm:$0xf]  ;;  %v247_v16 = vld [vmem:[%s3536_s12 + $0x8] sm:$0xf]  ;;  %v789_v30 = vld [vmem:[%s3536_s12 + $0xc] sm:$0x1]  ;;  %v803_v33 = vunpack.c.l.bf16 %v787_v24 }
  0x11   : > { %1023 = vmatpush.bf16.msra.mxu2 %v3382_v3  ;;  %v3364_v17 = vld [vmem:[%s4343_s1 + $0x20] sm:$0xff]  ;;  %v254_v21 = vunpack.c.l.bf16 %v246_v15  ;;  %v255_v22 = vunpack.c.l.bf16 %v247_v16  ;;  %v788_v25 = vld [vmem:[%s3536_s12 + $0x8] sm:$0xe]  ;;  %v805_v35 = vunpack.c.l.bf16 %v789_v30  ;;  %v3379_v41 = vld [vmem:[%s4343_s1 + $0x98] sm:$0xff] }
  0x12   : > { %1214 = vmatpush.bf16.msra.mxu3 %v3390_v5  ;;  %v3380_v18 = vld [vmem:[%s4343_s1 + $0xa0] sm:$0xff]  ;;  %v269_v19 = vmul.f32 %v3541_v7, %v258_v11  ;;  %v270_v20 = vmul.f32 %v3541_v7, %v259_v12  ;;  %v804_v34 = vunpack.c.l.bf16 %v788_v25  ;;  %v819_v43 = vmul.f32 %v3541_v7, %v803_v33  ;;  %v3387_v50 = vld [vmem:[%s4343_s1 + $0xd8] sm:$0xff]  ;;  %v252_v55 = vld [vmem:[%s3536_s12 + $0x30] sm:$0xf] }
  0x13   : > { %v786_v23 = vld [vmem:[%s3536_s12] sm:$0xe]  ;;  %v265_v28 = vmul.f32 %v3541_v7, %v254_v21  ;;  %v266_v29 = vmul.f32 %v3541_v7, %v255_v22  ;;  %v821_v45 = vmul.f32 %v3541_v7, %v805_v35  ;;  %v3362_v56 = vld [vmem:[%s4343_s1 + $0x10] sm:$0xff]  ;;  %v253_v62 = vld [vmem:[%s3536_s12 + $0x38] sm:$0xf] }
  0x14   : > { %3434 = vmatpush.bf16.msra.mxu1 %v3365_v6  ;;  %398 = vmatpush.bf16.msra.mxu0 %v3365_v6  ;;  %v280_v26 = vadd.f32 %v3551_v13, %v269_v19  ;;  %v281_v27 = vadd.f32 %v3551_v13, %v270_v20  ;;  %v3388_v31 = vld [vmem:[%s4343_s1 + $0xe0] sm:$0xff]  ;;  %v802_v32 = vunpack.c.l.bf16 %v786_v23  ;;  %v820_v44 = vmul.f32 %v3541_v7, %v804_v34  ;;  %v3378_v57 = vld [vmem:[%s4343_s1 + $0x90] sm:$0xff]  ;;  %v3361_v9 = vld [vmem:[%s4343_s1 + $0x8] sm:$0xff] }
  0x15   : > { %1024 = vmatpush.bf16.msra.mxu2 %v3381_v8  ;;  %v276_v39 = vadd.f32 %v3551_v13, %v265_v28  ;;  %v277_v40 = vadd.f32 %v3551_v13, %v266_v29  ;;  %v835_v52 = vadd.f32 %v3551_v13, %v819_v43  ;;  %v837_v54 = vadd.f32 %v3551_v13, %v821_v45  ;;  %v248_v3 = vld [vmem:[%s3536_s12 + $0x10] sm:$0xf]  ;;  %v249_v16 = vld [vmem:[%s3536_s12 + $0x18] sm:$0xf]  ;;  %vm3618_vm2 = vmor %vm898_vm0, %vm899_vm1 }
  0x16   : > { %1215 = vmatpush.bf16.msra.mxu3 %v3389_v14  ;;  %v288_v37 = vmax.f32 %v280_v26, 0.0  ;;  %v289_v38 = vmax.f32 %v281_v27, 0.0  ;;  %v818_v42 = vmul.f32 %v3541_v7, %v802_v32  ;;  %v836_v53 = vadd.f32 %v3551_v13, %v820_v44  ;;  %v3386_v15 = vld [vmem:[%s4343_s1 + $0xd0] sm:$0xff]  ;;  %v2973_v22 = vld [vmem:[%s3536_s12 + $0x8] sm:$0xf]  ;;  %v3376_v45 = vld [vmem:[%s4343_s1 + $0x80] sm:$0xff] }
  0x17   : > { %v284_v48 = vmax.f32 %v276_v39, 0.0  ;;  %v285_v49 = vmax.f32 %v277_v40, 0.0  ;;  %v851_v0 = vmax.f32 %v835_v52, 0.0  ;;  %v853_v2 = vmax.f32 %v837_v54, 0.0  ;;  %v2974_v23 = vld [vmem:[%s3536_s12 + $0x10] sm:$0xf]  ;;  %vm3766_vm5 = vmor %vm537_vm3, %vm538_vm4 }
  0x18   : > { %3435 = vmatpush.bf16.msra.mxu1 %v3364_v17  ;;  %399 = vmatpush.bf16.msra.mxu0 %v3364_v17  ;;  %v296_v46 = vpack.c.bf16 %v288_v37, %v288_v37  ;;  %v297_v47 = vpack.c.bf16 %v289_v38, %v289_v38  ;;  %v834_v51 = vadd.f32 %v3551_v13, %v818_v42  ;;  %v852_v1 = vmax.f32 %v836_v53, 0.0  ;;  %v3377_v24 = vld [vmem:[%s4343_s1 + $0x88] sm:$0xff]  ;;  %v790_v38 = vld [vmem:[%s3536_s12 + $0x10] sm:$0xe]  ;;  %v3360_v39 = vld [vmem:[%s4343_s1] sm:$0xff] }
  0x19   : > { %1025 = vmatpush.bf16.msra.mxu2 %v3380_v18  ;;  %v292_v60 = vpack.c.bf16 %v284_v48, %v284_v48  ;;  %v293_v61 = vpack.c.bf16 %v285_v49, %v285_v49  ;;  %v260_v8 = vunpack.c.l.bf16 %v252_v55  ;;  %v867_v11 = vpack.c.bf16 %v851_v0, %v851_v0  ;;  %v3385_v35 = vld [vmem:[%s4343_s1 + $0xc8] sm:$0xff]  ;;  %v3375_v40 = vld [vmem:[%s4343_s1 + $0x78] sm:$0xff] }
  0x1a   : > { %1216 = vmatpush.bf16.msra.mxu3 %v3388_v31  ;;  %v336_v58 = vunpack.c.l.b16 %v296_v46  ;;  %v337_v59 = vunpack.c.l.b16 %v297_v47  ;;  %v850_v63 = vmax.f32 %v834_v51, 0.0  ;;  %v868_v12 = vpack.c.bf16 %v852_v1, %v852_v1  ;;  %v792_v51 = vld [vmem:[%s3536_s12 + $0x18] sm:$0xe] }
  0x1b   : > { %v332_v5 = vunpack.c.l.b16 %v292_v60  ;;  %v333_v6 = vunpack.c.l.b16 %v293_v61  ;;  %v869_v14 = vpack.c.bf16 %v853_v2, %v853_v2  ;;  %v261_v19 = vunpack.c.l.bf16 %v253_v62  ;;  %v3399_v52 = vld [vmem:[%s4343_s1 + $0x138] sm:$0xff]  ;;  %v3384_v2 = vld [vmem:[%s4343_s1 + $0xc0] sm:$0xff] }
  0x1c   : > { %3436 = vmatpush.bf16.msra.mxu1 %v3363_v36  ;;  %400 = vmatpush.bf16.msra.mxu0 %v3363_v36  ;;  %v3605_v4 = vpack.c.b16 %v337_v59, %v336_v58  ;;  %v866_v10 = vpack.c.bf16 %v850_v63, %v850_v63  ;;  %v271_v20 = vmul.f32 %v3541_v7, %v260_v8  ;;  %v256_v21 = vunpack.c.l.bf16 %v248_v3  ;;  %v793_v62 = vld [vmem:[%s3536_s12 + $0x1c] sm:$0x1]  ;;  %v3374_v63 = vld [vmem:[%s4343_s1 + $0x70] sm:$0xff] }
  0x1d   : > { %1026 = vmatpush.bf16.msra.mxu2 %v3379_v41  ;;  %v3614_v17 = vpack.c.b16 %v333_v6, %v332_v5  ;;  %v903_v26 = vrot.slane %v867_v11, 5  ;;  %v2918_v27 = vrot.slane %v868_v12, 9  ;;  %v907_v28 = vrot.slane %v869_v14, 5  ;;  %v3423_v11 = vld [vmem:[%s4343_s1 + $0x1f8] sm:$0xff]  ;;  %v441_v12 = vld [vmem:[%s3536_s12] sm:$0xf] }
  0x1e   : > { %1217 = vmatpush.bf16.msra.mxu3 %v3387_v50  ;;  %v2917_v25 = vrot.slane %v866_v10, 9  ;;  %v272_v29 = vmul.f32 %v3541_v7, %v261_v19  ;;  %v282_v30 = vadd.f32 %v3551_v13, %v271_v20  ;;  %v257_v31 = vunpack.c.l.bf16 %v249_v16  ;;  %v791_v50 = vld [vmem:[%s3536_s12 + $0x14] sm:$0x1] }
  0x1f   : > { %v267_v32 = vmul.f32 %v3541_v7, %v256_v21  ;;  %v908_v34 = vsel %vm3618_vm2, %v2918_v27, %v907_v28  ;;  %v1076_v36 = vunpack.c.l.bf16 %v2973_v22  ;;  %v1077_v37 = vunpack.c.l.bf16 %v2974_v23  ;;  %v3398_v14 = vld [vmem:[%s4343_s1 + $0x130] sm:$0xff] }
  0x20   : > { %3437 = vmatpush.bf16.msra.mxu1 %v3362_v56  ;;  %401 = vmatpush.bf16.msra.mxu0 %v3362_v56  ;;  %v904_v33 = vsel %vm3618_vm2, %v2917_v25, %v903_v26  ;;  %v959_v42 = vunpack.c.l.b16 %v908_v34  ;;  %v283_v43 = vadd.f32 %v3551_v13, %v272_v29  ;;  %v290_v44 = vmax.f32 %v282_v30, 0.0  ;;  %v3415_v56 = vld [vmem:[%s4343_s1 + $0x1b8] sm:$0xff]  ;;  %v3414_v21 = vld [vmem:[%s4343_s1 + $0x1b0] sm:$0xff]  ;;  %v442_v26 = vld [vmem:[%s3536_s12 + $0x4] sm:$0x1] }
  0x21   : > { %1027 = vmatpush.bf16.msra.mxu2 %v3378_v57  ;;  %v958_v41 = vunpack.c.l.b16 %v904_v33  ;;  %v268_v46 = vmul.f32 %v3541_v7, %v257_v31  ;;  %v278_v47 = vadd.f32 %v3551_v13, %v267_v32  ;;  %v1084_v48 = vmul.f32 %v3541_v7, %v1076_v36  ;;  %v443_v30 = vld [vmem:[%s3536_s12 + $0x8] sm:$0xf] }
  0x22   : > { %1218 = vmatpush.bf16.msra.mxu3 %v3386_v15  ;;  %v1085_v49 = vmul.f32 %v3541_v7, %v1077_v37  ;;  %v291_v54 = vmax.f32 %v283_v43, 0.0  ;;  %v298_v55 = vpack.c.bf16 %v290_v44, %v290_v44  ;;  %v806_v57 = vunpack.c.l.bf16 %v790_v38  ;;  %v3397_v36 = vld [vmem:[%s4343_s1 + $0x128] sm:$0xff] }
  0x23   : > { %v966_v53 = vpack.c.b16 %v959_v42, %v958_v41  ;;  %v279_v58 = vadd.f32 %v3551_v13, %v268_v46  ;;  %v286_v59 = vmax.f32 %v278_v47, 0.0  ;;  %v1092_v60 = vadd.f32 %v3551_v13, %v1084_v48 }
  0x24   : > { %3438 = vmatpush.bf16.msra.mxu1 %v3361_v9  ;;  %402 = vmatpush.bf16.msra.mxu0 %v3361_v9  ;;  %v1093_v61 = vadd.f32 %v3551_v13, %v1085_v49  ;;  %v299_v0 = vpack.c.bf16 %v291_v54, %v291_v54  ;;  %v338_v1 = vunpack.c.l.b16 %v298_v55  ;;  %v807_v3 = vunpack.c.l.bf16 %v791_v50  ;;  %v3372_v50 = vld [vmem:[%s4343_s1 + $0x60] sm:$0xff] }
  0x25   : > { %1028 = vmatpush.bf16.msra.mxu2 %v3377_v24  ;;  %v808_v5 = vunpack.c.l.bf16 %v792_v51  ;;  %v287_v6 = vmax.f32 %v279_v58, 0.0  ;;  %v294_v8 = vpack.c.bf16 %v286_v59, %v286_v59  ;;  %v1100_v9 = vmax.f32 %v1092_v60, 0.0  ;;  %v3396_v54 = vld [vmem:[%s4343_s1 + $0x120] sm:$0xff] }
  0x26   : > { %1219 = vmatpush.bf16.msra.mxu3 %v3385_v35  ;;  %v1101_v10 = vmax.f32 %v1093_v61, 0.0  ;;  %v339_v15 = vunpack.c.l.b16 %v299_v0  ;;  %v809_v16 = vunpack.c.l.bf16 %v793_v62  ;;  %v822_v19 = vmul.f32 %v3541_v7, %v806_v57  ;;  %v444_v35 = vld [vmem:[%s3536_s12 + $0xc] sm:$0x1]  ;;  %v3371_v0 = vld [vmem:[%s4343_s1 + $0x58] sm:$0xff] }
  0x27   : > { %v823_v20 = vmul.f32 %v3541_v7, %v807_v3  ;;  %v295_v22 = vpack.c.bf16 %v287_v6, %v287_v6  ;;  %v334_v23 = vunpack.c.l.b16 %v294_v8  ;;  %v1108_v24 = vpack.c.bf16 %v1100_v9, %v1100_v9 }
  0x28   : > { %3439 = vmatpush.bf16.msra.mxu1 %v3360_v39  ;;  %403 = vmatpush.bf16.msra.mxu0 %v3360_v39  ;;  %v1109_v25 = vpack.c.bf16 %v1101_v10, %v1101_v10  ;;  %v3686_v27 = vpack.c.b16 %v339_v15, %v338_v1  ;;  %v824_v28 = vmul.f32 %v3541_v7, %v808_v5  ;;  %v457_v31 = vunpack.c.l.bf16 %v441_v12  ;;  %v2976_v10 = vld [vmem:[%s3536_s12 + $0x20] sm:$0xf] }
  0x29   : > { %1029 = vmatpush.bf16.msra.mxu2 %v3376_v45  ;;  %v825_v29 = vmul.f32 %v3541_v7, %v809_v16  ;;  %v1149_v32 = vunpack.c.l.b16 %v1108_v24  ;;  %v838_v34 = vadd.f32 %v3551_v13, %v822_v19  ;;  %v839_v37 = vadd.f32 %v3551_v13, %v823_v20  ;;  %v3413_v45 = vld [vmem:[%s4343_s1 + $0x1a8] sm:$0xff]  ;;  %v3422_v19 = vld [vmem:[%s4343_s1 + $0x1f0] sm:$0xff] }
  0x2a   : > { %1220 = vmatpush.bf16.msra.mxu3 %v3384_v2  ;;  %v1150_v33 = vunpack.c.l.b16 %v1109_v25  ;;  %v840_v38 = vadd.f32 %v3551_v13, %v824_v28  ;;  %v459_v44 = vunpack.c.l.bf16 %v443_v30  ;;  %v460_v49 = vunpack.c.l.bf16 %v444_v35  ;;  %v3370_v24 = vld [vmem:[%s4343_s1 + $0x50] sm:$0xff] }
  0x2b   : > { %414 = vmatmul.bf16.vlgmr.msra.gmra.mxu1 %v3605_v4  ;;  %404 = vmatmul.bf16.vlgmr.msra.gmra.mxu0 %v3614_v17  ;;  %v3373_v4 = vld [vmem:[%s4343_s1 + $0x68] sm:$0xff]  ;;  %v335_v17 = vunpack.c.l.b16 %v295_v22  ;;  %v841_v39 = vadd.f32 %v3551_v13, %v825_v29  ;;  %v854_v43 = vmax.f32 %v838_v34, 0.0  ;;  %v855_v46 = vmax.f32 %v839_v37, 0.0  ;;  %v3394_v35 = vld [vmem:[%s4343_s1 + $0x110] sm:$0xff] }
  0x2c   : > { %741 = vmatpush.bf16.msrb.mxu1 %v3375_v40  ;;  %1555 = vmatpush.bf16.msrb.mxu0 %v3399_v52  ;;  %v458_v40 = vunpack.c.l.bf16 %v442_v26  ;;  %v1157_v42 = vpack.c.b16 %v1150_v33, %v1149_v32  ;;  %v856_v47 = vmax.f32 %v840_v38, 0.0  ;;  %v473_v52 = vmul.f32 %v3541_v7, %v457_v31  ;;  %v3029_v32 = vld [vmem:[%s3536_s12 + $0x8] sm:$0xf]  ;;  %v3412_v33 = vld [vmem:[%s4343_s1 + $0x1a0] sm:$0xff] }
  0x2d   : > { %2024 = vmatpush.bf16.msrb.mxu2 %v3415_v56  ;;  %v3702_v41 = vpack.c.b16 %v335_v17, %v334_v23  ;;  %v857_v48 = vmax.f32 %v841_v39, 0.0  ;;  %v870_v51 = vpack.c.bf16 %v854_v43, %v854_v43  ;;  %v871_v55 = vpack.c.bf16 %v855_v46, %v855_v46  ;;  %v3421_v34 = vld [vmem:[%s4343_s1 + $0x1e8] sm:$0xff]  ;;  %v3031_v46 = vld [vmem:[%s3536_s12 + $0x10] sm:$0xf] }
  0x2e   : > { %1030 = vmatmul.bf16.vlgmr.msra.gmra.mxu2 %v966_v53  ;;  %2366 = vmatpush.bf16.msrb.mxu3 %v3423_v11  ;;  %v474_v53 = vmul.f32 %v3541_v7, %v458_v40  ;;  %v872_v56 = vpack.c.bf16 %v856_v47, %v856_v47  ;;  %v475_v58 = vmul.f32 %v3541_v7, %v459_v44  ;;  %v3395_v11 = vld [vmem:[%s4343_s1 + $0x118] sm:$0xff]  ;;  %v1079_v28 = vunpack.c.l.bf16 %v2976_v10  ;;  %v3030_v40 = vld [vmem:[%s3536_s12 + $0xc] sm:$0x1] }
  0x2f   : > { %1221 = vmatmul.bf16.vlgmr.msra.gmra.mxu3 %v1157_v42  ;;  %v873_v57 = vpack.c.bf16 %v857_v48, %v857_v48  ;;  %v2919_v59 = vrot.slane %v870_v51, 9  ;;  %v476_v60 = vmul.f32 %v3541_v7, %v460_v49  ;;  %v489_v61 = vadd.f32 %v3551_v13, %v473_v52  ;;  %v3032_v51 = vld [vmem:[%s3536_s12 + $0x14] sm:$0x1] }
  0x30   : > { %742 = vmatpush.bf16.msrb.mxu1 %v3374_v63  ;;  %1556 = vmatpush.bf16.msrb.mxu0 %v3398_v14  ;;  %v490_v62 = vadd.f32 %v3551_v13, %v474_v53  ;;  %v2975_v63 = vld [vmem:[%s3536_s12 + $0x18] sm:$0xf]  ;;  %v911_v1 = vrot.slane %v871_v55, 5  ;;  %v2920_v2 = vrot.slane %v872_v56, 9  ;;  %v491_v5 = vadd.f32 %v3551_v13, %v475_v58  ;;  %v3393_v55 = vld [vmem:[%s4343_s1 + $0x108] sm:$0xff] }
  0x31   : > { %2025 = vmatpush.bf16.msrb.mxu2 %v3414_v21  ;;  %v915_v3 = vrot.slane %v873_v57, 5  ;;  %v492_v6 = vadd.f32 %v3551_v13, %v476_v60  ;;  %v505_v8 = vmax.f32 %v489_v61, 0.0  ;;  %v1078_v16 = vunpack.c.l.bf16 %v2975_v63 }
  0x32   : > { %v506_v9 = vmax.f32 %v490_v62, 0.0  ;;  %v912_v12 = vsel %vm3618_vm2, %v2919_v59, %v911_v1  ;;  %v507_v15 = vmax.f32 %v491_v5, 0.0  ;;  %2367 = vmatpush.bf16.msrb.mxu3 %v3422_v19  ;;  %v1087_v39 = vmul.f32 %v3541_v7, %v1079_v28  ;;  %v3407_v19 = vld [vmem:[%s4343_s1 + $0x178] sm:$0xff]  ;;  %v796_v28 = vld [vmem:[%s3536_s12 + $0x28] sm:$0xe] }
  0x33   : > { %v916_v14 = vsel %vm3618_vm2, %v2920_v2, %v915_v3  ;;  %v960_v20 = vunpack.c.l.b16 %v912_v12  ;;  %v508_v22 = vmax.f32 %v492_v6, 0.0  ;;  %v521_v23 = vpack.c.bf16 %v505_v8, %v505_v8  ;;  %v3368_v6 = vld [vmem:[%s4343_s1 + $0x40] sm:$0xff] }
  0x34   : > { %743 = vmatpush.bf16.msrb.mxu1 %v3373_v4  ;;  %1557 = vmatpush.bf16.msrb.mxu0 %v3397_v36  ;;  %v961_v21 = vunpack.c.l.b16 %v916_v14  ;;  %v522_v25 = vpack.c.bf16 %v506_v9, %v506_v9  ;;  %v523_v26 = vpack.c.bf16 %v507_v15, %v507_v15  ;;  %v1086_v29 = vmul.f32 %v3541_v7, %v1078_v16  ;;  %v794_v12 = vld [vmem:[%s3536_s12 + $0x20] sm:$0xe]  ;;  %v795_v14 = vld [vmem:[%s3536_s12 + $0x24] sm:$0x1] }
  0x35   : > { %2026 = vmatpush.bf16.msrb.mxu2 %v3413_v45  ;;  %v524_v31 = vpack.c.bf16 %v508_v22, %v508_v22  ;;  %v541_v4 = vshrl.u32 %v521_v23, 16  ;;  %v544_v17 = vshll.u32 %v521_v23, 16  ;;  %v1275_v59 = vunpack.c.l.bf16 %v3030_v40  ;;  %v3406_v40 = vld [vmem:[%s4343_s1 + $0x170] sm:$0xff] }
  0x36   : > { %v967_v30 = vpack.c.b16 %v961_v21, %v960_v20  ;;  %v550_v36 = vshll.u32 %v522_v25, 16  ;;  %v555_v37 = vshrl.u32 %v523_v26, 16  ;;  %v558_v38 = vshll.u32 %v523_v26, 16  ;;  %2368 = vmatpush.bf16.msrb.mxu3 %v3421_v34  ;;  %v3392_v20 = vld [vmem:[%s4343_s1 + $0x100] sm:$0xff] }
  0x37   : > { %v543_v42 = vrot.slane %v541_v4, 4  ;;  %v546_v43 = vrot.slane %v544_v17, 5  ;;  %v564_v44 = vshll.u32 %v524_v31, 16  ;;  %v1094_v45 = vadd.f32 %v3551_v13, %v1086_v29  ;;  %v797_v29 = vld [vmem:[%s3536_s12 + $0x2c] sm:$0x1] }
  0x38   : > { %744 = vmatpush.bf16.msrb.mxu1 %v3372_v50  ;;  %1558 = vmatpush.bf16.msrb.mxu0 %v3396_v54  ;;  %v552_v47 = vrot.slane %v550_v36, 5  ;;  %v557_v48 = vrot.slane %v555_v37, 4  ;;  %v560_v49 = vrot.slane %v558_v38, 5  ;;  %v1095_v50 = vadd.f32 %v3551_v13, %v1087_v39 }
  0x39   : > { %v566_v52 = vrot.slane %v564_v44, 5  ;;  %v1102_v53 = vmax.f32 %v1094_v45, 0.0  ;;  %v1274_v54 = vunpack.c.l.bf16 %v3029_v32  ;;  %2027 = vmatpush.bf16.msrb.mxu2 %v3412_v33  ;;  %v1276_v60 = vunpack.c.l.bf16 %v3031_v46 }
  0x3a   : > { %v561_v57 = vor.u32 %v560_v49, %v557_v48  ;;  %v1103_v58 = vmax.f32 %v1095_v50, 0.0  ;;  %v1277_v63 = vunpack.c.l.bf16 %v3032_v51  ;;  %v1291_v3 = vmul.f32 %v3541_v7, %v1275_v59  ;;  %v3411_v50 = vld [vmem:[%s4343_s1 + $0x198] sm:$0xff]  ;;  %v445_v59 = vld [vmem:[%s3536_s12 + $0x10] sm:$0xf] }
  0x3b   : > { %419 = vmatmul.bf16.gmra.mxu1 %v3686_v27  ;;  %409 = vmatmul.bf16.gmra.mxu0 %v3702_v41  ;;  %v3369_v27 = vld [vmem:[%s4343_s1 + $0x48] sm:$0xff]  ;;  %v547_v41 = vor.u32 %v546_v43, %v543_v42  ;;  %v1110_v62 = vpack.c.bf16 %v1102_v53, %v1102_v53  ;;  %v1292_v5 = vmul.f32 %v3541_v7, %v1276_v60  ;;  %v810_v4 = vunpack.c.l.bf16 %v794_v12  ;;  %v3808_v51 = vld [vmem:[%s4343_s1 + $0x238] sm:$0xff] }
  0x3c   : > { %745 = vmatpush.bf16.msrb.mxu1 %v3371_v0  ;;  %1559 = vmatpush.bf16.msrb.mxu0 %v3395_v11  ;;  %v1290_v0 = vmul.f32 %v3541_v7, %v1274_v54  ;;  %v562_v1 = vrot.slane %v561_v57, 4  ;;  %v1111_v2 = vpack.c.bf16 %v1103_v58, %v1103_v58  ;;  %v1293_v10 = vmul.f32 %v3541_v7, %v1277_v63  ;;  %v3405_v60 = vld [vmem:[%s4343_s1 + $0x168] sm:$0xff] }
  0x3d   : > { %v548_v61 = vrot.slane %v547_v41, 4  ;;  %v1151_v9 = vunpack.c.l.b16 %v1110_v62  ;;  %v1307_v22 = vadd.f32 %v3551_v13, %v1291_v3  ;;  %v811_v17 = vunpack.c.l.bf16 %v795_v14  ;;  %2028 = vmatpush.bf16.msrb.mxu2 %v3411_v50 }
  0x3e   : > { %1035 = vmatmul.bf16.gmra.mxu2 %v967_v30  ;;  %v1306_v11 = vadd.f32 %v3551_v13, %v1290_v0  ;;  %v567_v15 = vsel %vm3766_vm5, %v562_v1, %v566_v52  ;;  %v1152_v21 = vunpack.c.l.b16 %v1111_v2  ;;  %v1309_v25 = vadd.f32 %v3551_v13, %v1293_v10  ;;  %v446_v1 = vld [vmem:[%s3536_s12 + $0x14] sm:$0x1] }
  0x3f   : > { %v553_v8 = vsel %vm3766_vm5, %v548_v61, %v552_v47  ;;  %v678_v23 = vunpack.c.l.b16 %v567_v15  ;;  %v1323_v31 = vmax.f32 %v1307_v22, 0.0  ;;  %v812_v37 = vunpack.c.l.bf16 %v796_v28 }
  0x40   : > { %746 = vmatpush.bf16.msrb.mxu1 %v3370_v24  ;;  %1560 = vmatpush.bf16.msrb.mxu0 %v3394_v35  ;;  %v677_v16 = vunpack.c.l.b16 %v553_v8  ;;  %v1308_v24 = vadd.f32 %v3551_v13, %v1292_v5  ;;  %v1322_v26 = vmax.f32 %v1306_v11, 0.0  ;;  %v1158_v30 = vpack.c.b16 %v1152_v21, %v1151_v9  ;;  %v447_v8 = vld [vmem:[%s3536_s12 + $0x18] sm:$0xf] }
  0x41   : > { %v1325_v34 = vmax.f32 %v1309_v25, 0.0  ;;  %v1339_v36 = vpack.c.bf16 %v1323_v31, %v1323_v31  ;;  %v813_v38 = vunpack.c.l.bf16 %v797_v29  ;;  %v826_v39 = vmul.f32 %v3541_v7, %v810_v4 }
  0x42   : > { %v685_v32 = vpack.c.b16 %v678_v23, %v677_v16  ;;  %v1324_v33 = vmax.f32 %v1308_v24, 0.0  ;;  %v1338_v35 = vpack.c.bf16 %v1322_v26, %v1322_v26  ;;  %1226 = vmatmul.bf16.gmra.mxu3 %v1158_v30  ;;  %v827_v47 = vmul.f32 %v3541_v7, %v811_v17 }
  0x43   : > { %v1341_v43 = vpack.c.bf16 %v1325_v34, %v1325_v34  ;;  %v1364_v46 = vshll.u32 %v1339_v36, 16  ;;  %v828_v48 = vmul.f32 %v3541_v7, %v812_v37  ;;  %v829_v49 = vmul.f32 %v3541_v7, %v813_v38 }
  0x44   : > { %747 = vmatpush.bf16.msrb.mxu1 %v3369_v27  ;;  %1561 = vmatpush.bf16.msrb.mxu0 %v3393_v55  ;;  %v1340_v42 = vpack.c.bf16 %v1324_v33, %v1324_v33  ;;  %v1355_v44 = vshrl.u32 %v1338_v35, 16  ;;  %v1358_v45 = vshll.u32 %v1338_v35, 16  ;;  %v842_v57 = vadd.f32 %v3551_v13, %v826_v39 }
  0x45   : > { %v1366_v54 = vrot.slane %v1364_v46, 5  ;;  %v1378_v55 = vshll.u32 %v1341_v43, 16  ;;  %v843_v58 = vadd.f32 %v3551_v13, %v827_v47  ;;  %v844_v0 = vadd.f32 %v3551_v13, %v828_v48  ;;  %v3033_v43 = vld [vmem:[%s3536_s12 + $0x18] sm:$0xf]  ;;  %v3420_v48 = vld [vmem:[%s4343_s1 + $0x1e0] sm:$0xff] }
  0x46   : > { %v1357_v27 = vrot.slane %v1355_v44, 4  ;;  %v1360_v41 = vrot.slane %v1358_v45, 5  ;;  %v1369_v52 = vshrl.u32 %v1340_v42, 16  ;;  %v1372_v53 = vshll.u32 %v1340_v42, 16  ;;  %v2978_v42 = vld [vmem:[%s3536_s12 + $0x30] sm:$0xf]  ;;  %2369 = vmatpush.bf16.msrb.mxu3 %v3420_v48 }
  0x47   : > { %v1380_v2 = vrot.slane %v1378_v55, 5  ;;  %v845_v3 = vadd.f32 %v3551_v13, %v829_v49  ;;  %v858_v5 = vmax.f32 %v842_v57, 0.0  ;;  %v860_v11 = vmax.f32 %v844_v0, 0.0 }
  0x48   : > { %748 = vmatpush.bf16.msrb.mxu1 %v3368_v6  ;;  %1562 = vmatpush.bf16.msrb.mxu0 %v3392_v20  ;;  %v1361_v61 = vor.u32 %v1360_v41, %v1357_v27  ;;  %v1371_v62 = vrot.slane %v1369_v52, 4  ;;  %v1374_v63 = vrot.slane %v1372_v53, 5  ;;  %v859_v6 = vmax.f32 %v843_v58, 0.0  ;;  %v3034_v52 = vld [vmem:[%s3536_s12 + $0x1c] sm:$0x1] }
  0x49   : > { %v461_v12 = vunpack.c.l.bf16 %v445_v59  ;;  %v861_v14 = vmax.f32 %v845_v3, 0.0  ;;  %v874_v15 = vpack.c.bf16 %v858_v5, %v858_v5  ;;  %v462_v20 = vunpack.c.l.bf16 %v446_v1  ;;  %v3404_v3 = vld [vmem:[%s4343_s1 + $0x160] sm:$0xff]  ;;  %v3410_v5 = vld [vmem:[%s4343_s1 + $0x190] sm:$0xff] }
  0x4a   : > { %v1362_v9 = vrot.slane %v1361_v61, 4  ;;  %v1375_v10 = vor.u32 %v1374_v63, %v1371_v62  ;;  %v875_v16 = vpack.c.bf16 %v859_v6, %v859_v6  ;;  %v876_v23 = vpack.c.bf16 %v860_v11, %v860_v11  ;;  %v3035_v62 = vld [vmem:[%s3536_s12 + $0x20] sm:$0xf]  ;;  %v3858_v6 = vld [vmem:[%s4343_s1 + $0x230] sm:$0xff]  ;;  %2029 = vmatpush.bf16.msrb.mxu2 %v3410_v5 }
  0x4b   : > { %749 = vmatmul.bf16.vlgmr.msrb.gmra.mxu1 %v685_v32  ;;  %v463_v24 = vunpack.c.l.bf16 %v447_v8  ;;  %v877_v26 = vpack.c.bf16 %v861_v14, %v861_v14  ;;  %v2921_v28 = vrot.slane %v874_v15, 9  ;;  %v477_v17 = vmul.f32 %v3541_v7, %v461_v12  ;;  %v2977_v32 = vld [vmem:[%s3536_s12 + $0x28] sm:$0xf]  ;;  %v3419_v12 = vld [vmem:[%s4343_s1 + $0x1d8] sm:$0xff] }
  0x4c   : > { %1833 = vmatpush.bf16.msra.mxu1 %v3407_v19  ;;  %2644 = vmatpush.bf16.msra.mxu0 %v3808_v51  ;;  %v448_v19 = vld [vmem:[%s3536_s12 + $0x1c] sm:$0x1]  ;;  %v1367_v21 = vsel %vm3766_vm5, %v1362_v9, %v1366_v54  ;;  %v1376_v22 = vrot.slane %v1375_v10, 4  ;;  %v919_v29 = vrot.slane %v875_v16, 5  ;;  %v2922_v31 = vrot.slane %v876_v23, 9 }
  0x4d   : > { %v1491_v25 = vunpack.c.l.b16 %v1367_v21  ;;  %v464_v4 = vunpack.c.l.bf16 %v448_v19  ;;  %v923_v35 = vrot.slane %v877_v26, 5  ;;  %v478_v36 = vmul.f32 %v3541_v7, %v462_v20  ;;  %v3036_v19 = vld [vmem:[%s3536_s12 + $0x24] sm:$0x1]  ;;  %2370 = vmatpush.bf16.msrb.mxu3 %v3419_v12  ;;  %v3403_v12 = vld [vmem:[%s4343_s1 + $0x158] sm:$0xff] }
  0x4e   : > { %v1381_v30 = vsel %vm3766_vm5, %v1376_v22, %v1380_v2  ;;  %v920_v34 = vsel %vm3618_vm2, %v2921_v28, %v919_v29  ;;  %v479_v38 = vmul.f32 %v3541_v7, %v463_v24  ;;  %v1080_v47 = vunpack.c.l.bf16 %v2977_v32  ;;  %v798_v32 = vld [vmem:[%s3536_s12 + $0x30] sm:$0xe] }
  0x4f   : > { %v1492_v33 = vunpack.c.l.b16 %v1381_v30  ;;  %v962_v37 = vunpack.c.l.b16 %v920_v34  ;;  %v480_v39 = vmul.f32 %v3541_v7, %v464_v4  ;;  %v924_v45 = vsel %vm3618_vm2, %v2922_v31, %v923_v35 }
  0x50   : > { %1834 = vmatpush.bf16.msra.mxu1 %v3406_v40  ;;  %v493_v40 = vadd.f32 %v3551_v13, %v477_v17  ;;  %v494_v46 = vadd.f32 %v3551_v13, %v478_v36  ;;  %v963_v49 = vunpack.c.l.b16 %v924_v45  ;;  %v495_v50 = vadd.f32 %v3551_v13, %v479_v38  ;;  %2645 = vmatpush.bf16.msra.mxu0 %v3858_v6  ;;  %v799_v45 = vld [vmem:[%s3536_s12 + $0x34] sm:$0x1] }
  0x51   : > { %v1499_v44 = vpack.c.b16 %v1492_v33, %v1491_v25  ;;  %v496_v27 = vadd.f32 %v3551_v13, %v480_v39  ;;  %v1081_v54 = vunpack.c.l.bf16 %v2978_v42  ;;  %v1088_v55 = vmul.f32 %v3541_v7, %v1080_v47 }
  0x52   : > { %v509_v41 = vmax.f32 %v493_v40, 0.0  ;;  %v510_v53 = vmax.f32 %v494_v46, 0.0  ;;  %v1278_v57 = vunpack.c.l.bf16 %v3033_v43  ;;  %v968_v58 = vpack.c.b16 %v963_v49, %v962_v37 }
  0x53   : > { %1563 = vmatmul.bf16.vlgmr.msrb.gmra.mxu0 %v1499_v44  ;;  %v511_v59 = vmax.f32 %v495_v50, 0.0  ;;  %v1089_v0 = vmul.f32 %v3541_v7, %v1081_v54  ;;  %v1096_v1 = vadd.f32 %v3551_v13, %v1088_v55  ;;  %v1279_v2 = vunpack.c.l.bf16 %v3034_v52  ;;  %v801_v55 = vld [vmem:[%s3536_s12 + $0x3c] sm:$0x1] }
  0x54   : > { %1835 = vmatpush.bf16.msra.mxu1 %v3405_v60  ;;  %v512_v60 = vmax.f32 %v496_v27, 0.0  ;;  %v525_v61 = vpack.c.bf16 %v509_v41, %v509_v41  ;;  %v526_v63 = vpack.c.bf16 %v510_v53, %v510_v53  ;;  %1040 = vmatmul.bf16.gmra.mxu2 %v968_v58  ;;  %v1280_v20 = vunpack.c.l.bf16 %v3035_v62  ;;  %v800_v27 = vld [vmem:[%s3536_s12 + $0x38] sm:$0xe] }
  0x55   : > { %v527_v8 = vpack.c.bf16 %v511_v59, %v511_v59  ;;  %v1097_v15 = vadd.f32 %v3551_v13, %v1089_v0  ;;  %v1104_v16 = vmax.f32 %v1096_v1, 0.0  ;;  %v1281_v17 = vunpack.c.l.bf16 %v3036_v19 }
  0x56   : > { %v528_v9 = vpack.c.bf16 %v512_v60, %v512_v60  ;;  %v569_v10 = vshrl.u32 %v525_v61, 16  ;;  %v572_v11 = vshll.u32 %v525_v61, 16  ;;  %v578_v14 = vshll.u32 %v526_v63, 16 }
  0x57   : > { %v583_v23 = vshrl.u32 %v527_v8, 16  ;;  %v586_v24 = vshll.u32 %v527_v8, 16  ;;  %v1105_v28 = vmax.f32 %v1097_v15, 0.0  ;;  %v1112_v29 = vpack.c.bf16 %v1104_v16, %v1104_v16 }
  0x58   : > { %1836 = vmatpush.bf16.msra.mxu1 %v3404_v3  ;;  %v571_v21 = vrot.slane %v569_v10, 4  ;;  %v574_v22 = vrot.slane %v572_v11, 5  ;;  %v580_v25 = vrot.slane %v578_v14, 5  ;;  %v592_v26 = vshll.u32 %v528_v9, 16  ;;  %v3892_v14 = vld [vmem:[%s4343_s1 + $0x228] sm:$0xff] }
  0x59   : > { %v585_v31 = vrot.slane %v583_v23, 4  ;;  %v588_v4 = vrot.slane %v586_v24, 5  ;;  %v1113_v34 = vpack.c.bf16 %v1105_v28, %v1105_v28  ;;  %v1153_v35 = vunpack.c.l.b16 %v1112_v29  ;;  %v449_v28 = vld [vmem:[%s3536_s12 + $0x20] sm:$0xf]  ;;  %2646 = vmatpush.bf16.msra.mxu0 %v3892_v14 }
  0x5a   : > { %v575_v30 = vor.u32 %v574_v22, %v571_v21  ;;  %v594_v33 = vrot.slane %v592_v26, 5  ;;  %v1294_v36 = vmul.f32 %v3541_v7, %v1278_v57  ;;  %v1295_v39 = vmul.f32 %v3541_v7, %v1279_v2  ;;  %v3408_v21 = vld [vmem:[%s4343_s1 + $0x180] sm:$0xff] }
  0x5b   : > { %v589_v38 = vor.u32 %v588_v4, %v585_v31  ;;  %v1296_v40 = vmul.f32 %v3541_v7, %v1280_v20  ;;  %v1154_v42 = vunpack.c.l.b16 %v1113_v34  ;;  %v1297_v43 = vmul.f32 %v3541_v7, %v1281_v17  ;;  %v450_v4 = vld [vmem:[%s3536_s12 + $0x24] sm:$0x1] }
  0x5c   : > { %v576_v37 = vrot.slane %v575_v30, 4  ;;  %v1310_v44 = vadd.f32 %v3551_v13, %v1294_v36  ;;  %v814_v46 = vunpack.c.l.bf16 %v798_v32  ;;  %v1311_v49 = vadd.f32 %v3551_v13, %v1295_v39  ;;  %1837 = vmatpush.bf16.msra.mxu1 %v3403_v12  ;;  %v451_v36 = vld [vmem:[%s3536_s12 + $0x28] sm:$0xf] }
  0x5d   : > { %v590_v48 = vrot.slane %v589_v38, 4  ;;  %v1312_v50 = vadd.f32 %v3551_v13, %v1296_v40  ;;  %v1159_v52 = vpack.c.b16 %v1154_v42, %v1153_v35  ;;  %v1313_v53 = vadd.f32 %v3551_v13, %v1297_v43  ;;  %v3409_v13 = vld [vmem:[%s4343_s1 + $0x188] sm:$0xff] }
  0x5e   : > { %v581_v47 = vsel %vm3766_vm5, %v576_v37, %v580_v25  ;;  %v1326_v54 = vmax.f32 %v1310_v44, 0.0  ;;  %v1327_v58 = vmax.f32 %v1311_v49, 0.0  ;;  %v815_v60 = vunpack.c.l.bf16 %v799_v45  ;;  %2030 = vmatpush.bf16.msrb.mxu2 %v3409_v13  ;;  %v3901_v25 = vld [vmem:[%s4344_s2] ss:$0 sm:$0xff]  ;;  %v452_v40 = vld [vmem:[%s3536_s12 + $0x2c] sm:$0x1] }
  0x5f   : > { %v679_v41 = vunpack.c.l.b16 %v581_v47  ;;  %v595_v57 = vsel %vm3766_vm5, %v590_v48, %v594_v33  ;;  %v1328_v59 = vmax.f32 %v1312_v50, 0.0  ;;  %1231 = vmatmul.bf16.gmra.mxu3 %v1159_v52  ;;  %v1329_v62 = vmax.f32 %v1313_v53, 0.0  ;;  %v3911_v33 = vld [vmem:[%s4345_s3] ss:$0 sm:$0xff] }
  0x60   : > { %v680_v61 = vunpack.c.l.b16 %v595_v57  ;;  %v1342_v63 = vpack.c.bf16 %v1326_v54, %v1326_v54  ;;  %v816_v0 = vunpack.c.l.bf16 %v800_v27  ;;  %v1343_v1 = vpack.c.bf16 %v1327_v58, %v1327_v58 }
  0x61   : > { %v1344_v2 = vpack.c.bf16 %v1328_v59, %v1328_v59  ;;  %v817_v3 = vunpack.c.l.bf16 %v801_v55  ;;  %v830_v5 = vmul.f32 %v3541_v7, %v814_v46  ;;  %v1345_v9 = vpack.c.bf16 %v1329_v62, %v1329_v62 }
  0x62   : > { %v686_v8 = vpack.c.b16 %v680_v61, %v679_v41  ;;  %v1383_v10 = vshrl.u32 %v1342_v63, 16  ;;  %v1386_v11 = vshll.u32 %v1342_v63, 16  ;;  %v1392_v15 = vshll.u32 %v1343_v1, 16  ;;  %2031 = vmatpush.bf16.msrb.mxu2 %v3408_v21 }
  0x63   : > { %v1397_v16 = vshrl.u32 %v1344_v2, 16  ;;  %v1400_v19 = vshll.u32 %v1344_v2, 16  ;;  %v831_v20 = vmul.f32 %v3541_v7, %v815_v60  ;;  %v1406_v24 = vshll.u32 %v1345_v9, 16  ;;  %v2979_v2 = vld [vmem:[%s3536_s12 + $0x38] sm:$0xf] }
  0x64   : > { %754 = vmatmul.bf16.gmra.mxu1 %v686_v8  ;;  %v1385_v22 = vrot.slane %v1383_v10, 4  ;;  %v1388_v23 = vrot.slane %v1386_v11, 5  ;;  %v832_v26 = vmul.f32 %v3901_v25, %v816_v0  ;;  %v1394_v7 = vrot.slane %v1392_v15, 5  ;;  %v2980_v9 = vld [vmem:[%s3536_s12 + $0x40] sm:$0xf] }
  0x65   : > { %v1399_v29 = vrot.slane %v1397_v16, 4  ;;  %v1402_v30 = vrot.slane %v1400_v19, 5  ;;  %v833_v31 = vmul.f32 %v3901_v25, %v817_v3  ;;  %v1408_v32 = vrot.slane %v1406_v24, 5  ;;  %v3037_v10 = vld [vmem:[%s3536_s12 + $0x28] sm:$0xf]  ;;  %v3402_v24 = vld [vmem:[%s4343_s1 + $0x150] sm:$0xff] }
  0x66   : > { %v1389_v17 = vor.u32 %v1388_v23, %v1385_v22  ;;  %v846_v34 = vadd.f32 %v3911_v33, %v830_v5  ;;  %v847_v35 = vadd.f32 %v3911_v33, %v831_v20  ;;  %v848_v38 = vadd.f32 %v3911_v33, %v832_v26  ;;  %3440 = vmatpush.bf16.msra.mxu2 %v3808_v51  ;;  %v3038_v16 = vld [vmem:[%s3536_s12 + $0x2c] sm:$0x1]  ;;  %v3418_v23 = vld [vmem:[%s4343_s1 + $0x1d0] sm:$0xff]  ;;  %v3428_v26 = vld [vmem:[%s4343_s1 + $0x220] sm:$0xff] }
  0x67   : > { %v1403_v37 = vor.u32 %v1402_v30, %v1399_v29  ;;  %v849_v39 = vadd.f32 %v3911_v33, %v833_v31  ;;  %v465_v42 = vunpack.c.l.bf16 %v449_v28  ;;  %v466_v46 = vunpack.c.l.bf16 %v450_v4  ;;  %2371 = vmatpush.bf16.msrb.mxu3 %v3418_v23  ;;  %1838 = vmatpush.bf16.msra.mxu1 %v3402_v24  ;;  %v3401_v24 = vld [vmem:[%s4343_s1 + $0x148] sm:$0xff] }
  0x68   : > { %v1390_v43 = vrot.slane %v1389_v17, 4  ;;  %v862_v44 = vmax.f32 %v846_v34, 0.0  ;;  %v863_v45 = vmax.f32 %v847_v35, 0.0  ;;  %v864_v48 = vmax.f32 %v848_v38, 0.0  ;;  %v3417_v34 = vld [vmem:[%s4343_s1 + $0x1c8] sm:$0xff]  ;;  %2647 = vmatpush.bf16.msra.mxu0 %v3428_v26 }
  0x69   : > { %v1404_v47 = vrot.slane %v1403_v37, 4  ;;  %v865_v49 = vmax.f32 %v849_v39, 0.0  ;;  %v467_v50 = vunpack.c.l.bf16 %v451_v36  ;;  %v468_v53 = vunpack.c.l.bf16 %v452_v40 }
  0x6a   : > { %v1395_v27 = vsel %vm3766_vm5, %v1390_v43, %v1394_v7  ;;  %v878_v41 = vpack.c.bf16 %v862_v44, %v862_v44  ;;  %v879_v52 = vpack.c.bf16 %v863_v45, %v863_v45  ;;  %v880_v57 = vpack.c.bf16 %v864_v48, %v864_v48  ;;  %3441 = vmatpush.bf16.msra.mxu2 %v3858_v6 }
  0x6b   : > { %v1409_v54 = vsel %vm3766_vm5, %v1404_v47, %v1408_v32  ;;  %v1493_v55 = vunpack.c.l.b16 %v1395_v27  ;;  %v881_v58 = vpack.c.bf16 %v865_v49, %v865_v49  ;;  %v481_v61 = vmul.f32 %v3901_v25, %v465_v42  ;;  %v3039_v47 = vld [vmem:[%s3536_s12 + $0x30] sm:$0xf]  ;;  %2372 = vmatpush.bf16.msrb.mxu3 %v3417_v34  ;;  %1839 = vmatpush.bf16.msra.mxu1 %v3401_v24  ;;  %v3042_v24 = vld [vmem:[%s3536_s12 + $0x3c] sm:$0x1] }
  0x6c   : > { %v1494_v51 = vunpack.c.l.b16 %v1409_v54  ;;  %v2923_v59 = vrot.slane %v878_v41, 9  ;;  %v927_v60 = vrot.slane %v879_v52, 5  ;;  %v2924_v62 = vrot.slane %v880_v57, 9  ;;  %v3040_v41 = vld [vmem:[%s3536_s12 + $0x34] sm:$0x1] }
  0x6d   : > { %v931_v63 = vrot.slane %v881_v58, 5  ;;  %v482_v0 = vmul.f32 %v3901_v25, %v466_v46  ;;  %v483_v1 = vmul.f32 %v3901_v25, %v467_v50  ;;  %v484_v13 = vmul.f32 %v3901_v25, %v468_v53 }
  0x6e   : > { %v1500_v3 = vpack.c.b16 %v1494_v51, %v1493_v55  ;;  %v928_v5 = vsel %vm3618_vm2, %v2923_v59, %v927_v60  ;;  %v497_v8 = vadd.f32 %v3911_v33, %v481_v61  ;;  %v1082_v22 = vunpack.c.l.bf16 %v2979_v2  ;;  %3442 = vmatpush.bf16.msra.mxu2 %v3892_v14 }
  0x6f   : > { %v932_v6 = vsel %vm3618_vm2, %v2924_v62, %v931_v63  ;;  %v964_v11 = vunpack.c.l.b16 %v928_v5  ;;  %v498_v12 = vadd.f32 %v3911_v33, %v482_v0  ;;  %v499_v15 = vadd.f32 %v3911_v33, %v483_v1  ;;  %v3165_v0 = vld [vmem:[%s3536_s12 + $0x10] sm:$0xf] }
  0x70   : > { %1568 = vmatmul.bf16.gmra.mxu0 %v1500_v3  ;;  %v965_v19 = vunpack.c.l.b16 %v932_v6  ;;  %v500_v20 = vadd.f32 %v3911_v33, %v484_v13  ;;  %v513_v21 = vmax.f32 %v497_v8, 0.0  ;;  %v1083_v29 = vunpack.c.l.bf16 %v2980_v9 }
  0x71   : > { %v514_v28 = vmax.f32 %v498_v12, 0.0  ;;  %v515_v7 = vmax.f32 %v499_v15, 0.0  ;;  %v1282_v30 = vunpack.c.l.bf16 %v3037_v10  ;;  %v1090_v32 = vmul.f32 %v3901_v25, %v1082_v22  ;;  %v3166_v15 = vld [vmem:[%s3536_s12 + $0x18] sm:$0xf] }
  0x72   : > { %v969_v31 = vpack.c.b16 %v965_v19, %v964_v11  ;;  %v516_v4 = vmax.f32 %v500_v20, 0.0  ;;  %v529_v17 = vpack.c.bf16 %v513_v21, %v513_v21  ;;  %v1091_v14 = vmul.f32 %v3901_v25, %v1083_v29  ;;  %3443 = vmatpush.bf16.msra.mxu2 %v3428_v26  ;;  %v453_v19 = vld [vmem:[%s3536_s12 + $0x30] sm:$0xf]  ;;  %v3427_v26 = vld [vmem:[%s4343_s1 + $0x218] sm:$0xff] }
  0x73   : > { %v530_v35 = vpack.c.bf16 %v514_v28, %v514_v28  ;;  %v531_v36 = vpack.c.bf16 %v515_v7, %v515_v7  ;;  %v1283_v37 = vunpack.c.l.bf16 %v3038_v16  ;;  %v1098_v42 = vadd.f32 %v3911_v33, %v1090_v32  ;;  %v3416_v28 = vld [vmem:[%s4343_s1 + $0x1c0] sm:$0xff]  ;;  %2648 = vmatpush.bf16.msra.mxu0 %v3427_v26 }
  0x74   : > { %1045 = vmatmul.bf16.gmra.mxu2 %v969_v31  ;;  %v532_v38 = vpack.c.bf16 %v516_v4, %v516_v4  ;;  %v597_v39 = vshrl.u32 %v529_v17, 16  ;;  %v600_v40 = vshll.u32 %v529_v17, 16  ;;  %v1099_v46 = vadd.f32 %v3911_v33, %v1091_v14  ;;  %v454_v4 = vld [vmem:[%s3536_s12 + $0x34] sm:$0x1]  ;;  %2373 = vmatpush.bf16.msrb.mxu3 %v3416_v28 }
  0x75   : > { %v606_v43 = vshll.u32 %v530_v35, 16  ;;  %v611_v44 = vshrl.u32 %v531_v36, 16  ;;  %v614_v45 = vshll.u32 %v531_v36, 16  ;;  %v1106_v27 = vmax.f32 %v1098_v42, 0.0 }
  0x76   : > { %v599_v48 = vrot.slane %v597_v39, 4  ;;  %v602_v49 = vrot.slane %v600_v40, 5  ;;  %v620_v50 = vshll.u32 %v532_v38, 16  ;;  %v1107_v55 = vmax.f32 %v1099_v46, 0.0  ;;  %3444 = vmatpush.bf16.msra.mxu2 %v3427_v26  ;;  %v3044_v26 = vld [vmem:[%s3536_s12 + $0x44] sm:$0x1] }
  0x77   : > { %v608_v52 = vrot.slane %v606_v43, 5  ;;  %v613_v53 = vrot.slane %v611_v44, 4  ;;  %v616_v54 = vrot.slane %v614_v45, 5  ;;  %v1114_v51 = vpack.c.bf16 %v1106_v27, %v1106_v27 }
  0x78   : > { %v603_v57 = vor.u32 %v602_v49, %v599_v48  ;;  %v622_v58 = vrot.slane %v620_v50, 5  ;;  %v1284_v59 = vunpack.c.l.bf16 %v3039_v47  ;;  %v1115_v61 = vpack.c.bf16 %v1107_v55, %v1107_v55  ;;  %v455_v48 = vld [vmem:[%s3536_s12 + $0x38] sm:$0xf] }
  0x79   : > { %v617_v60 = vor.u32 %v616_v54, %v613_v53  ;;  %v1285_v62 = vunpack.c.l.bf16 %v3040_v41  ;;  %v1298_v63 = vmul.f32 %v3901_v25, %v1282_v30  ;;  %v1155_v2 = vunpack.c.l.b16 %v1114_v51 }
  0x7a   : > { %v604_v1 = vrot.slane %v603_v57, 4  ;;  %v1299_v3 = vmul.f32 %v3901_v25, %v1283_v37  ;;  %v1300_v5 = vmul.f32 %v3901_v25, %v1284_v59  ;;  %v1156_v8 = vunpack.c.l.b16 %v1115_v61 }
  0x7b   : > { %v618_v13 = vrot.slane %v617_v60, 4  ;;  %v1301_v9 = vmul.f32 %v3901_v25, %v1285_v62  ;;  %v1314_v10 = vadd.f32 %v3911_v33, %v1298_v63  ;;  %v1887_v16 = vunpack.c.l.bf16 %v3165_v0 }
  0x7c   : > { %v609_v6 = vsel %vm3766_vm5, %v604_v1, %v608_v52  ;;  %v1315_v11 = vadd.f32 %v3911_v33, %v1299_v3  ;;  %v1316_v12 = vadd.f32 %v3911_v33, %v1300_v5  ;;  %v1160_v22 = vpack.c.b16 %v1156_v8, %v1155_v2  ;;  %v456_v52 = vld [vmem:[%s3536_s12 + $0x3c] sm:$0x1]  ;;  %v3041_v1 = vld [vmem:[%s3536_s12 + $0x38] sm:$0xf] }
  0x7d   : > { %v623_v20 = vsel %vm3766_vm5, %v618_v13, %v622_v58  ;;  %v681_v21 = vunpack.c.l.b16 %v609_v6  ;;  %v1317_v23 = vadd.f32 %v3911_v33, %v1301_v9  ;;  %v1330_v29 = vmax.f32 %v1314_v10, 0.0 }
  0x7e   : > { %v682_v7 = vunpack.c.l.b16 %v623_v20  ;;  %v1331_v30 = vmax.f32 %v1315_v11, 0.0  ;;  %v1332_v31 = vmax.f32 %v1316_v12, 0.0  ;;  %1236 = vmatmul.bf16.gmra.mxu3 %v1160_v22  ;;  %v1888_v32 = vunpack.c.l.bf16 %v3166_v15 }
  0x7f   : > { %v1333_v17 = vmax.f32 %v1317_v23, 0.0  ;;  %v1895_v34 = vmul.f32 %v3901_v25, %v1887_v16  ;;  %v469_v35 = vunpack.c.l.bf16 %v453_v19  ;;  %v1346_v14 = vpack.c.bf16 %v1330_v29, %v1330_v29  ;;  %v3043_v16 = vld [vmem:[%s3536_s12 + $0x40] sm:$0xf] }
  0x80   : > { %v687_v36 = vpack.c.b16 %v682_v7, %v681_v21  ;;  %v1347_v37 = vpack.c.bf16 %v1331_v30, %v1331_v30  ;;  %v1348_v38 = vpack.c.bf16 %v1332_v31, %v1332_v31  ;;  %v1896_v40 = vmul.f32 %v3901_v25, %v1888_v32 }
  0x81   : > { %v1349_v39 = vpack.c.bf16 %v1333_v17, %v1333_v17  ;;  %v1903_v42 = vadd.f32 %v3911_v33, %v1895_v34  ;;  %v470_v43 = vunpack.c.l.bf16 %v454_v4  ;;  %v1411_v44 = vshrl.u32 %v1346_v14, 16 }
  0x82   : > { %759 = vmatmul.bf16.gmra.mxu1 %v687_v36  ;;  %v1414_v45 = vshll.u32 %v1346_v14, 16  ;;  %v1420_v46 = vshll.u32 %v1347_v37, 16  ;;  %v1425_v47 = vshrl.u32 %v1348_v38, 16  ;;  %v1428_v49 = vshll.u32 %v1348_v38, 16 }
  0x83   : > { %v1434_v50 = vshll.u32 %v1349_v39, 16  ;;  %v1904_v27 = vadd.f32 %v3911_v33, %v1896_v40  ;;  %v1911_v41 = vmax.f32 %v1903_v42, 0.0  ;;  %v1413_v53 = vrot.slane %v1411_v44, 4 }
  0x84   : > { %v1416_v54 = vrot.slane %v1414_v45, 5  ;;  %v1422_v55 = vrot.slane %v1420_v46, 5  ;;  %v1427_v57 = vrot.slane %v1425_v47, 4  ;;  %v1430_v58 = vrot.slane %v1428_v49, 5 }
  0x85   : > { %v1436_v51 = vrot.slane %v1434_v50, 5  ;;  %v1912_v59 = vmax.f32 %v1904_v27, 0.0  ;;  %v1919_v60 = vpack.c.bf16 %v1911_v41, %v1911_v41  ;;  %v471_v62 = vunpack.c.l.bf16 %v455_v48  ;;  %v3221_v50 = vld [vmem:[%s3536_s12 + $0x10] sm:$0xf] }
  0x86   : > { %v1417_v61 = vor.u32 %v1416_v54, %v1413_v53  ;;  %v472_v63 = vunpack.c.l.bf16 %v456_v52  ;;  %v485_v0 = vmul.f32 %v3901_v25, %v469_v35  ;;  %v1431_v2 = vor.u32 %v1430_v58, %v1427_v57  ;;  %v3222_v54 = vld [vmem:[%s3536_s12 + $0x14] sm:$0x1] }
  0x87   : > { %v1920_v3 = vpack.c.bf16 %v1912_v59, %v1912_v59  ;;  %v1960_v5 = vunpack.c.l.b16 %v1919_v60  ;;  %v486_v13 = vmul.f32 %v3901_v25, %v470_v43  ;;  %v487_v9 = vmul.f32 %v3901_v25, %v471_v62  ;;  %v3426_v57 = vld [vmem:[%s4343_s1 + $0x210] sm:$0xff] }
  0x88   : > { %v1418_v8 = vrot.slane %v1417_v61, 4  ;;  %v488_v10 = vmul.f32 %v3901_v25, %v472_v63  ;;  %v501_v6 = vadd.f32 %v3911_v33, %v485_v0  ;;  %v1432_v11 = vrot.slane %v1431_v2, 4  ;;  %v3224_v2 = vld [vmem:[%s3536_s12 + $0x1c] sm:$0x1]  ;;  %2649 = vmatpush.bf16.msra.mxu0 %v3426_v57  ;;  %3445 = vmatpush.bf16.msra.mxu2 %v3426_v57 }
  0x89   : > { %v1961_v12 = vunpack.c.l.b16 %v1920_v3  ;;  %v502_v15 = vadd.f32 %v3911_v33, %v486_v13  ;;  %v1286_v19 = vunpack.c.l.bf16 %v3041_v1  ;;  %v503_v21 = vadd.f32 %v3911_v33, %v487_v9  ;;  %v3223_v1 = vld [vmem:[%s3536_s12 + $0x18] sm:$0xf]  ;;  %v3425_v9 = vld [vmem:[%s4343_s1 + $0x208] sm:$0xff] }
  0x8a   : > { %v1423_v20 = vsel %vm3766_vm5, %v1418_v8, %v1422_v55  ;;  %v504_v22 = vadd.f32 %v3911_v33, %v488_v10  ;;  %v517_v23 = vmax.f32 %v501_v6, 0.0  ;;  %v1437_v28 = vsel %vm3766_vm5, %v1432_v11, %v1436_v51  ;;  %v3400_v55 = vld [vmem:[%s4343_s1 + $0x140] sm:$0xff] }
  0x8b   : > { %v1495_v7 = vunpack.c.l.b16 %v1423_v20  ;;  %v1968_v29 = vpack.c.b16 %v1961_v12, %v1960_v5  ;;  %v518_v30 = vmax.f32 %v502_v15, 0.0  ;;  %v1496_v31 = vunpack.c.l.b16 %v1437_v28  ;;  %1840 = vmatpush.bf16.msra.mxu1 %v3400_v55 }
  0x8c   : > { %v519_v4 = vmax.f32 %v503_v21, 0.0  ;;  %v520_v17 = vmax.f32 %v504_v22, 0.0  ;;  %v533_v32 = vpack.c.bf16 %v517_v23, %v517_v23  ;;  %v1287_v35 = vunpack.c.l.bf16 %v3042_v24  ;;  %2650 = vmatpush.bf16.msra.mxu0 %v3425_v9  ;;  %3446 = vmatpush.bf16.msra.mxu2 %v3425_v9 }
  0x8d   : > { %2032 = vmatmul.bf16.vlgmr.msrb.gmra.mxu2 %v1968_v29  ;;  %v534_v34 = vpack.c.bf16 %v518_v30, %v518_v30  ;;  %v1288_v36 = vunpack.c.l.bf16 %v3043_v16  ;;  %v1289_v14 = vunpack.c.l.bf16 %v3044_v26  ;;  %v1501_v37 = vpack.c.b16 %v1496_v31, %v1495_v7 }
  0x8e   : > { %v535_v38 = vpack.c.bf16 %v519_v4, %v519_v4  ;;  %v536_v39 = vpack.c.bf16 %v520_v17, %v520_v17  ;;  %v625_v40 = vshrl.u32 %v533_v32, 16  ;;  %v628_v42 = vshll.u32 %v533_v32, 16 }
  0x8f   : > { %v634_v43 = vshll.u32 %v534_v34, 16  ;;  %v1302_v44 = vmul.f32 %v3901_v25, %v1286_v19  ;;  %v1303_v45 = vmul.f32 %v3901_v25, %v1287_v35  ;;  %1573 = vmatmul.bf16.gmra.mxu0 %v1501_v37  ;;  %v1304_v52 = vmul.f32 %v3901_v25, %v1288_v36  ;;  %v3424_v37 = vld [vmem:[%s4343_s1 + $0x200] sm:$0xff] }
  0x90   : > { %v627_v46 = vrot.slane %v625_v40, 4  ;;  %v639_v47 = vshrl.u32 %v535_v38, 16  ;;  %v642_v48 = vshll.u32 %v535_v38, 16  ;;  %v648_v49 = vshll.u32 %v536_v39, 16  ;;  %2651 = vmatpush.bf16.msra.mxu0 %v3424_v37  ;;  %3447 = vmatpush.bf16.msra.mxu2 %v3424_v37 }
  0x91   : > { %v630_v27 = vrot.slane %v628_v42, 5  ;;  %v636_v41 = vrot.slane %v634_v43, 5  ;;  %v1305_v53 = vmul.f32 %v3901_v25, %v1289_v14  ;;  %v1318_v60 = vadd.f32 %v3911_v33, %v1302_v44  ;;  %v3167_v14 = vld [vmem:[%s3536_s12 + $0x20] sm:$0xf]  ;;  %v3168_v43 = vld [vmem:[%s3536_s12 + $0x28] sm:$0xf] }
  0x92   : > { %v641_v58 = vrot.slane %v639_v47, 4  ;;  %v644_v51 = vrot.slane %v642_v48, 5  ;;  %v650_v59 = vrot.slane %v648_v49, 5  ;;  %v1319_v62 = vadd.f32 %v3911_v33, %v1303_v45 }
  0x93   : > { %v631_v61 = vor.u32 %v630_v27, %v627_v46  ;;  %v1320_v63 = vadd.f32 %v3911_v33, %v1304_v52  ;;  %v1321_v0 = vadd.f32 %v3911_v33, %v1305_v53  ;;  %v1334_v5 = vmax.f32 %v1318_v60, 0.0 }
  0x94   : > { %v645_v3 = vor.u32 %v644_v51, %v641_v58  ;;  %v2085_v13 = vunpack.c.l.bf16 %v3221_v50  ;;  %v2086_v8 = vunpack.c.l.bf16 %v3222_v54  ;;  %v1335_v6 = vmax.f32 %v1319_v62, 0.0 }
  0x95   : > { %v632_v10 = vrot.slane %v631_v61, 4  ;;  %v1336_v11 = vmax.f32 %v1320_v63, 0.0  ;;  %v1337_v12 = vmax.f32 %v1321_v0, 0.0  ;;  %v1350_v16 = vpack.c.bf16 %v1334_v5, %v1334_v5 }
  0x96   : > { %v646_v15 = vrot.slane %v645_v3, 4  ;;  %v2087_v19 = vunpack.c.l.bf16 %v3223_v1  ;;  %v2088_v20 = vunpack.c.l.bf16 %v3224_v2  ;;  %v1351_v22 = vpack.c.bf16 %v1335_v6, %v1335_v6 }
  0x97   : > { %v637_v21 = vsel %vm3766_vm5, %v632_v10, %v636_v41  ;;  %v1352_v23 = vpack.c.bf16 %v1336_v11, %v1336_v11  ;;  %v1353_v24 = vpack.c.bf16 %v1337_v12, %v1337_v12  ;;  %v1439_v7 = vshrl.u32 %v1350_v16, 16  ;;  %v3093_v12 = vld [vmem:[%s3536_s12 + $0x8] sm:$0xe] }
  0x98   : > { %v651_v26 = vsel %vm3766_vm5, %v646_v15, %v650_v59  ;;  %v683_v28 = vunpack.c.l.b16 %v637_v21  ;;  %v1442_v29 = vshll.u32 %v1350_v16, 16  ;;  %v1448_v31 = vshll.u32 %v1351_v22, 16  ;;  %v3094_v21 = vld [vmem:[%s3536_s12 + $0xc] sm:$0x1] }
  0x99   : > { %v684_v30 = vunpack.c.l.b16 %v651_v26  ;;  %v1453_v4 = vshrl.u32 %v1352_v23, 16  ;;  %v1456_v17 = vshll.u32 %v1352_v23, 16  ;;  %v1441_v32 = vrot.slane %v1439_v7, 4 }
  0x9a   : > { %v1444_v34 = vrot.slane %v1442_v29, 5  ;;  %v1462_v35 = vshll.u32 %v1353_v24, 16  ;;  %v2101_v36 = vmul.f32 %v3901_v25, %v2085_v13  ;;  %v1450_v39 = vrot.slane %v1448_v31, 5 }
  0x9b   : > { %v688_v38 = vpack.c.b16 %v684_v30, %v683_v28  ;;  %v1455_v40 = vrot.slane %v1453_v4, 4  ;;  %v1458_v42 = vrot.slane %v1456_v17, 5  ;;  %v2102_v46 = vmul.f32 %v3901_v25, %v2086_v8  ;;  %v3095_v28 = vld [vmem:[%s3536_s12 + $0x10] sm:$0xe]  ;;  %v3096_v4 = vld [vmem:[%s3536_s12 + $0x14] sm:$0x1] }
  0x9c   : > { %v1445_v44 = vor.u32 %v1444_v34, %v1441_v32  ;;  %v1464_v45 = vrot.slane %v1462_v35, 5  ;;  %v2103_v47 = vmul.f32 %v3901_v25, %v2087_v19  ;;  %v2104_v49 = vmul.f32 %v3901_v25, %v2088_v20 }
  0x9d   : > { %764 = vmatmul.bf16.gmra.mxu1 %v688_v38  ;;  %v1459_v48 = vor.u32 %v1458_v42, %v1455_v40  ;;  %v2117_v50 = vadd.f32 %v3911_v33, %v2101_v36  ;;  %v1889_v27 = vunpack.c.l.bf16 %v3167_v14  ;;  %v2118_v52 = vadd.f32 %v3911_v33, %v2102_v46 }
  0x9e   : > { %v1446_v41 = vrot.slane %v1445_v44, 4  ;;  %v2119_v53 = vadd.f32 %v3911_v33, %v2103_v47  ;;  %v1890_v54 = vunpack.c.l.bf16 %v3168_v43  ;;  %v2120_v57 = vadd.f32 %v3911_v33, %v2104_v49 }
  0x9f   : > { %v1460_v55 = vrot.slane %v1459_v48, 4  ;;  %v2133_v58 = vmax.f32 %v2117_v50, 0.0  ;;  %v1897_v51 = vmul.f32 %v3901_v25, %v1889_v27  ;;  %v2134_v60 = vmax.f32 %v2118_v52, 0.0  ;;  %v3227_v52 = vld [vmem:[%s3536_s12 + $0x28] sm:$0xf] }
  0xa0   : > { %v1451_v59 = vsel %vm3766_vm5, %v1446_v41, %v1450_v39  ;;  %v2135_v61 = vmax.f32 %v2119_v53, 0.0  ;;  %v1898_v62 = vmul.f32 %v3901_v25, %v1890_v54  ;;  %v2136_v1 = vmax.f32 %v2120_v57, 0.0  ;;  %v3225_v39 = vld [vmem:[%s3536_s12 + $0x20] sm:$0xf]  ;;  %v3226_v41 = vld [vmem:[%s3536_s12 + $0x24] sm:$0x1] }
  0xa1   : > { %v1465_v63 = vsel %vm3766_vm5, %v1460_v55, %v1464_v45  ;;  %v1497_v0 = vunpack.c.l.b16 %v1451_v59  ;;  %v2149_v2 = vpack.c.bf16 %v2133_v58, %v2133_v58  ;;  %v2150_v5 = vpack.c.bf16 %v2134_v60, %v2134_v60  ;;  %v3228_v53 = vld [vmem:[%s3536_s12 + $0x2c] sm:$0x1] }
  0xa2   : > { %v1498_v3 = vunpack.c.l.b16 %v1465_v63  ;;  %v2151_v13 = vpack.c.bf16 %v2135_v61, %v2135_v61  ;;  %v1905_v8 = vadd.f32 %v3911_v33, %v1897_v51  ;;  %v2152_v9 = vpack.c.bf16 %v2136_v1, %v2136_v1 }
  0xa3   : > { %v2166_v10 = vshrl.u32 %v2149_v2, 16  ;;  %v2169_v6 = vshll.u32 %v2149_v2, 16  ;;  %v1906_v11 = vadd.f32 %v3911_v33, %v1898_v62  ;;  %v2175_v16 = vshll.u32 %v2150_v5, 16 }
  0xa4   : > { %v1502_v15 = vpack.c.b16 %v1498_v3, %v1497_v0  ;;  %v2180_v19 = vshrl.u32 %v2151_v13, 16  ;;  %v2183_v20 = vshll.u32 %v2151_v13, 16  ;;  %v2189_v24 = vshll.u32 %v2152_v9, 16 }
  0xa5   : > { %v2168_v22 = vrot.slane %v2166_v10, 4  ;;  %v2171_v23 = vrot.slane %v2169_v6, 5  ;;  %v1913_v26 = vmax.f32 %v1905_v8, 0.0  ;;  %v2177_v7 = vrot.slane %v2175_v16, 5 }
  0xa6   : > { %1578 = vmatmul.bf16.gmra.mxu0 %v1502_v15  ;;  %v2182_v29 = vrot.slane %v2180_v19, 4  ;;  %v2185_v30 = vrot.slane %v2183_v20, 5  ;;  %v1914_v31 = vmax.f32 %v1906_v11, 0.0  ;;  %v2191_v32 = vrot.slane %v2189_v24, 5 }
  0xa7   : > { %v2172_v17 = vor.u32 %v2171_v23, %v2168_v22  ;;  %v1921_v34 = vpack.c.bf16 %v1913_v26, %v1913_v26  ;;  %v1616_v35 = vunpack.c.l.bf16 %v3093_v12  ;;  %v1617_v37 = vunpack.c.l.bf16 %v3094_v21  ;;  %v3285_v12 = vld [vmem:[%s3536_s12 + $0x10] sm:$0xe]  ;;  %v3286_v26 = vld [vmem:[%s3536_s12 + $0x14] sm:$0x1] }
  0xa8   : > { %v2186_v36 = vor.u32 %v2185_v30, %v2182_v29  ;;  %v1922_v14 = vpack.c.bf16 %v1914_v31, %v1914_v31  ;;  %v1618_v38 = vunpack.c.l.bf16 %v3095_v28  ;;  %v1619_v43 = vunpack.c.l.bf16 %v3096_v4  ;;  %v3287_v30 = vld [vmem:[%s3536_s12 + $0x18] sm:$0xe] }
  0xa9   : > { %v2173_v40 = vrot.slane %v2172_v17, 4  ;;  %v1962_v42 = vunpack.c.l.b16 %v1921_v34  ;;  %v1632_v44 = vmul.f32 %v3901_v25, %v1616_v35  ;;  %v1633_v47 = vmul.f32 %v3901_v25, %v1617_v37  ;;  %v3288_v35 = vld [vmem:[%s3536_s12 + $0x1c] sm:$0x1] }
  0xaa   : > { %v2187_v45 = vrot.slane %v2186_v36, 4  ;;  %v1963_v46 = vunpack.c.l.b16 %v1922_v14  ;;  %v1634_v48 = vmul.f32 %v3901_v25, %v1618_v38  ;;  %v1635_v50 = vmul.f32 %v3901_v25, %v1619_v43 }
  0xab   : > { %v2178_v49 = vsel %vm3766_vm5, %v2173_v40, %v2177_v7  ;;  %v1648_v27 = vadd.f32 %v3911_v33, %v1632_v44  ;;  %v2089_v54 = vunpack.c.l.bf16 %v3225_v39  ;;  %v1649_v51 = vadd.f32 %v3911_v33, %v1633_v47 }
  0xac   : > { %v2192_v55 = vsel %vm3766_vm5, %v2187_v45, %v2191_v32  ;;  %v2302_v57 = vunpack.c.l.b16 %v2178_v49  ;;  %v1969_v58 = vpack.c.b16 %v1963_v46, %v1962_v42  ;;  %v1650_v60 = vadd.f32 %v3911_v33, %v1634_v48 }
  0xad   : > { %v2303_v59 = vunpack.c.l.b16 %v2192_v55  ;;  %v1651_v61 = vadd.f32 %v3911_v33, %v1635_v50  ;;  %v1664_v62 = vmax.f32 %v1648_v27, 0.0  ;;  %v1665_v63 = vmax.f32 %v1649_v51, 0.0  ;;  %v3169_v55 = vld [vmem:[%s3536_s12 + $0x30] sm:$0xf] }
  0xae   : > { %2037 = vmatmul.bf16.gmra.mxu2 %v1969_v58  ;;  %v2090_v0 = vunpack.c.l.bf16 %v3226_v41  ;;  %v2091_v1 = vunpack.c.l.bf16 %v3227_v52  ;;  %v2092_v2 = vunpack.c.l.bf16 %v3228_v53  ;;  %v1666_v5 = vmax.f32 %v1650_v60, 0.0  ;;  %v3170_v60 = vld [vmem:[%s3536_s12 + $0x38] sm:$0xf] }
  0xaf   : > { %v2310_v3 = vpack.c.b16 %v2303_v59, %v2302_v57  ;;  %v1667_v13 = vmax.f32 %v1651_v61, 0.0  ;;  %v1680_v8 = vpack.c.bf16 %v1664_v62, %v1664_v62  ;;  %v1681_v9 = vpack.c.bf16 %v1665_v63, %v1665_v63 }
  0xb0   : > { %v2105_v10 = vmul.f32 %v3901_v25, %v2089_v54  ;;  %v2106_v6 = vmul.f32 %v3901_v25, %v2090_v0  ;;  %v2107_v11 = vmul.f32 %v3901_v25, %v2091_v1  ;;  %v1682_v15 = vpack.c.bf16 %v1666_v5, %v1666_v5 }
  0xb1   : > { %2374 = vmatmul.bf16.vlgmr.msrb.gmra.mxu3 %v2310_v3  ;;  %v1683_v16 = vpack.c.bf16 %v1667_v13, %v1667_v13  ;;  %v3109_v19 = vrot.slane %v1680_v8, 9  ;;  %v2108_v20 = vmul.f32 %v3901_v25, %v2092_v2  ;;  %v1714_v21 = vrot.slane %v1681_v9, 5 }
  0xb2   : > { %v2121_v22 = vadd.f32 %v3911_v33, %v2105_v10  ;;  %v2122_v23 = vadd.f32 %v3911_v33, %v2106_v6  ;;  %v2123_v24 = vadd.f32 %v3911_v33, %v2107_v11  ;;  %v3110_v28 = vrot.slane %v1682_v15, 9 }
  0xb3   : > { %v1718_v7 = vrot.slane %v1683_v16, 5  ;;  %v2124_v29 = vadd.f32 %v3911_v33, %v2108_v20  ;;  %v2427_v31 = vunpack.c.l.bf16 %v3285_v12  ;;  %v1715_v4 = vsel %vm3618_vm2, %v3109_v19, %v1714_v21 }
  0xb4   : > { %v2137_v17 = vmax.f32 %v2121_v22, 0.0  ;;  %v2138_v32 = vmax.f32 %v2122_v23, 0.0  ;;  %v2139_v34 = vmax.f32 %v2123_v24, 0.0  ;;  %v1769_v14 = vunpack.c.l.b16 %v1715_v4  ;;  %v3098_v4 = vld [vmem:[%s3536_s12 + $0x1c] sm:$0x1] }
  0xb5   : > { %v1719_v36 = vsel %vm3618_vm2, %v3110_v28, %v1718_v7  ;;  %v2140_v37 = vmax.f32 %v2124_v29, 0.0  ;;  %v2428_v38 = vunpack.c.l.bf16 %v3286_v26  ;;  %v2429_v45 = vunpack.c.l.bf16 %v3287_v30  ;;  %v3097_v28 = vld [vmem:[%s3536_s12 + $0x18] sm:$0xe] }
  0xb6   : > { %v1770_v39 = vunpack.c.l.b16 %v1719_v36  ;;  %v2153_v40 = vpack.c.bf16 %v2137_v17, %v2137_v17  ;;  %v2154_v42 = vpack.c.bf16 %v2138_v32, %v2138_v32  ;;  %v2155_v43 = vpack.c.bf16 %v2139_v34, %v2139_v34  ;;  %v3099_v17 = vld [vmem:[%s3536_s12 + $0x20] sm:$0xe] }
  0xb7   : > { %v2156_v44 = vpack.c.bf16 %v2140_v37, %v2140_v37  ;;  %v2430_v46 = vunpack.c.l.bf16 %v3288_v35  ;;  %v2443_v47 = vmul.f32 %v3901_v25, %v2427_v31  ;;  %v2444_v54 = vmul.f32 %v3901_v25, %v2428_v38 }
  0xb8   : > { %v1777_v48 = vpack.c.b16 %v1770_v39, %v1769_v14  ;;  %v2194_v49 = vshrl.u32 %v2153_v40, 16  ;;  %v2197_v50 = vshll.u32 %v2153_v40, 16  ;;  %v2203_v27 = vshll.u32 %v2154_v42, 16  ;;  %v3100_v39 = vld [vmem:[%s3536_s12 + $0x24] sm:$0x1] }
  0xb9   : > { %v2208_v41 = vshrl.u32 %v2155_v43, 16  ;;  %v2211_v52 = vshll.u32 %v2155_v43, 16  ;;  %v2217_v53 = vshll.u32 %v2156_v44, 16  ;;  %v2445_v59 = vmul.f32 %v3901_v25, %v2429_v45 }
  0xba   : > { %1841 = vmatmul.bf16.vlgmr.msra.gmra.mxu1 %v1777_v48  ;;  %v2196_v57 = vrot.slane %v2194_v49, 4  ;;  %v2199_v58 = vrot.slane %v2197_v50, 5  ;;  %v2205_v51 = vrot.slane %v2203_v27, 5  ;;  %v2446_v0 = vmul.f32 %v3901_v25, %v2430_v46  ;;  %v3229_v46 = vld [vmem:[%s3536_s12 + $0x30] sm:$0xf] }
  0xbb   : > { %v2210_v61 = vrot.slane %v2208_v41, 4  ;;  %v2213_v62 = vrot.slane %v2211_v52, 5  ;;  %v2219_v63 = vrot.slane %v2217_v53, 5  ;;  %v2459_v2 = vadd.f32 %v3911_v33, %v2443_v47 }
  0xbc   : > { %v2200_v1 = vor.u32 %v2199_v58, %v2196_v57  ;;  %v2460_v3 = vadd.f32 %v3911_v33, %v2444_v54  ;;  %v2461_v5 = vadd.f32 %v3911_v33, %v2445_v59  ;;  %v2462_v8 = vadd.f32 %v3911_v33, %v2446_v0  ;;  %v3230_v54 = vld [vmem:[%s3536_s12 + $0x34] sm:$0x1]  ;;  %v3232_v59 = vld [vmem:[%s3536_s12 + $0x3c] sm:$0x1] }
  0xbd   : > { %v2214_v13 = vor.u32 %v2213_v62, %v2210_v61  ;;  %v1891_v9 = vunpack.c.l.bf16 %v3169_v55  ;;  %v1892_v10 = vunpack.c.l.bf16 %v3170_v60  ;;  %v2475_v11 = vmax.f32 %v2459_v2, 0.0  ;;  %v3231_v55 = vld [vmem:[%s3536_s12 + $0x38] sm:$0xf] }
  0xbe   : > { %v2201_v6 = vrot.slane %v2200_v1, 4  ;;  %v2476_v12 = vmax.f32 %v2460_v3, 0.0  ;;  %v2477_v15 = vmax.f32 %v2461_v5, 0.0  ;;  %v2478_v19 = vmax.f32 %v2462_v8, 0.0 }
  0xbf   : > { %v2215_v16 = vrot.slane %v2214_v13, 4  ;;  %v1899_v20 = vmul.f32 %v3901_v25, %v1891_v9  ;;  %v1900_v21 = vmul.f32 %v3901_v25, %v1892_v10  ;;  %v2491_v23 = vpack.c.bf16 %v2475_v11, %v2475_v11 }
  0xc0   : > { %v2206_v22 = vsel %vm3766_vm5, %v2201_v6, %v2205_v51  ;;  %v2492_v24 = vpack.c.bf16 %v2476_v12, %v2476_v12  ;;  %v2493_v26 = vpack.c.bf16 %v2477_v15, %v2477_v15  ;;  %v2494_v30 = vpack.c.bf16 %v2478_v19, %v2478_v19 }
  0xc1   : > { %v2220_v7 = vsel %vm3766_vm5, %v2215_v16, %v2219_v63  ;;  %v2304_v29 = vunpack.c.l.b16 %v2206_v22  ;;  %v1907_v31 = vadd.f32 %v3911_v33, %v1899_v20  ;;  %v3301_v34 = vrot.slane %v2491_v23, 9  ;;  %v4133_v23 = vld [vmem:[%s4344_s2] ss:$0 sm:$0xff] }
  0xc2   : > { %v2305_v32 = vunpack.c.l.b16 %v2220_v7  ;;  %v2525_v35 = vrot.slane %v2492_v24, 5  ;;  %v3302_v36 = vrot.slane %v2493_v26, 9  ;;  %v2529_v14 = vrot.slane %v2494_v30, 5  ;;  %v3289_v7 = vld [vmem:[%s3536_s12 + $0x20] sm:$0xe] }
  0xc3   : > { %v1908_v37 = vadd.f32 %v3911_v33, %v1900_v21  ;;  %v1915_v38 = vmax.f32 %v1907_v31, 0.0  ;;  %v1620_v40 = vunpack.c.l.bf16 %v3097_v28  ;;  %v1621_v44 = vunpack.c.l.bf16 %v3098_v4  ;;  %v3290_v4 = vld [vmem:[%s3536_s12 + $0x24] sm:$0x1] }
  0xc4   : > { %v2311_v42 = vpack.c.b16 %v2305_v32, %v2304_v29  ;;  %v2526_v43 = vsel %vm3618_vm2, %v3301_v34, %v2525_v35  ;;  %v1622_v45 = vunpack.c.l.bf16 %v3099_v17  ;;  %v2530_v47 = vsel %vm3618_vm2, %v3302_v36, %v2529_v14  ;;  %v4144_v32 = vld [vmem:[%s4345_s3] ss:$0 sm:$0xff]  ;;  %v3291_v14 = vld [vmem:[%s3536_s12 + $0x28] sm:$0xe] }
  0xc5   : > { %v2580_v48 = vunpack.c.l.b16 %v2526_v43  ;;  %v1916_v49 = vmax.f32 %v1908_v37, 0.0  ;;  %v1923_v50 = vpack.c.bf16 %v1915_v38, %v1915_v38  ;;  %v2581_v27 = vunpack.c.l.b16 %v2530_v47 }
  0xc6   : > { %2379 = vmatmul.bf16.gmra.mxu3 %v2311_v42  ;;  %v1623_v41 = vunpack.c.l.bf16 %v3100_v39  ;;  %v1636_v52 = vmul.f32 %v3901_v25, %v1620_v40  ;;  %v1637_v53 = vmul.f32 %v3901_v25, %v1621_v44  ;;  %v1638_v51 = vmul.f32 %v3901_v25, %v1622_v45  ;;  %v3292_v45 = vld [vmem:[%s3536_s12 + $0x2c] sm:$0x1] }
  0xc7   : > { %v1924_v57 = vpack.c.bf16 %v1916_v49, %v1916_v49  ;;  %v1964_v58 = vunpack.c.l.b16 %v1923_v50  ;;  %v2093_v60 = vunpack.c.l.bf16 %v3229_v46  ;;  %v2588_v61 = vpack.c.b16 %v2581_v27, %v2580_v48 }
  0xc8   : > { %v1639_v62 = vmul.f32 %v3901_v25, %v1623_v41  ;;  %v1652_v63 = vadd.f32 %v3911_v33, %v1636_v52  ;;  %v1653_v0 = vadd.f32 %v3911_v33, %v1637_v53  ;;  %v1654_v2 = vadd.f32 %v3911_v33, %v1638_v51 }
  0xc9   : > { %v1965_v1 = vunpack.c.l.b16 %v1924_v57  ;;  %v2094_v3 = vunpack.c.l.bf16 %v3230_v54  ;;  %v2095_v5 = vunpack.c.l.bf16 %v3231_v55  ;;  %2652 = vmatmul.bf16.vlgmr.msra.gmra.mxu0 %v2588_v61  ;;  %v2096_v10 = vunpack.c.l.bf16 %v3232_v59  ;;  %v3171_v61 = vld [vmem:[%s3536_s12 + $0x40] sm:$0xf] }
  0xca   : > { %v1655_v13 = vadd.f32 %v3911_v33, %v1639_v62  ;;  %v1668_v8 = vmax.f32 %v1652_v63, 0.0  ;;  %v1669_v9 = vmax.f32 %v1653_v0, 0.0  ;;  %v1670_v11 = vmax.f32 %v1654_v2, 0.0  ;;  %v3172_v2 = vld [vmem:[%s3536_s12 + $0x48] sm:$0xf] }
  0xcb   : > { %v1970_v6 = vpack.c.b16 %v1965_v1, %v1964_v58  ;;  %v2109_v12 = vmul.f32 %v3901_v25, %v2093_v60  ;;  %v2110_v15 = vmul.f32 %v3901_v25, %v2094_v3  ;;  %v2111_v21 = vmul.f32 %v3901_v25, %v2095_v5 }
  0xcc   : > { %v1671_v16 = vmax.f32 %v1655_v13, 0.0  ;;  %v1684_v19 = vpack.c.bf16 %v1668_v8, %v1668_v8  ;;  %v1685_v20 = vpack.c.bf16 %v1669_v9, %v1669_v9  ;;  %v1686_v22 = vpack.c.bf16 %v1670_v11, %v1670_v11  ;;  %v4158_v9 = vpop.f32.mrf.mxu1 }
  0xcd   : > { %2042 = vmatmul.bf16.gmra.mxu2 %v1970_v6  ;;  %v2112_v24 = vmul.f32 %v4133_v23, %v2096_v10  ;;  %v2125_v26 = vadd.f32 %v3911_v33, %v2109_v12  ;;  %v2126_v28 = vadd.f32 %v3911_v33, %v2110_v15  ;;  %v2127_v25 = vadd.f32 %v3911_v33, %v2111_v21 }
  0xce   : > { %v1687_v29 = vpack.c.bf16 %v1671_v16, %v1671_v16  ;;  %v3111_v30 = vrot.slane %v1684_v19, 9  ;;  %v1722_v31 = vrot.slane %v1685_v20, 5  ;;  %v3112_v17 = vrot.slane %v1686_v22, 9 }
  0xcf   : > { %v2128_v34 = vadd.f32 %v4144_v32, %v2112_v24  ;;  %v2141_v35 = vmax.f32 %v2125_v26, 0.0  ;;  %v2142_v36 = vmax.f32 %v2126_v28, 0.0  ;;  %v2143_v39 = vmax.f32 %v2127_v25, 0.0 }
  0xd0   : > { %v1723_v37 = vsel %vm3618_vm2, %v3111_v30, %v1722_v31  ;;  %v1726_v38 = vrot.slane %v1687_v29, 5  ;;  %v2431_v40 = vunpack.c.l.bf16 %v3289_v7  ;;  %v2432_v48 = vunpack.c.l.bf16 %v3290_v4  ;;  %v3101_v31 = vld [vmem:[%s3536_s12 + $0x28] sm:$0xe] }
  0xd1   : > { %v1771_v33 = vunpack.c.l.b16 %v1723_v37  ;;  %v2144_v42 = vmax.f32 %v2128_v34, 0.0  ;;  %v2157_v43 = vpack.c.bf16 %v2141_v35, %v2141_v35  ;;  %v2158_v44 = vpack.c.bf16 %v2142_v36, %v2142_v36 }
  0xd2   : > { %v1727_v46 = vsel %vm3618_vm2, %v3112_v17, %v1726_v38  ;;  %v2159_v47 = vpack.c.bf16 %v2143_v39, %v2143_v39  ;;  %v2433_v49 = vunpack.c.l.bf16 %v3291_v14  ;;  %v2434_v57 = vunpack.c.l.bf16 %v3292_v45  ;;  %v3102_v38 = vld [vmem:[%s3536_s12 + $0x2c] sm:$0x1]  ;;  %v3103_v39 = vld [vmem:[%s3536_s12 + $0x30] sm:$0xe] }
  0xd3   : > { %v1772_v50 = vunpack.c.l.b16 %v1727_v46  ;;  %v2160_v27 = vpack.c.bf16 %v2144_v42, %v2144_v42  ;;  %v2222_v41 = vshrl.u32 %v2157_v43, 16  ;;  %v2225_v52 = vshll.u32 %v2157_v43, 16  ;;  %v3104_v43 = vld [vmem:[%s3536_s12 + $0x34] sm:$0x1] }
  0xd4   : > { %v2231_v53 = vshll.u32 %v2158_v44, 16  ;;  %v2236_v54 = vshrl.u32 %v2159_v47, 16  ;;  %v2239_v55 = vshll.u32 %v2159_v47, 16  ;;  %v2447_v1 = vmul.f32 %v4133_v23, %v2431_v40 }
  0xd5   : > { %v1778_v58 = vpack.c.b16 %v1772_v50, %v1771_v33  ;;  %v2224_v51 = vrot.slane %v2222_v41, 4  ;;  %v2227_v59 = vrot.slane %v2225_v52, 5  ;;  %v2245_v60 = vshll.u32 %v2160_v27, 16  ;;  %v4177_v52 = vpop.f32.mrf.mxu0 }
  0xd6   : > { %v2233_v62 = vrot.slane %v2231_v53, 5  ;;  %v2238_v63 = vrot.slane %v2236_v54, 4  ;;  %v2241_v0 = vrot.slane %v2239_v55, 5  ;;  %v2448_v13 = vmul.f32 %v4133_v23, %v2432_v48 }
  0xd7   : > { %1846 = vmatmul.bf16.gmra.mxu1 %v1778_v58  ;;  %v2228_v3 = vor.u32 %v2227_v59, %v2224_v51  ;;  %v2247_v5 = vrot.slane %v2245_v60, 5  ;;  %v2449_v8 = vmul.f32 %v4133_v23, %v2433_v49  ;;  %v2450_v6 = vmul.f32 %v4133_v23, %v2434_v57  ;;  %v4182_v58 = vpop.f32.mrf.mxu1  ;;  %v3233_v51 = vld [vmem:[%s3536_s12 + $0x40] sm:$0xf] }
  0xd8   : > { %v2242_v10 = vor.u32 %v2241_v0, %v2238_v63  ;;  %v2463_v11 = vadd.f32 %v4144_v32, %v2447_v1  ;;  %v1893_v12 = vunpack.c.l.bf16 %v3171_v61  ;;  %v2464_v16 = vadd.f32 %v4144_v32, %v2448_v13  ;;  %v3234_v63 = vld [vmem:[%s3536_s12 + $0x44] sm:$0x1] }
  0xd9   : > { %v2229_v15 = vrot.slane %v2228_v3, 4  ;;  %v2465_v19 = vadd.f32 %v4144_v32, %v2449_v8  ;;  %v1894_v20 = vunpack.c.l.bf16 %v3172_v2  ;;  %v2466_v22 = vadd.f32 %v4144_v32, %v2450_v6  ;;  %v3236_v6 = vld [vmem:[%s3536_s12 + $0x4c] sm:$0x1] }
  0xda   : > { %v2243_v21 = vrot.slane %v2242_v10, 4  ;;  %v2479_v24 = vmax.f32 %v2463_v11, 0.0  ;;  %v1901_v26 = vmul.f32 %v4133_v23, %v1893_v12  ;;  %v2480_v7 = vmax.f32 %v2464_v16, 0.0 }
  0xdb   : > { %v2234_v28 = vsel %vm3766_vm5, %v2229_v15, %v2233_v62  ;;  %v2481_v29 = vmax.f32 %v2465_v19, 0.0  ;;  %v1902_v30 = vmul.f32 %v4133_v23, %v1894_v20  ;;  %v2482_v17 = vmax.f32 %v2466_v22, 0.0 }
  0xdc   : > { %v2248_v25 = vsel %vm3766_vm5, %v2243_v21, %v2247_v5  ;;  %v2306_v4 = vunpack.c.l.b16 %v2234_v28  ;;  %v2495_v34 = vpack.c.bf16 %v2479_v24, %v2479_v24  ;;  %v2496_v36 = vpack.c.bf16 %v2480_v7, %v2480_v7  ;;  %v3235_v5 = vld [vmem:[%s3536_s12 + $0x48] sm:$0xf] }
  0xdd   : > { %v2307_v35 = vunpack.c.l.b16 %v2248_v25  ;;  %v2497_v14 = vpack.c.bf16 %v2481_v29, %v2481_v29  ;;  %v1909_v37 = vadd.f32 %v4144_v32, %v1901_v26  ;;  %v2498_v40 = vpack.c.bf16 %v2482_v17, %v2482_v17 }
  0xde   : > { %v3303_v33 = vrot.slane %v2495_v34, 9  ;;  %v1910_v42 = vadd.f32 %v4144_v32, %v1902_v30  ;;  %v1624_v44 = vunpack.c.l.bf16 %v3101_v31  ;;  %v2533_v46 = vrot.slane %v2496_v36, 5 }
  0xdf   : > { %v2312_v45 = vpack.c.b16 %v2307_v35, %v2306_v4  ;;  %v3304_v47 = vrot.slane %v2497_v14, 9  ;;  %v1917_v48 = vmax.f32 %v1909_v37, 0.0  ;;  %v2537_v49 = vrot.slane %v2498_v40, 5  ;;  %v3293_v14 = vld [vmem:[%s3536_s12 + $0x30] sm:$0xe] }
  0xe0   : > { %v1918_v50 = vmax.f32 %v1910_v42, 0.0  ;;  %v1625_v27 = vunpack.c.l.bf16 %v3102_v38  ;;  %v1626_v41 = vunpack.c.l.bf16 %v3103_v39  ;;  %v2534_v53 = vsel %vm3618_vm2, %v3303_v33, %v2533_v46  ;;  %v4205_v33 = vpop.f32.mrf.mxu0  ;;  %v3294_v46 = vld [vmem:[%s3536_s12 + $0x34] sm:$0x1] }
  0xe1   : > { %2384 = vmatmul.bf16.gmra.mxu3 %v2312_v45  ;;  %v1925_v54 = vpack.c.bf16 %v1917_v48, %v1917_v48  ;;  %v1627_v55 = vunpack.c.l.bf16 %v3104_v43  ;;  %v1640_v57 = vmul.f32 %v4133_v23, %v1624_v44  ;;  %v2538_v59 = vsel %vm3618_vm2, %v3304_v47, %v2537_v49  ;;  %v4209_v47 = vpop.f32.mrf.mxu1 }
  0xe2   : > { %v2582_v60 = vunpack.c.l.b16 %v2534_v53  ;;  %v1926_v61 = vpack.c.bf16 %v1918_v50, %v1918_v50  ;;  %v1641_v62 = vmul.f32 %v4133_v23, %v1625_v27  ;;  %v2583_v0 = vunpack.c.l.b16 %v2538_v59  ;;  %v3295_v27 = vld [vmem:[%s3536_s12 + $0x38] sm:$0xe] }
  0xe3   : > { %v1966_v1 = vunpack.c.l.b16 %v1925_v54  ;;  %v1642_v2 = vmul.f32 %v4133_v23, %v1626_v41  ;;  %v1643_v3 = vmul.f32 %v4133_v23, %v1627_v55  ;;  %v1656_v8 = vadd.f32 %v4144_v32, %v1640_v57 }
  0xe4   : > { %v1967_v13 = vunpack.c.l.b16 %v1926_v61  ;;  %v1657_v10 = vadd.f32 %v4144_v32, %v1641_v62  ;;  %v2097_v11 = vunpack.c.l.bf16 %v3233_v51  ;;  %v2589_v12 = vpack.c.b16 %v2583_v0, %v2582_v60  ;;  %v4216_v51 = vpop.f32.mrf.mxu2  ;;  %v3296_v62 = vld [vmem:[%s3536_s12 + $0x3c] sm:$0x1] }
  0xe5   : > { %v1658_v15 = vadd.f32 %v4144_v32, %v1642_v2  ;;  %v1659_v16 = vadd.f32 %v4144_v32, %v1643_v3  ;;  %v2098_v19 = vunpack.c.l.bf16 %v3234_v63  ;;  %v1672_v21 = vmax.f32 %v1656_v8, 0.0 }
  0xe6   : > { %v1971_v20 = vpack.c.b16 %v1967_v13, %v1966_v1  ;;  %v1673_v22 = vmax.f32 %v1657_v10, 0.0  ;;  %v2099_v24 = vunpack.c.l.bf16 %v3235_v5  ;;  %2657 = vmatmul.bf16.gmra.mxu0 %v2589_v12  ;;  %v2100_v7 = vunpack.c.l.bf16 %v3236_v6 }
  0xe7   : > { %v1674_v26 = vmax.f32 %v1658_v15, 0.0  ;;  %v1675_v28 = vmax.f32 %v1659_v16, 0.0  ;;  %v2113_v29 = vmul.f32 %v4133_v23, %v2097_v11  ;;  %v1688_v30 = vpack.c.bf16 %v1672_v21, %v1672_v21  ;;  %v3297_v16 = vld [vmem:[%s3536_s12 + $0x40] sm:$0xe] }
  0xe8   : > { %2047 = vmatmul.bf16.gmra.mxu2 %v1971_v20  ;;  %v1689_v31 = vpack.c.bf16 %v1673_v22, %v1673_v22  ;;  %v2114_v25 = vmul.f32 %v4133_v23, %v2098_v19  ;;  %v2115_v4 = vmul.f32 %v4133_v23, %v2099_v24  ;;  %v2116_v35 = vmul.f32 %v4133_v23, %v2100_v7  ;;  %v4220_v19 = vpop.f32.mrf.mxu3 }
  0xe9   : > { %v1690_v17 = vpack.c.bf16 %v1674_v26, %v1674_v26  ;;  %v1691_v34 = vpack.c.bf16 %v1675_v28, %v1675_v28  ;;  %v2129_v36 = vadd.f32 %v4144_v32, %v2113_v29  ;;  %v3113_v37 = vrot.slane %v1688_v30, 9  ;;  %v3298_v26 = vld [vmem:[%s3536_s12 + $0x44] sm:$0x1]  ;;  %v4224_v28 = vpop.f32.mrf.mxu0 }
  0xea   : > { %v1730_v38 = vrot.slane %v1689_v31, 5  ;;  %v2130_v39 = vadd.f32 %v4144_v32, %v2114_v25  ;;  %v2131_v40 = vadd.f32 %v4144_v32, %v2115_v4  ;;  %v2132_v44 = vadd.f32 %v4144_v32, %v2116_v35  ;;  %v3299_v25 = vld [vmem:[%s3536_s12 + $0x48] sm:$0xe]  ;;  %v4229_v4 = vpop.f32.mrf.mxu1 }
  0xeb   : > { %v3114_v42 = vrot.slane %v1690_v17, 9  ;;  %v1734_v43 = vrot.slane %v1691_v34, 5  ;;  %v2145_v45 = vmax.f32 %v2129_v36, 0.0  ;;  %v2435_v41 = vunpack.c.l.bf16 %v3293_v14  ;;  %v3300_v36 = vld [vmem:[%s3536_s12 + $0x4c] sm:$0x1] }
  0xec   : > { %v1731_v48 = vsel %vm3618_vm2, %v3113_v37, %v1730_v38  ;;  %v2146_v49 = vmax.f32 %v2130_v39, 0.0  ;;  %v2147_v50 = vmax.f32 %v2131_v40, 0.0  ;;  %v2148_v55 = vmax.f32 %v2132_v44, 0.0 }
  0xed   : > { %v1735_v53 = vsel %vm3618_vm2, %v3114_v42, %v1734_v43  ;;  %v1773_v54 = vunpack.c.l.b16 %v1731_v48  ;;  %v2161_v57 = vpack.c.bf16 %v2145_v45, %v2145_v45  ;;  %v2436_v63 = vunpack.c.l.bf16 %v3294_v46 }
  0xee   : > { %v1774_v59 = vunpack.c.l.b16 %v1735_v53  ;;  %v2162_v60 = vpack.c.bf16 %v2146_v49, %v2146_v49  ;;  %v2163_v61 = vpack.c.bf16 %v2147_v50, %v2147_v50  ;;  %v2164_v0 = vpack.c.bf16 %v2148_v55, %v2148_v55 }
  0xef   : > { %v2250_v1 = vshrl.u32 %v2161_v57, 16  ;;  %v2253_v2 = vshll.u32 %v2161_v57, 16  ;;  %v2437_v3 = vunpack.c.l.bf16 %v3295_v27  ;;  %v2438_v15 = vunpack.c.l.bf16 %v3296_v62  ;;  %v4239_v27 = vpop.f32.mrf.mxu2 }
  0xf0   : > { %v1779_v5 = vpack.c.b16 %v1774_v59, %v1773_v54  ;;  %v2259_v13 = vshll.u32 %v2162_v60, 16  ;;  %v2264_v8 = vshrl.u32 %v2163_v61, 16  ;;  %v2267_v10 = vshll.u32 %v2163_v61, 16 }
  0xf1   : > { %v2252_v6 = vrot.slane %v2250_v1, 4  ;;  %v2255_v11 = vrot.slane %v2253_v2, 5  ;;  %v2273_v12 = vshll.u32 %v2164_v0, 16  ;;  %v2451_v24 = vmul.f32 %v4133_v23, %v2435_v41  ;;  %v3105_v2 = vld [vmem:[%s3536_s12 + $0x38] sm:$0xe]  ;;  %v4248_v56 = vpop.f32.mrf.mxu0 }
  0xf2   : > { %1851 = vmatmul.bf16.gmra.mxu1 %v1779_v5  ;;  %v2261_v20 = vrot.slane %v2259_v13, 5  ;;  %v2266_v21 = vrot.slane %v2264_v8, 4  ;;  %v2269_v22 = vrot.slane %v2267_v10, 5  ;;  %v2452_v30 = vmul.f32 %v4133_v23, %v2436_v63 }
  0xf3   : > { %v2256_v7 = vor.u32 %v2255_v11, %v2252_v6  ;;  %v2275_v29 = vrot.slane %v2273_v12, 5  ;;  %v2453_v31 = vmul.f32 %v4133_v23, %v2437_v3  ;;  %v2454_v34 = vmul.f32 %v4133_v23, %v2438_v15  ;;  %v3106_v3 = vld [vmem:[%s3536_s12 + $0x3c] sm:$0x1]  ;;  %v4251_v6 = vpop.f32.mrf.mxu1  ;;  %v4253_v11 = vpop.f32.mrf.mxu3 }
  0xf4   : > { %v2270_v17 = vor.u32 %v2269_v22, %v2266_v21  ;;  %v2467_v35 = vadd.f32 %v4144_v32, %v2451_v24  ;;  %v2439_v14 = vunpack.c.l.bf16 %v3297_v16  ;;  %v2468_v38 = vadd.f32 %v4144_v32, %v2452_v30  ;;  %v3107_v21 = vld [vmem:[%s3536_s12 + $0x40] sm:$0xe] }
  0xf5   : > { %v2257_v37 = vrot.slane %v2256_v7, 4  ;;  %v2469_v39 = vadd.f32 %v4144_v32, %v2453_v31  ;;  %v2440_v40 = vunpack.c.l.bf16 %v3298_v26  ;;  %v2470_v43 = vadd.f32 %v4144_v32, %v2454_v34  ;;  %v3108_v26 = vld [vmem:[%s3536_s12 + $0x44] sm:$0x1]  ;;  %s3359_s12 = sshll.u32 %s4353_s19, 6 }
  0xf6   : > { %v2271_v42 = vrot.slane %v2270_v17, 4  ;;  %v2483_v44 = vmax.f32 %v2467_v35, 0.0  ;;  %v2441_v45 = vunpack.c.l.bf16 %v3299_v25  ;;  %v2484_v48 = vmax.f32 %v2468_v38, 0.0  ;;  %s4319_s27 = scalar_lea.vmem %s4346_s4, %s3359_s12 }
  0xf7   : > { %v2262_v46 = vsel %vm3766_vm5, %v2257_v37, %v2261_v20  ;;  %v2485_v49 = vmax.f32 %v2469_v39, 0.0  ;;  %v2442_v50 = vunpack.c.l.bf16 %v3300_v36  ;;  %v2486_v54 = vmax.f32 %v2470_v43, 0.0 }
  0xf8   : > { %v2276_v41 = vsel %vm3766_vm5, %v2271_v42, %v2275_v29  ;;  %v2308_v53 = vunpack.c.l.b16 %v2262_v46  ;;  %v2499_v55 = vpack.c.bf16 %v2483_v44, %v2483_v44  ;;  %v2500_v59 = vpack.c.bf16 %v2484_v48, %v2484_v48  ;;  %v1036_v46 = vpop.f32.mrf.mxu2 }
  0xf9   : > { %v2309_v57 = vunpack.c.l.b16 %v2276_v41  ;;  %v2501_v60 = vpack.c.bf16 %v2485_v49, %v2485_v49  ;;  %v2455_v61 = vmul.f32 %v4133_v23, %v2439_v14  ;;  %v2502_v62 = vpack.c.bf16 %v2486_v54, %v2486_v54 }
  0xfa   : > { %v3305_v63 = vrot.slane %v2499_v55, 9  ;;  %v2456_v0 = vmul.f32 %v4133_v23, %v2440_v40  ;;  %v2457_v1 = vmul.f32 %v4133_v23, %v2441_v45  ;;  %v2541_v13 = vrot.slane %v2500_v59, 5 }
  0xfb   : > { %v2313_v5 = vpack.c.b16 %v2309_v57, %v2308_v53  ;;  %v3306_v8 = vrot.slane %v2501_v60, 9  ;;  %v2458_v10 = vmul.f32 %v4133_v23, %v2442_v50  ;;  %v2545_v12 = vrot.slane %v2502_v62, 5  ;;  %v4269_v53 = vpop.f32.mrf.mxu0  ;;  %v4273_v60 = vpop.f32.mrf.mxu1 }
  0xfc   : > { %v2471_v15 = vadd.f32 %v4144_v32, %v2455_v61  ;;  %v2472_v16 = vadd.f32 %v4144_v32, %v2456_v0  ;;  %v2473_v20 = vadd.f32 %v4144_v32, %v2457_v1  ;;  %v2542_v22 = vsel %vm3618_vm2, %v3305_v63, %v2541_v13 }
  0xfd   : > { %2389 = vmatmul.bf16.gmra.mxu3 %v2313_v5  ;;  %v2474_v24 = vadd.f32 %v4144_v32, %v2458_v10  ;;  %v1628_v7 = vunpack.c.l.bf16 %v3105_v2  ;;  %v1629_v29 = vunpack.c.l.bf16 %v3106_v3  ;;  %v2546_v30 = vsel %vm3618_vm2, %v3306_v8, %v2545_v12  ;;  %v1227_v3 = vpop.f32.mrf.mxu3 }
  0xfe   : > { %v2584_v31 = vunpack.c.l.b16 %v2542_v22  ;;  %v2487_v25 = vmax.f32 %v2471_v15, 0.0  ;;  %v2488_v17 = vmax.f32 %v2472_v16, 0.0  ;;  %v2585_v34 = vunpack.c.l.b16 %v2546_v30 }
  0xff   : > { %v2489_v35 = vmax.f32 %v2473_v20, 0.0  ;;  %v2490_v36 = vmax.f32 %v2474_v24, 0.0  ;;  %v1630_v14 = vunpack.c.l.bf16 %v3107_v21  ;;  %v1631_v39 = vunpack.c.l.bf16 %v3108_v26 }
 0x100   : > { %v2503_v37 = vpack.c.bf16 %v2487_v25, %v2487_v25  ;;  %v2504_v38 = vpack.c.bf16 %v2488_v17, %v2488_v17  ;;  %v1644_v40 = vmul.f32 %v4133_v23, %v1628_v7  ;;  %v2590_v42 = vpack.c.b16 %v2585_v34, %v2584_v31 }
 0x101   : > { %v2505_v43 = vpack.c.bf16 %v2489_v35, %v2489_v35  ;;  %v2506_v44 = vpack.c.bf16 %v2490_v36, %v2490_v36  ;;  %v1645_v45 = vmul.f32 %v4133_v23, %v1629_v29  ;;  %v1646_v50 = vmul.f32 %v4133_v23, %v1630_v14  ;;  %v1038_v29 = vpop.f32.mrf.mxu2 }
 0x102   : > { %v3307_v48 = vrot.slane %v2503_v37, 9  ;;  %v2549_v49 = vrot.slane %v2504_v38, 5  ;;  %v1647_v41 = vmul.f32 %v4133_v23, %v1631_v39  ;;  %2662 = vmatmul.bf16.gmra.mxu0 %v2590_v42  ;;  %v1660_v57 = vadd.f32 %v4144_v32, %v1644_v40 }
 0x103   : > { %v3308_v54 = vrot.slane %v2505_v43, 9  ;;  %v2553_v55 = vrot.slane %v2506_v44, 5  ;;  %v1661_v59 = vadd.f32 %v4144_v32, %v1645_v45  ;;  %v1662_v62 = vadd.f32 %v4144_v32, %v1646_v50  ;;  %v4281_v26 = vpop.f32.mrf.mxu0  ;;  %v755_v30 = vpop.f32.mrf.mxu1 }
 0x104   : > { %v2550_v61 = vsel %vm3618_vm2, %v3307_v48, %v2549_v49  ;;  %v1663_v63 = vadd.f32 %v4144_v32, %v1647_v41  ;;  %v1676_v1 = vmax.f32 %v1660_v57, 0.0  ;;  %v772_v17 = vadd.f32 %v755_v30, %v4224_v28 }
 0x105   : > { %v2554_v23 = vsel %vm3618_vm2, %v3308_v54, %v2553_v55  ;;  %v2586_v0 = vunpack.c.l.b16 %v2550_v61  ;;  %v1677_v2 = vmax.f32 %v1661_v59, 0.0  ;;  %v1678_v13 = vmax.f32 %v1662_v62, 0.0  ;;  %v1229_v14 = vpop.f32.mrf.mxu3 }
 0x106   : > { %v2587_v5 = vunpack.c.l.b16 %v2554_v23  ;;  %v1679_v8 = vmax.f32 %v1663_v63, 0.0  ;;  %v1692_v10 = vpack.c.bf16 %v1676_v1, %v1676_v1  ;;  %v1053_v35 = vadd.f32 %v1036_v46, %v772_v17 }
 0x107   : > { %v1693_v12 = vpack.c.bf16 %v1677_v2, %v1677_v2  ;;  %v1694_v16 = vpack.c.bf16 %v1678_v13, %v1678_v13 }
 0x108   : > { %v2591_v15 = vpack.c.b16 %v2587_v5, %v2586_v0  ;;  %v1695_v20 = vpack.c.bf16 %v1679_v8, %v1679_v8  ;;  %v3115_v21 = vrot.slane %v1692_v10, 9  ;;  %v1244_v37 = vadd.f32 %v1227_v3, %v1053_v35 }
 0x109   : > { %v1738_v22 = vrot.slane %v1693_v12, 5  ;;  %v3116_v24 = vrot.slane %v1694_v16, 9  ;;  %v1041_v43 = vpop.f32.mrf.mxu2  ;;  %v770_v5 = vadd.f32 %v4251_v6, %v4177_v52 }
 0x10a   : > { %2667 = vmatmul.bf16.vlgmr.msra.gmra.mxu2 %v2591_v15  ;;  %v1742_v32 = vrot.slane %v1695_v20, 5 }
 0x10b   : > { %v1739_v7 = vsel %vm3618_vm2, %v3115_v21, %v1738_v22  ;;  %v1569_v38 = vpop.f32.mrf.mxu0  ;;  %v757_v40 = vpop.f32.mrf.mxu1  ;;  %v1051_v10 = vadd.f32 %v4216_v51, %v770_v5 }
 0x10c   : > { %v1743_v31 = vsel %vm3618_vm2, %v3116_v24, %v1742_v32  ;;  %v1775_v25 = vunpack.c.l.b16 %v1739_v7  ;;  %v4288_v39 = vadd.f32 %v1569_v38, %v1244_v37  ;;  %v773_v42 = vadd.f32 %v757_v40, %v4248_v56 }
 0x10d   : > { %v1776_v34 = vunpack.c.l.b16 %v1743_v31  ;;  %v1232_v18 = vpop.f32.mrf.mxu3  ;;  %v1242_v21 = vadd.f32 %v4220_v19, %v1051_v10 }
 0x10e   : > { %v1054_v44 = vadd.f32 %v1038_v29, %v773_v42 }
 0x10f   : > { %v1780_v36 = vpack.c.b16 %v1776_v34, %v1775_v25  ;;  %v1584_v6 = vadd.f32 %v4269_v53, %v1242_v21 }
 0x110   : > { %v1245_v45 = vadd.f32 %v1229_v14, %v1054_v44 }
 0x111   : > { %1856 = vmatmul.bf16.gmra.mxu1 %v1780_v36  ;;  %v1043_v41 = vpop.f32.mrf.mxu2 }
 0x113   : > { %v1571_v48 = vpop.f32.mrf.mxu0  ;;  %v760_v28 = vpop.f32.mrf.mxu1 }
 0x114   : > { %v4291_v49 = vadd.f32 %v1571_v48, %v1245_v45  ;;  %v774_v46 = vadd.f32 %v760_v28, %v4158_v9 }
 0x115   : > { %v1234_v57 = vpop.f32.mrf.mxu3 }
 0x116   : > { %v1055_v50 = vadd.f32 %v1041_v43, %v774_v46 }
 0x118   : > { %v1246_v54 = vadd.f32 %v1232_v18, %v1055_v50 }
 0x119   : > { %v1046_v23 = vpop.f32.mrf.mxu2 }
 0x11b   : > { %v1574_v55 = vpop.f32.mrf.mxu0  ;;  %v762_v61 = vpop.f32.mrf.mxu1 }
 0x11c   : > { %v4294_v59 = vadd.f32 %v1574_v55, %v1246_v54  ;;  %v775_v56 = vadd.f32 %v762_v61, %v4182_v58 }
 0x11d   : > { %v1237_v9 = vpop.f32.mrf.mxu3 }
 0x11e   : > { %v1056_v62 = vadd.f32 %v1043_v41, %v775_v56 }
 0x120   : > { %v1247_v63 = vadd.f32 %v1234_v57, %v1056_v62 }
 0x121   : > { %v1048_v15 = vpop.f32.mrf.mxu2 }
 0x123   : > { %v1576_v0 = vpop.f32.mrf.mxu0  ;;  %v765_v2 = vpop.f32.mrf.mxu1 }
 0x124   : > { %v4297_v1 = vadd.f32 %v1576_v0, %v1247_v63  ;;  %v776_v3 = vadd.f32 %v765_v2, %v4209_v47  ;;  %v771_v47 = vadd.f32 %v4273_v60, %v4205_v33 }
 0x125   : > { %v1239_v24 = vpop.f32.mrf.mxu3 }
 0x126   : > { %v1057_v13 = vadd.f32 %v1046_v23, %v776_v3  ;;  %v1052_v51 = vadd.f32 %v4239_v27, %v771_v47 }
 0x128   : > { %v1248_v8 = vadd.f32 %v1237_v9, %v1057_v13 }
 0x129   : > { %v2033_v31 = vpop.f32.mrf.mxu2 }
 0x12b   : > { %v1579_v12 = vpop.f32.mrf.mxu0  ;;  %v767_v16 = vpop.f32.mrf.mxu1 }
 0x12c   : > { %v4303_v58 = vadd.f32 %v1579_v12, %v1248_v8  ;;  %v777_v20 = vadd.f32 %v767_v16, %v4229_v4  ;;  %v1243_v4 = vadd.f32 %v4253_v11, %v1052_v51 }
 0x12e   : > { %v1058_v22 = vadd.f32 %v1048_v15, %v777_v20  ;;  %v1585_v33 = vadd.f32 %v4281_v26, %v1243_v4 }
 0x130   : > { %v1249_v52 = vadd.f32 %v1239_v24, %v1058_v22 }
 0x131   : > { %v2035_v35 = vpop.f32.mrf.mxu2 }
 0x133   : > { %v1581_v32 = vpop.f32.mrf.mxu0 }
 0x134   : > { %v4311_v7 = vadd.f32 %v1581_v32, %v1249_v52  ;;  %v2375_v25 = vpop.f32.mrf.mxu3 }
 0x137   : > { %v1842_v29 = vpop.f32.mrf.mxu1 }
 0x138   : > { %v1862_v30 = vadd.f32 %v1842_v29, %v1584_v6 }
 0x139   : > { %v2038_v45 = vpop.f32.mrf.mxu2 }
 0x13a   : > { %v2053_v19 = vadd.f32 %v2033_v31, %v1862_v30 }
 0x13c   : > { %v2395_v17 = vadd.f32 %v2375_v25, %v2053_v19  ;;  %v2377_v11 = vpop.f32.mrf.mxu3 }
 0x13f   : > { %v1844_v60 = vpop.f32.mrf.mxu1 }
 0x140   : > { %v1863_v34 = vadd.f32 %v1844_v60, %v1585_v33 }
 0x141   : > { %v2040_v50 = vpop.f32.mrf.mxu2 }
 0x142   : > { %v2054_v36 = vadd.f32 %v2035_v35, %v1863_v34 }
 0x144   : > { %v2396_v14 = vadd.f32 %v2377_v11, %v2054_v36 }
 0x146   : > { %v2653_v27 = vpop.f32.mrf.mxu0 }
 0x147   : > { %v2673_v53 = vadd.f32 %v2653_v27, %v2395_v17 }
 0x149   : > { %2697 = vst [vmem:[%s4319_s27] sm:$0xff] %v2673_v53  ;;  %v2718_v38 = vmul.f32 %v2673_v53, %v2673_v53  ;;  %v2380_v28 = vpop.f32.mrf.mxu3 }
 0x14e   : > { %v2655_v37 = vpop.f32.mrf.mxu0 }
 0x14f   : > { %v2674_v26 = vadd.f32 %v2655_v37, %v2396_v14 }
 0x150   : > { %v2043_v2 = vpop.f32.mrf.mxu2 }
 0x151   : > { %2698 = vst [vmem:[%s4319_s27 + $0x8] sm:$0xff] %v2674_v26  ;;  %v2705_v40 = vadd.f32 %v2674_v26, %v2673_v53  ;;  %v2719_v42 = vmul.f32 %v2674_v26, %v2674_v26  ;;  %v2382_v63 = vpop.f32.mrf.mxu3 }
 0x153   : > { %v2726_v43 = vadd.f32 %v2719_v42, %v2718_v38 }
 0x154   : > { %v1847_v44 = vpop.f32.mrf.mxu1 }
 0x155   : > { %v1864_v18 = vadd.f32 %v1847_v44, %v4288_v39 }
 0x157   : > { %v2055_v48 = vadd.f32 %v2038_v45, %v1864_v18 }
 0x158   : > { %v2045_v10 = vpop.f32.mrf.mxu2 }
 0x159   : > { %v2397_v41 = vadd.f32 %v2380_v28, %v2055_v48 }
 0x15c   : > { %v1849_v46 = vpop.f32.mrf.mxu1 }
 0x15d   : > { %v1865_v54 = vadd.f32 %v1849_v46, %v4291_v49 }
 0x15f   : > { %v2056_v61 = vadd.f32 %v2040_v50, %v1865_v54 }
 0x161   : > { %v2398_v0 = vadd.f32 %v2382_v63, %v2056_v61 }
 0x163   : > { %v2658_v55 = vpop.f32.mrf.mxu0 }
 0x164   : > { %v2675_v57 = vadd.f32 %v2658_v55, %v2397_v41  ;;  %v2385_v15 = vpop.f32.mrf.mxu3 }
 0x166   : > { %2699 = vst [vmem:[%s4319_s27 + $0x10] sm:$0xff] %v2675_v57  ;;  %v2706_v56 = vadd.f32 %v2705_v40, %v2675_v57  ;;  %v2720_v62 = vmul.f32 %v2675_v57, %v2675_v57 }
 0x168   : > { %v2727_v23 = vadd.f32 %v2726_v43, %v2720_v62 }
 0x16b   : > { %v2660_v3 = vpop.f32.mrf.mxu0  ;;  %v2048_v47 = vpop.f32.mrf.mxu2 }
 0x16c   : > { %v2676_v39 = vadd.f32 %v2660_v3, %v2398_v0  ;;  %v2387_v32 = vpop.f32.mrf.mxu3 }
 0x16e   : > { %2700 = vst [vmem:[%s4319_s27 + $0x18] sm:$0xff] %v2676_v39  ;;  %v2707_v9 = vadd.f32 %v2706_v56, %v2676_v39  ;;  %v2721_v5 = vmul.f32 %v2676_v39, %v2676_v39 }
 0x16f   : > { %v1852_v13 = vpop.f32.mrf.mxu1 }
 0x170   : > { %v2728_v8 = vadd.f32 %v2727_v23, %v2721_v5  ;;  %v1866_v49 = vadd.f32 %v1852_v13, %v4294_v59 }
 0x172   : > { %v2057_v12 = vadd.f32 %v2043_v2, %v1866_v49 }
 0x173   : > { %v2050_v31 = vpop.f32.mrf.mxu2 }
 0x174   : > { %v2399_v20 = vadd.f32 %v2385_v15, %v2057_v12 }
 0x177   : > { %v1854_v16 = vpop.f32.mrf.mxu1 }
 0x178   : > { %v1867_v21 = vadd.f32 %v1854_v16, %v4297_v1 }
 0x17a   : > { %v2058_v52 = vadd.f32 %v2045_v10, %v1867_v21 }
 0x17c   : > { %v2400_v30 = vadd.f32 %v2387_v32, %v2058_v52 }
 0x17f   : > { %v2663_v22 = vpop.f32.mrf.mxu0 }
 0x180   : > { %v2677_v24 = vadd.f32 %v2663_v22, %v2399_v20  ;;  %v2390_v17 = vpop.f32.mrf.mxu3 }
 0x182   : > { %2701 = vst [vmem:[%s4319_s27 + $0x20] sm:$0xff] %v2677_v24  ;;  %v2708_v6 = vadd.f32 %v2707_v9, %v2677_v24  ;;  %v2722_v51 = vmul.f32 %v2677_v24, %v2677_v24 }
 0x184   : > { %v2729_v29 = vadd.f32 %v2728_v8, %v2722_v51 }
 0x187   : > { %v2665_v59 = vpop.f32.mrf.mxu0 }
 0x188   : > { %v2678_v4 = vadd.f32 %v2665_v59, %v2400_v30  ;;  %v2392_v40 = vpop.f32.mrf.mxu3 }
 0x18a   : > { %2702 = vst [vmem:[%s4319_s27 + $0x28] sm:$0xff] %v2678_v4  ;;  %v2709_v19 = vadd.f32 %v2708_v6, %v2678_v4  ;;  %v2723_v25 = vmul.f32 %v2678_v4, %v2678_v4 }
 0x18c   : > { %v2730_v33 = vadd.f32 %v2729_v29, %v2723_v25 }
 0x18d   : > { %v2668_v35 = vpop.f32.mrf.mxu2 }
 0x18e   : > { %v1857_v60 = vpop.f32.mrf.mxu1 }
 0x18f   : > { %v1868_v1 = vadd.f32 %v1857_v60, %v4303_v58 }
 0x191   : > { %v2059_v34 = vadd.f32 %v2048_v47, %v1868_v1 }
 0x193   : > { %v2401_v27 = vadd.f32 %v2390_v17, %v2059_v34 }
 0x195   : > { %v2679_v53 = vadd.f32 %v2668_v35, %v2401_v27  ;;  %v2670_v43 = vpop.f32.mrf.mxu2 }
 0x196   : > { %v1859_v36 = vpop.f32.mrf.mxu1 }
 0x197   : > { %2703 = vst [vmem:[%s4319_s27 + $0x30] sm:$0xff] %v2679_v53  ;;  %v2710_v11 = vadd.f32 %v2709_v19, %v2679_v53  ;;  %v2724_v14 = vmul.f32 %v2679_v53, %v2679_v53  ;;  %v1869_v37 = vadd.f32 %v1859_v36, %v4311_v7 }
 0x199   : > { %v2731_v26 = vadd.f32 %v2730_v33, %v2724_v14  ;;  %v2060_v38 = vadd.f32 %v2050_v31, %v1869_v37 }
 0x19b   : > { %v2402_v42 = vadd.f32 %v2392_v40, %v2060_v38 }
 0x19d   : > { %v2680_v44 = vadd.f32 %v2670_v43, %v2402_v42 }
 0x19f   : > { %2704 = vst [vmem:[%s4319_s27 + $0x38] sm:$0xff] %v2680_v44  ;;  %v2711_v58 = vadd.f32 %v2710_v11, %v2680_v44  ;;  %v2725_v45 = vmul.f32 %v2680_v44, %v2680_v44 }
 0x1a1   : > { %v2712_v18 = vrot.slane %v2711_v58, 4  ;;  %v2732_v48 = vadd.f32 %v2731_v26, %v2725_v45 }
 0x1a3   : > { %v2713_v28 = vadd.f32 %v2712_v18, %v2711_v58  ;;  %v2733_v46 = vrot.slane %v2732_v48, 4 }
 0x1a5   : > { %v2714_v50 = vrot.slane %v2713_v28, 2  ;;  %v2734_v41 = vadd.f32 %v2733_v46, %v2732_v48 }
 0x1a7   : > { %v2715_v54 = vadd.f32 %v2714_v50, %v2713_v28  ;;  %v2735_v55 = vrot.slane %v2734_v41, 2 }
 0x1a9   : > { %v2716_v57 = vrot.slane %v2715_v54, 1  ;;  %v2736_v7 = vadd.f32 %v2735_v55, %v2734_v41 }
 0x1ab   : > { %v2737_v61 = vrot.slane %v2736_v7, 1  ;;  %v2717_v56 = vadd.f32 %v2716_v57, %v2715_v54 }
 0x1ad   : > { %v2738_v62 = vadd.f32 %v2737_v61, %v2736_v7 }
 0x1af   : > { %v2740_v63 = vsel %vm2739_vm6, %v2717_v56, %v2738_v62 }
 0x1b0   : > { %2741 = vst [vmem:[%s235_s6] sm:$0x3] %v2740_v63 }
 0x1b1 PF: > { %s16_s18 = sadd.s32 1, %s3469_s18  }
 0x1b2   : > { %p13_p4 = scmp.ge.s32.totalorder %s16_s18, 4  }
 0x1b4   :  { %15 = sbr.rel (!%p13_p4) target bundleno = 1 (0x1), region = 88 }

</bundles_post_ra>
